<compile_context>
chip_gen: v7x
topology: tpu7x:2x2x1
jax: 0.10.0
libtpu: 0.0.40
codegen_flags: <defaults>
</compile_context>

<pallas_src>
import math

import jax
import jax.numpy as jnp
from jax.experimental import pallas as pl
from jax.experimental.pallas import tpu as pltpu

# ---------------- model configuration (small, consistent with the module) ----
IMG = 16          # img_size
PATCH = 4         # patch_size
IN_CH = 3         # in_channels
EMBED = 32        # embed_dim
DEPTH = 2         # number of TransformerEncoder blocks
HEADS = 4         # num_heads
MLP_RATIO = 4.0
CLASSES = 10
LANE = 128
CLASSES_PAD = LANE   # lane-dense classifier output width (sliced to CLASSES outside)
BATCH = 2

TAU = 2.0         # MultiStepLIFNode tau
V_TH = 1.0        # spike threshold (spikingjelly default)
LN_EPS = 1e-5     # nn.LayerNorm default eps

N_SPATIAL = (IMG // PATCH) ** 2      # 16 patches
N_TOKENS = N_SPATIAL + 1             # +1 class token = 17
HEAD_DIM = EMBED // HEADS            # 8
SCALE = HEAD_DIM ** (-0.5)
HIDDEN = int(EMBED * MLP_RATIO)      # 128
CPP = IN_CH * PATCH * PATCH          # 48  (flattened patch length)

# ---------------- packed-buffer static row offsets ---------------------------
# weight slab (bf16, 128 lanes wide):
WROWS_PER_BLOCK = EMBED + EMBED + EMBED + HIDDEN       # wqkv, wproj, w1, w2 = 224
W_BLK0 = CPP                                           # patch-proj rows 0:CPP
W_HEAD = CPP + DEPTH * WROWS_PER_BLOCK                 # 496
W_TOTAL = W_HEAD + EMBED                               # 528
# bias / affine slab (f32, 128 lanes wide):
B_BLK0 = N_TOKENS                                      # tokbias rows 0:N_TOKENS
B_LNG = N_TOKENS + 3 * DEPTH                           # 23
B_LNB = B_LNG + 1                                      # 24
B_BH = B_LNB + 1                                       # 25
B_TOTAL = B_BH + 1                                     # 26


def _vmem():
    # whole-array block resident in VMEM (total footprint is ~170 KB)
    return pl.BlockSpec(memory_space=pltpu.MemorySpace.VMEM)


# ---------------- in-kernel math helpers -------------------------------------
def _erf(x):
    # Abramowitz & Stegun 7.1.26, |abs err| < 1.5e-7 (f32-level accuracy).
    a1, a2, a3, a4, a5 = 0.254829592, -0.284496736, 1.421413741, -1.453152027, 1.061405429
    p = 0.3275911
    ax = jnp.abs(x)
    t = 1.0 / (1.0 + p * ax)
    poly = ((((a5 * t + a4) * t + a3) * t + a2) * t + a1) * t
    y = 1.0 - poly * jnp.exp(-ax * ax)
    return jnp.where(x >= 0, y, -y)


def _gelu(x):
    # exact (erf) GELU, matching torch.nn.GELU() default
    return 0.5 * x * (1.0 + _erf(x * 0.7071067811865476))


def _mxu(a, b):
    """2-D matmul with bf16 operands and f32 accumulation (MXU-friendly on
    v5e/v6e/v7x).  Casts are no-ops when the operand is already bf16."""
    return jnp.dot(a.astype(jnp.bfloat16), b.astype(jnp.bfloat16),
                   preferred_element_type=jnp.float32)


def _mxu_qkt(q, k):
    """q @ k^T expressed directly as a dot_general (no explicit transpose)."""
    return jax.lax.dot_general(q.astype(jnp.bfloat16), k.astype(jnp.bfloat16),
                               (((1,), (1,)), ((), ())),
                               preferred_element_type=jnp.float32)


# ---------------- fused Pallas kernel -----------------------------------------
def spikevit_kernel(p_ref, w_ref, b_ref, o_ref):
    """Entire SpikingViT forward in one kernel invocation.

    p_ref: (B, N_TOKENS, CPP) f32  patches; row 0 is all-zero (class-token slot)
    w_ref: (W_TOTAL, 128)    bf16  packed weights:
             rows [0:CPP]                        patch-projection (cols 0:D)
             per block d at base CPP + d*224:
               [+0 :+32 ] wqkv  (cols 0:3D)
               [+32:+64 ] wproj (cols 0:D)
               [+64:+96 ] w1    (cols 0:HIDDEN)
               [+96:+224] w2    (cols 0:D)
             rows [W_HEAD:W_HEAD+D]              classifier head (cols 0:128)
    b_ref: (B_TOTAL, 128)    f32   packed biases/affines:
             rows [0:N] tokbias (row0 = cls+pos[0], rows>=1 = conv_b+pos[i])
             per block d at base N + 3d: bproj, b1, b2
             rows 23/24/25: ln_gamma, ln_beta, head bias
    o_ref: (B, 128) f32  padded logits
    """
    N = N_TOKENS
    D = EMBED
    HD = HEAD_DIM
    inv_tau = 1.0 / TAU
    f32 = jnp.float32

    # ---- patch embedding: conv-as-matmul + (conv bias, cls, pos) fold -------
    # p row 0 is zero, so its projection is 0 and tokbias supplies cls + pos[0].
    tokbias = b_ref[0:N, 0:D]                                   # (17, 32) f32
    wc = w_ref[0:CPP, 0:D]                                      # (48, 32) bf16
    xs = [_mxu(p_ref[t], wc) + tokbias for t in range(BATCH)]   # B x (17, 32) f32

    # ---- encoder blocks (DEPTH small -> unrolled, tokens stay in registers) --
    for d in range(DEPTH):
        wb = W_BLK0 + d * WROWS_PER_BLOCK
        bb = B_BLK0 + 3 * d
        wqkv = w_ref[wb:wb + D, 0:3 * D]                        # (32, 96)  bf16
        wproj = w_ref[wb + D:wb + 2 * D, 0:D]                   # (32, 32)  bf16
        w1 = w_ref[wb + 2 * D:wb + 3 * D, 0:HIDDEN]             # (32, 128) bf16
        w2 = w_ref[wb + 3 * D:wb + 3 * D + HIDDEN, 0:D]         # (128, 32) bf16
        bproj = b_ref[bb:bb + 1, 0:D]                           # (1, 32)  f32
        b1 = b_ref[bb + 1:bb + 2, 0:HIDDEN]                     # (1, 128) f32
        b2 = b_ref[bb + 2:bb + 3, 0:D]                          # (1, 32)  f32

        # SpikeSelfAttention --------------------------------------------------
        qkv = [_mxu(xs[t], wqkv) for t in range(BATCH)]         # B x (17, 96) f32

        # MultiStepLIFNode: leading (batch) axis is the time axis -> sequential
        # carry; spikes stay as live values (no VMEM scratch round-trip).
        v = jnp.zeros((N, 3 * D), f32)
        spikes = []
        for t in range(BATCH):
            v = v + (qkv[t] - v) * inv_tau                      # charge (v_reset=0)
            fired = v >= V_TH                                   # fire
            spikes.append(fired.astype(f32))                    # binary spikes
            v = jnp.where(fired, 0.0, v)                        # hard reset (reuse mask)

        # attention is independent per batch element (B=2) ---------------------
        for t in range(BATCH):
            s = spikes[t]                                       # (17, 96) binary
            heads = []
            for h in range(HEADS):
                lo = h * HD
                qh = s[:, lo:lo + HD]
                kh = s[:, D + lo:D + lo + HD]
                vh = s[:, 2 * D + lo:2 * D + lo + HD]
                att = _mxu_qkt(qh, kh) * SCALE                  # (17, 17) f32
                # binary spikes -> att in [0, HD*SCALE] ~= [0, 2.83]: exp cannot
                # overflow, so the max-stabilization is dropped (XLU savings).
                e = jnp.exp(att)
                pnorm = e * pl.reciprocal(jnp.sum(e, axis=-1, keepdims=True),
                                          approx=True)
                heads.append(_mxu(pnorm, vh))                   # (17, 8) f32
            attn = jnp.concatenate(heads, axis=-1)              # (17, 32) head concat
            xs[t] = xs[t] + _mxu(attn, wproj) + bproj           # ONE out-proj + residual 1

        # MLP: fc1 -> GELU -> fc2 -> GELU (dropout = identity) ----------------
        for t in range(BATCH):
            h1 = _gelu(_mxu(xs[t], w1) + b1)                    # (17, 128)
            h2 = _gelu(_mxu(h1, w2) + b2)                       # (17, 32)
            xs[t] = xs[t] + h2                                  # residual 2

    # ---- final LayerNorm + head on the class token (per-token ops, so
    #      applying them only to token 0 equals head(norm(x))[:, 0]) ----------
    cls = jnp.concatenate([xs[t][0:1, :] for t in range(BATCH)], axis=0)  # (B, 32)
    mu = jnp.mean(cls, axis=-1, keepdims=True)
    var = jnp.mean((cls - mu) ** 2, axis=-1, keepdims=True)
    y = (cls - mu) * jax.lax.rsqrt(var + LN_EPS)
    y = y * b_ref[B_LNG:B_LNG + 1, 0:D] + b_ref[B_LNB:B_LNB + 1, 0:D]
    wh = w_ref[W_HEAD:W_HEAD + D, 0:CLASSES_PAD]                # (32, 128) bf16
    bh = b_ref[B_BH:B_BH + 1, 0:CLASSES_PAD]                    # (1, 128)  f32
    o_ref[...] = _mxu(y, wh) + bh                               # lane-dense logits


# ---------------- wrapper ------------------------------------------------------
def _pad_cols(w):
    return jnp.pad(w, ((0, 0), (0, LANE - w.shape[1])))


def spiking_vit_forward(x, params):
    B = x.shape[0]

    # im2col: non-overlapping patches (== Conv2d with stride == kernel).
    p = x.reshape(B, IN_CH, IMG // PATCH, PATCH, IMG // PATCH, PATCH)
    p = p.transpose(0, 2, 4, 1, 3, 5).reshape(B, N_SPATIAL, CPP)
    # Prepend an all-zero patch row for the class-token slot so the kernel never
    # concatenates along the (17-row, unaligned) token axis: zero-row @ W == 0.
    p_tok = jnp.concatenate([jnp.zeros((B, 1, CPP), jnp.float32), p], axis=1)

    # ---- packed bf16 weight slab (one prologue DMA) --------------------------
    segs = [_pad_cols(params['conv_w'].reshape(EMBED, CPP).T)]          # (48, 128)
    for blk in params['blocks']:
        segs += [_pad_cols(blk['wqkv']), _pad_cols(blk['wproj']),
                 _pad_cols(blk['w1']), _pad_cols(blk['w2'])]
    segs.append(_pad_cols(params['head_w']))                            # (32, 128)
    wbuf = jnp.concatenate(segs, axis=0).astype(jnp.bfloat16)           # (528, 128)
    assert wbuf.shape == (W_TOTAL, LANE), wbuf.shape

    # ---- packed f32 bias / affine slab (one prologue DMA) --------------------
    # additive per-token term: row 0 = cls + pos[0]; rows >= 1 = conv_b + pos[i]
    tok_bias = jnp.concatenate(
        [params['cls'] + params['pos'][:, :1, :],
         params['pos'][:, 1:, :] + params['conv_b'].reshape(1, 1, EMBED)],
        axis=1)[0]                                                      # (17, 32)
    brows = [_pad_cols(tok_bias)]
    for blk in params['blocks']:
        brows += [_pad_cols(blk['bproj']), _pad_cols(blk['b1']), _pad_cols(blk['b2'])]
    brows += [_pad_cols(params['ln_g']), _pad_cols(params['ln_b']),
              _pad_cols(params['head_b'])]
    bbuf = jnp.concatenate(brows, axis=0)                               # (26, 128)
    assert bbuf.shape == (B_TOTAL, LANE), bbuf.shape

    out_pad = pl.pallas_call(
        spikevit_kernel,
        out_shape=jax.ShapeDtypeStruct((B, CLASSES_PAD), jnp.float32),
        in_specs=[_vmem(), _vmem(), _vmem()],
        out_specs=_vmem(),
    )(p_tok, wbuf, bbuf)

    return out_pad[:, :CLASSES]


# ---------------- deterministic parameter init --------------------------------
def init_params(key):
    ks = iter(jax.random.split(key, 8 + 8 * DEPTH))

    def nrm(shape, std):
        return jax.random.normal(next(ks), shape, jnp.float32) * std

    params = {
        'conv_w': nrm((EMBED, IN_CH, PATCH, PATCH), 1.0 / math.sqrt(CPP)),
        'conv_b': nrm((EMBED,), 0.02),
        'cls':    nrm((1, 1, EMBED), 0.02),
        'pos':    nrm((1, N_TOKENS, EMBED), 0.02),
        'ln_g':   jnp.ones((1, EMBED), jnp.float32),
        'ln_b':   jnp.zeros((1, EMBED), jnp.float32),
        'head_w': nrm((EMBED, CLASSES), 1.0 / math.sqrt(EMBED)),
        'head_b': jnp.zeros((1, CLASSES), jnp.float32),
        'blocks': [],
    }
    for _ in range(DEPTH):
        params['blocks'].append({
            'wqkv':  nrm((EMBED, 3 * EMBED), 1.0 / math.sqrt(EMBED)),
            'wproj': nrm((EMBED, EMBED), 1.0 / math.sqrt(EMBED)),
            'bproj': nrm((1, EMBED), 0.02),
            'w1':    nrm((EMBED, HIDDEN), 1.0 / math.sqrt(EMBED)),
            'b1':    nrm((1, HIDDEN), 0.02),
            'w2':    nrm((HIDDEN, EMBED), 1.0 / math.sqrt(HIDDEN)),
            'b2':    nrm((1, EMBED), 0.02),
        })
    return params


# ---------------- main ---------------------------------------------------------
if __name__ == "__main__":
    key = jax.random.PRNGKey(0)
    pkey, xkey = jax.random.split(key)
    params = init_params(pkey)
    x = jax.random.normal(xkey, (BATCH, IN_CH, IMG, IMG), jnp.float32)  # NCHW

    fwd = jax.jit(spiking_vit_forward)
    out = jax.block_until_ready(fwd(x, params))

    assert out.shape == (BATCH, CLASSES), out.shape
    assert bool(jnp.all(jnp.isfinite(out)))
    print("KERNEL_OK")
</pallas_src>

<mosaic_0001>
module attributes {stable_mosaic.version = 11 : i64} {
  func.func @spikevit_kernel(%arg0: memref<2x17x48xf32, #tpu.memory_space<vmem>>, %arg1: memref<528x128xbf16, #tpu.memory_space<vmem>>, %arg2: memref<26x128xf32, #tpu.memory_space<vmem>>, %arg3: memref<2x128xf32, #tpu.memory_space<vmem>>) attributes {dimension_semantics = [], scalar_prefetch = 0 : i64, scratch_operands = 0 : i64, tpu.core_type = #tpu.core_type<tc>} {
    %c0 = arith.constant 0 : index
    %c0_0 = arith.constant 0 : index
    %0 = vector.load %arg2[%c0, %c0_0] : memref<26x128xf32, #tpu.memory_space<vmem>>, vector<17x32xf32>
    %c0_1 = arith.constant 0 : index
    %c0_2 = arith.constant 0 : index
    %1 = vector.load %arg1[%c0_1, %c0_2] : memref<528x128xbf16, #tpu.memory_space<vmem>>, vector<48x32xbf16>
    %c0_3 = arith.constant 0 : index
    %c0_4 = arith.constant 0 : index
    %c0_5 = arith.constant 0 : index
    %2 = vector.load %arg0[%c0_3, %c0_4, %c0_5] : memref<2x17x48xf32, #tpu.memory_space<vmem>>, vector<1x17x48xf32>
    %3 = vector.shape_cast %2 : vector<1x17x48xf32> to vector<17x48xf32>
    %4 = arith.truncf %3 : vector<17x48xf32> to vector<17x48xbf16>
    %cst = arith.constant dense<0.000000e+00> : vector<17x32xf32>
    %5 = tpu.matmul %4, %1, %cst {dimension_numbers = #tpu.dot_dimension_numbers<[1], [0], [0], [1], [0, 0, 1, 1], [], []>} : vector<17x48xbf16>, vector<48x32xbf16>, vector<17x32xf32> -> vector<17x32xf32>
    %6 = arith.addf %5, %0 : vector<17x32xf32>
    %c1 = arith.constant 1 : index
    %c0_6 = arith.constant 0 : index
    %c0_7 = arith.constant 0 : index
    %7 = vector.load %arg0[%c1, %c0_6, %c0_7] : memref<2x17x48xf32, #tpu.memory_space<vmem>>, vector<1x17x48xf32>
    %8 = vector.shape_cast %7 : vector<1x17x48xf32> to vector<17x48xf32>
    %9 = arith.truncf %8 : vector<17x48xf32> to vector<17x48xbf16>
    %cst_8 = arith.constant dense<0.000000e+00> : vector<17x32xf32>
    %10 = tpu.matmul %9, %1, %cst_8 {dimension_numbers = #tpu.dot_dimension_numbers<[1], [0], [0], [1], [0, 0, 1, 1], [], []>} : vector<17x48xbf16>, vector<48x32xbf16>, vector<17x32xf32> -> vector<17x32xf32>
    %11 = arith.addf %10, %0 : vector<17x32xf32>
    %c48 = arith.constant 48 : index
    %c0_9 = arith.constant 0 : index
    %12 = vector.load %arg1[%c48, %c0_9] : memref<528x128xbf16, #tpu.memory_space<vmem>>, vector<32x96xbf16>
    %c80 = arith.constant 80 : index
    %c0_10 = arith.constant 0 : index
    %13 = vector.load %arg1[%c80, %c0_10] : memref<528x128xbf16, #tpu.memory_space<vmem>>, vector<32x32xbf16>
    %c112 = arith.constant 112 : index
    %c0_11 = arith.constant 0 : index
    %14 = vector.load %arg1[%c112, %c0_11] : memref<528x128xbf16, #tpu.memory_space<vmem>>, vector<32x128xbf16>
    %c144 = arith.constant 144 : index
    %c0_12 = arith.constant 0 : index
    %15 = vector.load %arg1[%c144, %c0_12] : memref<528x128xbf16, #tpu.memory_space<vmem>>, vector<128x32xbf16>
    %c17 = arith.constant 17 : index
    %c0_13 = arith.constant 0 : index
    %16 = vector.load %arg2[%c17, %c0_13] : memref<26x128xf32, #tpu.memory_space<vmem>>, vector<1x32xf32>
    %c18 = arith.constant 18 : index
    %c0_14 = arith.constant 0 : index
    %17 = vector.load %arg2[%c18, %c0_14] : memref<26x128xf32, #tpu.memory_space<vmem>>, vector<1x128xf32>
    %c19 = arith.constant 19 : index
    %c0_15 = arith.constant 0 : index
    %18 = vector.load %arg2[%c19, %c0_15] : memref<26x128xf32, #tpu.memory_space<vmem>>, vector<1x32xf32>
    %19 = arith.truncf %6 : vector<17x32xf32> to vector<17x32xbf16>
    %cst_16 = arith.constant dense<0.000000e+00> : vector<17x96xf32>
    %20 = tpu.matmul %19, %12, %cst_16 {dimension_numbers = #tpu.dot_dimension_numbers<[1], [0], [0], [1], [0, 0, 1, 1], [], []>} : vector<17x32xbf16>, vector<32x96xbf16>, vector<17x96xf32> -> vector<17x96xf32>
    %21 = arith.truncf %11 : vector<17x32xf32> to vector<17x32xbf16>
    %cst_17 = arith.constant dense<0.000000e+00> : vector<17x96xf32>
    %22 = tpu.matmul %21, %12, %cst_17 {dimension_numbers = #tpu.dot_dimension_numbers<[1], [0], [0], [1], [0, 0, 1, 1], [], []>} : vector<17x32xbf16>, vector<32x96xbf16>, vector<17x96xf32> -> vector<17x96xf32>
    %cst_18 = arith.constant 0.000000e+00 : f32
    %23 = vector.broadcast %cst_18 : f32 to vector<17x96xf32>
    %24 = arith.subf %20, %23 : vector<17x96xf32>
    %cst_19 = arith.constant 5.000000e-01 : f32
    %25 = vector.broadcast %cst_19 : f32 to vector<17x96xf32>
    %26 = arith.mulf %24, %25 : vector<17x96xf32>
    %27 = arith.addf %23, %26 : vector<17x96xf32>
    %cst_20 = arith.constant 1.000000e+00 : f32
    %28 = vector.broadcast %cst_20 : f32 to vector<17x96xf32>
    %29 = arith.cmpf oge, %27, %28 : vector<17x96xf32>
    %30 = arith.extui %29 : vector<17x96xi1> to vector<17x96xi32>
    %31 = arith.sitofp %30 : vector<17x96xi32> to vector<17x96xf32>
    %cst_21 = arith.constant 0.000000e+00 : f32
    %32 = vector.broadcast %cst_21 : f32 to vector<17x96xf32>
    %33 = arith.select %29, %32, %27 : vector<17x96xi1>, vector<17x96xf32>
    %34 = arith.subf %22, %33 : vector<17x96xf32>
    %cst_22 = arith.constant 5.000000e-01 : f32
    %35 = vector.broadcast %cst_22 : f32 to vector<17x96xf32>
    %36 = arith.mulf %34, %35 : vector<17x96xf32>
    %37 = arith.addf %33, %36 : vector<17x96xf32>
    %cst_23 = arith.constant 1.000000e+00 : f32
    %38 = vector.broadcast %cst_23 : f32 to vector<17x96xf32>
    %39 = arith.cmpf oge, %37, %38 : vector<17x96xf32>
    %40 = arith.extui %39 : vector<17x96xi1> to vector<17x96xi32>
    %41 = arith.sitofp %40 : vector<17x96xi32> to vector<17x96xf32>
    %42 = vector.extract_strided_slice %31 {offsets = [0, 0], sizes = [17, 8], strides = [1, 1]} : vector<17x96xf32> to vector<17x8xf32>
    %43 = vector.extract_strided_slice %31 {offsets = [0, 32], sizes = [17, 8], strides = [1, 1]} : vector<17x96xf32> to vector<17x8xf32>
    %44 = vector.extract_strided_slice %31 {offsets = [0, 64], sizes = [17, 8], strides = [1, 1]} : vector<17x96xf32> to vector<17x8xf32>
    %45 = arith.truncf %42 : vector<17x8xf32> to vector<17x8xbf16>
    %46 = arith.truncf %43 : vector<17x8xf32> to vector<17x8xbf16>
    %cst_24 = arith.constant dense<0.000000e+00> : vector<17x17xf32>
    %47 = tpu.matmul %45, %46, %cst_24 {dimension_numbers = #tpu.dot_dimension_numbers<[1], [1], [0], [0], [0, 0, 1, 0], [], []>} : vector<17x8xbf16>, vector<17x8xbf16>, vector<17x17xf32> -> vector<17x17xf32>
    %cst_25 = arith.constant 0.353553385 : f32
    %48 = vector.broadcast %cst_25 : f32 to vector<17x17xf32>
    %49 = arith.mulf %47, %48 : vector<17x17xf32>
    %50 = math.exp %49 : vector<17x17xf32>
    %cst_26 = arith.constant dense<0.000000e+00> : vector<17xf32>
    %51 = vector.multi_reduction <add>, %50, %cst_26 [1] : vector<17x17xf32> to vector<17xf32>
    %52 = vector.shape_cast %51 : vector<17xf32> to vector<17x1xf32>
    %53 = tpu.reciprocal %52 {approx = true} : vector<17x1xf32> -> vector<17x1xf32>
    %54 = vector.broadcast %53 : vector<17x1xf32> to vector<17x17xf32>
    %55 = arith.mulf %50, %54 : vector<17x17xf32>
    %56 = arith.truncf %55 : vector<17x17xf32> to vector<17x17xbf16>
    %57 = arith.truncf %44 : vector<17x8xf32> to vector<17x8xbf16>
    %cst_27 = arith.constant dense<0.000000e+00> : vector<17x8xf32>
    %58 = tpu.matmul %56, %57, %cst_27 {dimension_numbers = #tpu.dot_dimension_numbers<[1], [0], [0], [1], [0, 0, 1, 1], [], []>} : vector<17x17xbf16>, vector<17x8xbf16>, vector<17x8xf32> -> vector<17x8xf32>
    %59 = vector.extract_strided_slice %31 {offsets = [0, 8], sizes = [17, 8], strides = [1, 1]} : vector<17x96xf32> to vector<17x8xf32>
    %60 = vector.extract_strided_slice %31 {offsets = [0, 40], sizes = [17, 8], strides = [1, 1]} : vector<17x96xf32> to vector<17x8xf32>
    %61 = vector.extract_strided_slice %31 {offsets = [0, 72], sizes = [17, 8], strides = [1, 1]} : vector<17x96xf32> to vector<17x8xf32>
    %62 = arith.truncf %59 : vector<17x8xf32> to vector<17x8xbf16>
    %63 = arith.truncf %60 : vector<17x8xf32> to vector<17x8xbf16>
    %cst_28 = arith.constant dense<0.000000e+00> : vector<17x17xf32>
    %64 = tpu.matmul %62, %63, %cst_28 {dimension_numbers = #tpu.dot_dimension_numbers<[1], [1], [0], [0], [0, 0, 1, 0], [], []>} : vector<17x8xbf16>, vector<17x8xbf16>, vector<17x17xf32> -> vector<17x17xf32>
    %cst_29 = arith.constant 0.353553385 : f32
    %65 = vector.broadcast %cst_29 : f32 to vector<17x17xf32>
    %66 = arith.mulf %64, %65 : vector<17x17xf32>
    %67 = math.exp %66 : vector<17x17xf32>
    %cst_30 = arith.constant dense<0.000000e+00> : vector<17xf32>
    %68 = vector.multi_reduction <add>, %67, %cst_30 [1] : vector<17x17xf32> to vector<17xf32>
    %69 = vector.shape_cast %68 : vector<17xf32> to vector<17x1xf32>
    %70 = tpu.reciprocal %69 {approx = true} : vector<17x1xf32> -> vector<17x1xf32>
    %71 = vector.broadcast %70 : vector<17x1xf32> to vector<17x17xf32>
    %72 = arith.mulf %67, %71 : vector<17x17xf32>
    %73 = arith.truncf %72 : vector<17x17xf32> to vector<17x17xbf16>
    %74 = arith.truncf %61 : vector<17x8xf32> to vector<17x8xbf16>
    %cst_31 = arith.constant dense<0.000000e+00> : vector<17x8xf32>
    %75 = tpu.matmul %73, %74, %cst_31 {dimension_numbers = #tpu.dot_dimension_numbers<[1], [0], [0], [1], [0, 0, 1, 1], [], []>} : vector<17x17xbf16>, vector<17x8xbf16>, vector<17x8xf32> -> vector<17x8xf32>
    %76 = vector.extract_strided_slice %31 {offsets = [0, 16], sizes = [17, 8], strides = [1, 1]} : vector<17x96xf32> to vector<17x8xf32>
    %77 = vector.extract_strided_slice %31 {offsets = [0, 48], sizes = [17, 8], strides = [1, 1]} : vector<17x96xf32> to vector<17x8xf32>
    %78 = vector.extract_strided_slice %31 {offsets = [0, 80], sizes = [17, 8], strides = [1, 1]} : vector<17x96xf32> to vector<17x8xf32>
    %79 = arith.truncf %76 : vector<17x8xf32> to vector<17x8xbf16>
    %80 = arith.truncf %77 : vector<17x8xf32> to vector<17x8xbf16>
    %cst_32 = arith.constant dense<0.000000e+00> : vector<17x17xf32>
    %81 = tpu.matmul %79, %80, %cst_32 {dimension_numbers = #tpu.dot_dimension_numbers<[1], [1], [0], [0], [0, 0, 1, 0], [], []>} : vector<17x8xbf16>, vector<17x8xbf16>, vector<17x17xf32> -> vector<17x17xf32>
    %cst_33 = arith.constant 0.353553385 : f32
    %82 = vector.broadcast %cst_33 : f32 to vector<17x17xf32>
    %83 = arith.mulf %81, %82 : vector<17x17xf32>
    %84 = math.exp %83 : vector<17x17xf32>
    %cst_34 = arith.constant dense<0.000000e+00> : vector<17xf32>
    %85 = vector.multi_reduction <add>, %84, %cst_34 [1] : vector<17x17xf32> to vector<17xf32>
    %86 = vector.shape_cast %85 : vector<17xf32> to vector<17x1xf32>
    %87 = tpu.reciprocal %86 {approx = true} : vector<17x1xf32> -> vector<17x1xf32>
    %88 = vector.broadcast %87 : vector<17x1xf32> to vector<17x17xf32>
    %89 = arith.mulf %84, %88 : vector<17x17xf32>
    %90 = arith.truncf %89 : vector<17x17xf32> to vector<17x17xbf16>
    %91 = arith.truncf %78 : vector<17x8xf32> to vector<17x8xbf16>
    %cst_35 = arith.constant dense<0.000000e+00> : vector<17x8xf32>
    %92 = tpu.matmul %90, %91, %cst_35 {dimension_numbers = #tpu.dot_dimension_numbers<[1], [0], [0], [1], [0, 0, 1, 1], [], []>} : vector<17x17xbf16>, vector<17x8xbf16>, vector<17x8xf32> -> vector<17x8xf32>
    %93 = vector.extract_strided_slice %31 {offsets = [0, 24], sizes = [17, 8], strides = [1, 1]} : vector<17x96xf32> to vector<17x8xf32>
    %94 = vector.extract_strided_slice %31 {offsets = [0, 56], sizes = [17, 8], strides = [1, 1]} : vector<17x96xf32> to vector<17x8xf32>
    %95 = vector.extract_strided_slice %31 {offsets = [0, 88], sizes = [17, 8], strides = [1, 1]} : vector<17x96xf32> to vector<17x8xf32>
    %96 = arith.truncf %93 : vector<17x8xf32> to vector<17x8xbf16>
    %97 = arith.truncf %94 : vector<17x8xf32> to vector<17x8xbf16>
    %cst_36 = arith.constant dense<0.000000e+00> : vector<17x17xf32>
    %98 = tpu.matmul %96, %97, %cst_36 {dimension_numbers = #tpu.dot_dimension_numbers<[1], [1], [0], [0], [0, 0, 1, 0], [], []>} : vector<17x8xbf16>, vector<17x8xbf16>, vector<17x17xf32> -> vector<17x17xf32>
    %cst_37 = arith.constant 0.353553385 : f32
    %99 = vector.broadcast %cst_37 : f32 to vector<17x17xf32>
    %100 = arith.mulf %98, %99 : vector<17x17xf32>
    %101 = math.exp %100 : vector<17x17xf32>
    %cst_38 = arith.constant dense<0.000000e+00> : vector<17xf32>
    %102 = vector.multi_reduction <add>, %101, %cst_38 [1] : vector<17x17xf32> to vector<17xf32>
    %103 = vector.shape_cast %102 : vector<17xf32> to vector<17x1xf32>
    %104 = tpu.reciprocal %103 {approx = true} : vector<17x1xf32> -> vector<17x1xf32>
    %105 = vector.broadcast %104 : vector<17x1xf32> to vector<17x17xf32>
    %106 = arith.mulf %101, %105 : vector<17x17xf32>
    %107 = arith.truncf %106 : vector<17x17xf32> to vector<17x17xbf16>
    %108 = arith.truncf %95 : vector<17x8xf32> to vector<17x8xbf16>
    %cst_39 = arith.constant dense<0.000000e+00> : vector<17x8xf32>
    %109 = tpu.matmul %107, %108, %cst_39 {dimension_numbers = #tpu.dot_dimension_numbers<[1], [0], [0], [1], [0, 0, 1, 1], [], []>} : vector<17x17xbf16>, vector<17x8xbf16>, vector<17x8xf32> -> vector<17x8xf32>
    %110 = tpu.concatenate %58, %75, %92, %109 in 1 : vector<17x8xf32>, vector<17x8xf32>, vector<17x8xf32>, vector<17x8xf32> -> vector<17x32xf32>
    %111 = arith.truncf %110 : vector<17x32xf32> to vector<17x32xbf16>
    %cst_40 = arith.constant dense<0.000000e+00> : vector<17x32xf32>
    %112 = tpu.matmul %111, %13, %cst_40 {dimension_numbers = #tpu.dot_dimension_numbers<[1], [0], [0], [1], [0, 0, 1, 1], [], []>} : vector<17x32xbf16>, vector<32x32xbf16>, vector<17x32xf32> -> vector<17x32xf32>
    %113 = arith.addf %6, %112 : vector<17x32xf32>
    %114 = vector.broadcast %16 : vector<1x32xf32> to vector<17x32xf32>
    %115 = arith.addf %113, %114 : vector<17x32xf32>
    %116 = vector.extract_strided_slice %41 {offsets = [0, 0], sizes = [17, 8], strides = [1, 1]} : vector<17x96xf32> to vector<17x8xf32>
    %117 = vector.extract_strided_slice %41 {offsets = [0, 32], sizes = [17, 8], strides = [1, 1]} : vector<17x96xf32> to vector<17x8xf32>
    %118 = vector.extract_strided_slice %41 {offsets = [0, 64], sizes = [17, 8], strides = [1, 1]} : vector<17x96xf32> to vector<17x8xf32>
    %119 = arith.truncf %116 : vector<17x8xf32> to vector<17x8xbf16>
    %120 = arith.truncf %117 : vector<17x8xf32> to vector<17x8xbf16>
    %cst_41 = arith.constant dense<0.000000e+00> : vector<17x17xf32>
    %121 = tpu.matmul %119, %120, %cst_41 {dimension_numbers = #tpu.dot_dimension_numbers<[1], [1], [0], [0], [0, 0, 1, 0], [], []>} : vector<17x8xbf16>, vector<17x8xbf16>, vector<17x17xf32> -> vector<17x17xf32>
    %cst_42 = arith.constant 0.353553385 : f32
    %122 = vector.broadcast %cst_42 : f32 to vector<17x17xf32>
    %123 = arith.mulf %121, %122 : vector<17x17xf32>
    %124 = math.exp %123 : vector<17x17xf32>
    %cst_43 = arith.constant dense<0.000000e+00> : vector<17xf32>
    %125 = vector.multi_reduction <add>, %124, %cst_43 [1] : vector<17x17xf32> to vector<17xf32>
    %126 = vector.shape_cast %125 : vector<17xf32> to vector<17x1xf32>
    %127 = tpu.reciprocal %126 {approx = true} : vector<17x1xf32> -> vector<17x1xf32>
    %128 = vector.broadcast %127 : vector<17x1xf32> to vector<17x17xf32>
    %129 = arith.mulf %124, %128 : vector<17x17xf32>
    %130 = arith.truncf %129 : vector<17x17xf32> to vector<17x17xbf16>
    %131 = arith.truncf %118 : vector<17x8xf32> to vector<17x8xbf16>
    %cst_44 = arith.constant dense<0.000000e+00> : vector<17x8xf32>
    %132 = tpu.matmul %130, %131, %cst_44 {dimension_numbers = #tpu.dot_dimension_numbers<[1], [0], [0], [1], [0, 0, 1, 1], [], []>} : vector<17x17xbf16>, vector<17x8xbf16>, vector<17x8xf32> -> vector<17x8xf32>
    %133 = vector.extract_strided_slice %41 {offsets = [0, 8], sizes = [17, 8], strides = [1, 1]} : vector<17x96xf32> to vector<17x8xf32>
    %134 = vector.extract_strided_slice %41 {offsets = [0, 40], sizes = [17, 8], strides = [1, 1]} : vector<17x96xf32> to vector<17x8xf32>
    %135 = vector.extract_strided_slice %41 {offsets = [0, 72], sizes = [17, 8], strides = [1, 1]} : vector<17x96xf32> to vector<17x8xf32>
    %136 = arith.truncf %133 : vector<17x8xf32> to vector<17x8xbf16>
    %137 = arith.truncf %134 : vector<17x8xf32> to vector<17x8xbf16>
    %cst_45 = arith.constant dense<0.000000e+00> : vector<17x17xf32>
    %138 = tpu.matmul %136, %137, %cst_45 {dimension_numbers = #tpu.dot_dimension_numbers<[1], [1], [0], [0], [0, 0, 1, 0], [], []>} : vector<17x8xbf16>, vector<17x8xbf16>, vector<17x17xf32> -> vector<17x17xf32>
    %cst_46 = arith.constant 0.353553385 : f32
    %139 = vector.broadcast %cst_46 : f32 to vector<17x17xf32>
    %140 = arith.mulf %138, %139 : vector<17x17xf32>
    %141 = math.exp %140 : vector<17x17xf32>
    %cst_47 = arith.constant dense<0.000000e+00> : vector<17xf32>
    %142 = vector.multi_reduction <add>, %141, %cst_47 [1] : vector<17x17xf32> to vector<17xf32>
    %143 = vector.shape_cast %142 : vector<17xf32> to vector<17x1xf32>
    %144 = tpu.reciprocal %143 {approx = true} : vector<17x1xf32> -> vector<17x1xf32>
    %145 = vector.broadcast %144 : vector<17x1xf32> to vector<17x17xf32>
    %146 = arith.mulf %141, %145 : vector<17x17xf32>
    %147 = arith.truncf %146 : vector<17x17xf32> to vector<17x17xbf16>
    %148 = arith.truncf %135 : vector<17x8xf32> to vector<17x8xbf16>
    %cst_48 = arith.constant dense<0.000000e+00> : vector<17x8xf32>
    %149 = tpu.matmul %147, %148, %cst_48 {dimension_numbers = #tpu.dot_dimension_numbers<[1], [0], [0], [1], [0, 0, 1, 1], [], []>} : vector<17x17xbf16>, vector<17x8xbf16>, vector<17x8xf32> -> vector<17x8xf32>
    %150 = vector.extract_strided_slice %41 {offsets = [0, 16], sizes = [17, 8], strides = [1, 1]} : vector<17x96xf32> to vector<17x8xf32>
    %151 = vector.extract_strided_slice %41 {offsets = [0, 48], sizes = [17, 8], strides = [1, 1]} : vector<17x96xf32> to vector<17x8xf32>
    %152 = vector.extract_strided_slice %41 {offsets = [0, 80], sizes = [17, 8], strides = [1, 1]} : vector<17x96xf32> to vector<17x8xf32>
    %153 = arith.truncf %150 : vector<17x8xf32> to vector<17x8xbf16>
    %154 = arith.truncf %151 : vector<17x8xf32> to vector<17x8xbf16>
    %cst_49 = arith.constant dense<0.000000e+00> : vector<17x17xf32>
    %155 = tpu.matmul %153, %154, %cst_49 {dimension_numbers = #tpu.dot_dimension_numbers<[1], [1], [0], [0], [0, 0, 1, 0], [], []>} : vector<17x8xbf16>, vector<17x8xbf16>, vector<17x17xf32> -> vector<17x17xf32>
    %cst_50 = arith.constant 0.353553385 : f32
    %156 = vector.broadcast %cst_50 : f32 to vector<17x17xf32>
    %157 = arith.mulf %155, %156 : vector<17x17xf32>
    %158 = math.exp %157 : vector<17x17xf32>
    %cst_51 = arith.constant dense<0.000000e+00> : vector<17xf32>
    %159 = vector.multi_reduction <add>, %158, %cst_51 [1] : vector<17x17xf32> to vector<17xf32>
    %160 = vector.shape_cast %159 : vector<17xf32> to vector<17x1xf32>
    %161 = tpu.reciprocal %160 {approx = true} : vector<17x1xf32> -> vector<17x1xf32>
    %162 = vector.broadcast %161 : vector<17x1xf32> to vector<17x17xf32>
    %163 = arith.mulf %158, %162 : vector<17x17xf32>
    %164 = arith.truncf %163 : vector<17x17xf32> to vector<17x17xbf16>
    %165 = arith.truncf %152 : vector<17x8xf32> to vector<17x8xbf16>
    %cst_52 = arith.constant dense<0.000000e+00> : vector<17x8xf32>
    %166 = tpu.matmul %164, %165, %cst_52 {dimension_numbers = #tpu.dot_dimension_numbers<[1], [0], [0], [1], [0, 0, 1, 1], [], []>} : vector<17x17xbf16>, vector<17x8xbf16>, vector<17x8xf32> -> vector<17x8xf32>
    %167 = vector.extract_strided_slice %41 {offsets = [0, 24], sizes = [17, 8], strides = [1, 1]} : vector<17x96xf32> to vector<17x8xf32>
    %168 = vector.extract_strided_slice %41 {offsets = [0, 56], sizes = [17, 8], strides = [1, 1]} : vector<17x96xf32> to vector<17x8xf32>
    %169 = vector.extract_strided_slice %41 {offsets = [0, 88], sizes = [17, 8], strides = [1, 1]} : vector<17x96xf32> to vector<17x8xf32>
    %170 = arith.truncf %167 : vector<17x8xf32> to vector<17x8xbf16>
    %171 = arith.truncf %168 : vector<17x8xf32> to vector<17x8xbf16>
    %cst_53 = arith.constant dense<0.000000e+00> : vector<17x17xf32>
    %172 = tpu.matmul %170, %171, %cst_53 {dimension_numbers = #tpu.dot_dimension_numbers<[1], [1], [0], [0], [0, 0, 1, 0], [], []>} : vector<17x8xbf16>, vector<17x8xbf16>, vector<17x17xf32> -> vector<17x17xf32>
    %cst_54 = arith.constant 0.353553385 : f32
    %173 = vector.broadcast %cst_54 : f32 to vector<17x17xf32>
    %174 = arith.mulf %172, %173 : vector<17x17xf32>
    %175 = math.exp %174 : vector<17x17xf32>
    %cst_55 = arith.constant dense<0.000000e+00> : vector<17xf32>
    %176 = vector.multi_reduction <add>, %175, %cst_55 [1] : vector<17x17xf32> to vector<17xf32>
    %177 = vector.shape_cast %176 : vector<17xf32> to vector<17x1xf32>
    %178 = tpu.reciprocal %177 {approx = true} : vector<17x1xf32> -> vector<17x1xf32>
    %179 = vector.broadcast %178 : vector<17x1xf32> to vector<17x17xf32>
    %180 = arith.mulf %175, %179 : vector<17x17xf32>
    %181 = arith.truncf %180 : vector<17x17xf32> to vector<17x17xbf16>
    %182 = arith.truncf %169 : vector<17x8xf32> to vector<17x8xbf16>
    %cst_56 = arith.constant dense<0.000000e+00> : vector<17x8xf32>
    %183 = tpu.matmul %181, %182, %cst_56 {dimension_numbers = #tpu.dot_dimension_numbers<[1], [0], [0], [1], [0, 0, 1, 1], [], []>} : vector<17x17xbf16>, vector<17x8xbf16>, vector<17x8xf32> -> vector<17x8xf32>
    %184 = tpu.concatenate %132, %149, %166, %183 in 1 : vector<17x8xf32>, vector<17x8xf32>, vector<17x8xf32>, vector<17x8xf32> -> vector<17x32xf32>
    %185 = arith.truncf %184 : vector<17x32xf32> to vector<17x32xbf16>
    %cst_57 = arith.constant dense<0.000000e+00> : vector<17x32xf32>
    %186 = tpu.matmul %185, %13, %cst_57 {dimension_numbers = #tpu.dot_dimension_numbers<[1], [0], [0], [1], [0, 0, 1, 1], [], []>} : vector<17x32xbf16>, vector<32x32xbf16>, vector<17x32xf32> -> vector<17x32xf32>
    %187 = arith.addf %11, %186 : vector<17x32xf32>
    %188 = vector.broadcast %16 : vector<1x32xf32> to vector<17x32xf32>
    %189 = arith.addf %187, %188 : vector<17x32xf32>
    %190 = arith.truncf %115 : vector<17x32xf32> to vector<17x32xbf16>
    %cst_58 = arith.constant dense<0.000000e+00> : vector<17x128xf32>
    %191 = tpu.matmul %190, %14, %cst_58 {dimension_numbers = #tpu.dot_dimension_numbers<[1], [0], [0], [1], [0, 0, 1, 1], [], []>} : vector<17x32xbf16>, vector<32x128xbf16>, vector<17x128xf32> -> vector<17x128xf32>
    %192 = vector.broadcast %17 : vector<1x128xf32> to vector<17x128xf32>
    %193 = arith.addf %191, %192 : vector<17x128xf32>
    %cst_59 = arith.constant 5.000000e-01 : f32
    %194 = vector.broadcast %cst_59 : f32 to vector<17x128xf32>
    %195 = arith.mulf %194, %193 : vector<17x128xf32>
    %cst_60 = arith.constant 0.707106769 : f32
    %196 = vector.broadcast %cst_60 : f32 to vector<17x128xf32>
    %197 = arith.mulf %193, %196 : vector<17x128xf32>
    %198 = math.absf %197 : vector<17x128xf32>
    %cst_61 = arith.constant 0.327591091 : f32
    %199 = vector.broadcast %cst_61 : f32 to vector<17x128xf32>
    %200 = arith.mulf %199, %198 : vector<17x128xf32>
    %cst_62 = arith.constant 1.000000e+00 : f32
    %201 = vector.broadcast %cst_62 : f32 to vector<17x128xf32>
    %202 = arith.addf %201, %200 : vector<17x128xf32>
    %cst_63 = arith.constant 1.000000e+00 : f32
    %203 = vector.broadcast %cst_63 : f32 to vector<17x128xf32>
    %204 = arith.divf %203, %202 : vector<17x128xf32>
    %cst_64 = arith.constant 1.06140542 : f32
    %205 = vector.broadcast %cst_64 : f32 to vector<17x128xf32>
    %206 = arith.mulf %205, %204 : vector<17x128xf32>
    %cst_65 = arith.constant -1.45315206 : f32
    %207 = vector.broadcast %cst_65 : f32 to vector<17x128xf32>
    %208 = arith.addf %206, %207 : vector<17x128xf32>
    %209 = arith.mulf %208, %204 : vector<17x128xf32>
    %cst_66 = arith.constant 1.42141378 : f32
    %210 = vector.broadcast %cst_66 : f32 to vector<17x128xf32>
    %211 = arith.addf %209, %210 : vector<17x128xf32>
    %212 = arith.mulf %211, %204 : vector<17x128xf32>
    %cst_67 = arith.constant -0.284496725 : f32
    %213 = vector.broadcast %cst_67 : f32 to vector<17x128xf32>
    %214 = arith.addf %212, %213 : vector<17x128xf32>
    %215 = arith.mulf %214, %204 : vector<17x128xf32>
    %cst_68 = arith.constant 0.254829586 : f32
    %216 = vector.broadcast %cst_68 : f32 to vector<17x128xf32>
    %217 = arith.addf %215, %216 : vector<17x128xf32>
    %218 = arith.mulf %217, %204 : vector<17x128xf32>
    %cst_69 = arith.constant 0.000000e+00 : f32
    %219 = vector.broadcast %cst_69 : f32 to vector<17x128xf32>
    %220 = arith.subf %219, %198 : vector<17x128xf32>
    %221 = arith.mulf %220, %198 : vector<17x128xf32>
    %222 = math.exp %221 : vector<17x128xf32>
    %223 = arith.mulf %218, %222 : vector<17x128xf32>
    %cst_70 = arith.constant 1.000000e+00 : f32
    %224 = vector.broadcast %cst_70 : f32 to vector<17x128xf32>
    %225 = arith.subf %224, %223 : vector<17x128xf32>
    %cst_71 = arith.constant 0.000000e+00 : f32
    %226 = vector.broadcast %cst_71 : f32 to vector<17x128xf32>
    %227 = arith.cmpf oge, %197, %226 : vector<17x128xf32>
    %cst_72 = arith.constant 0.000000e+00 : f32
    %228 = vector.broadcast %cst_72 : f32 to vector<17x128xf32>
    %229 = arith.subf %228, %225 : vector<17x128xf32>
    %230 = arith.select %227, %225, %229 : vector<17x128xi1>, vector<17x128xf32>
    %cst_73 = arith.constant 1.000000e+00 : f32
    %231 = vector.broadcast %cst_73 : f32 to vector<17x128xf32>
    %232 = arith.addf %231, %230 : vector<17x128xf32>
    %233 = arith.mulf %195, %232 : vector<17x128xf32>
    %234 = arith.truncf %233 : vector<17x128xf32> to vector<17x128xbf16>
    %cst_74 = arith.constant dense<0.000000e+00> : vector<17x32xf32>
    %235 = tpu.matmul %234, %15, %cst_74 {dimension_numbers = #tpu.dot_dimension_numbers<[1], [0], [0], [1], [0, 0, 1, 1], [], []>} : vector<17x128xbf16>, vector<128x32xbf16>, vector<17x32xf32> -> vector<17x32xf32>
    %236 = vector.broadcast %18 : vector<1x32xf32> to vector<17x32xf32>
    %237 = arith.addf %235, %236 : vector<17x32xf32>
    %cst_75 = arith.constant 5.000000e-01 : f32
    %238 = vector.broadcast %cst_75 : f32 to vector<17x32xf32>
    %239 = arith.mulf %238, %237 : vector<17x32xf32>
    %cst_76 = arith.constant 0.707106769 : f32
    %240 = vector.broadcast %cst_76 : f32 to vector<17x32xf32>
    %241 = arith.mulf %237, %240 : vector<17x32xf32>
    %242 = math.absf %241 : vector<17x32xf32>
    %cst_77 = arith.constant 0.327591091 : f32
    %243 = vector.broadcast %cst_77 : f32 to vector<17x32xf32>
    %244 = arith.mulf %243, %242 : vector<17x32xf32>
    %cst_78 = arith.constant 1.000000e+00 : f32
    %245 = vector.broadcast %cst_78 : f32 to vector<17x32xf32>
    %246 = arith.addf %245, %244 : vector<17x32xf32>
    %cst_79 = arith.constant 1.000000e+00 : f32
    %247 = vector.broadcast %cst_79 : f32 to vector<17x32xf32>
    %248 = arith.divf %247, %246 : vector<17x32xf32>
    %cst_80 = arith.constant 1.06140542 : f32
    %249 = vector.broadcast %cst_80 : f32 to vector<17x32xf32>
    %250 = arith.mulf %249, %248 : vector<17x32xf32>
    %cst_81 = arith.constant -1.45315206 : f32
    %251 = vector.broadcast %cst_81 : f32 to vector<17x32xf32>
    %252 = arith.addf %250, %251 : vector<17x32xf32>
    %253 = arith.mulf %252, %248 : vector<17x32xf32>
    %cst_82 = arith.constant 1.42141378 : f32
    %254 = vector.broadcast %cst_82 : f32 to vector<17x32xf32>
    %255 = arith.addf %253, %254 : vector<17x32xf32>
    %256 = arith.mulf %255, %248 : vector<17x32xf32>
    %cst_83 = arith.constant -0.284496725 : f32
    %257 = vector.broadcast %cst_83 : f32 to vector<17x32xf32>
    %258 = arith.addf %256, %257 : vector<17x32xf32>
    %259 = arith.mulf %258, %248 : vector<17x32xf32>
    %cst_84 = arith.constant 0.254829586 : f32
    %260 = vector.broadcast %cst_84 : f32 to vector<17x32xf32>
    %261 = arith.addf %259, %260 : vector<17x32xf32>
    %262 = arith.mulf %261, %248 : vector<17x32xf32>
    %cst_85 = arith.constant 0.000000e+00 : f32
    %263 = vector.broadcast %cst_85 : f32 to vector<17x32xf32>
    %264 = arith.subf %263, %242 : vector<17x32xf32>
    %265 = arith.mulf %264, %242 : vector<17x32xf32>
    %266 = math.exp %265 : vector<17x32xf32>
    %267 = arith.mulf %262, %266 : vector<17x32xf32>
    %cst_86 = arith.constant 1.000000e+00 : f32
    %268 = vector.broadcast %cst_86 : f32 to vector<17x32xf32>
    %269 = arith.subf %268, %267 : vector<17x32xf32>
    %cst_87 = arith.constant 0.000000e+00 : f32
    %270 = vector.broadcast %cst_87 : f32 to vector<17x32xf32>
    %271 = arith.cmpf oge, %241, %270 : vector<17x32xf32>
    %cst_88 = arith.constant 0.000000e+00 : f32
    %272 = vector.broadcast %cst_88 : f32 to vector<17x32xf32>
    %273 = arith.subf %272, %269 : vector<17x32xf32>
    %274 = arith.select %271, %269, %273 : vector<17x32xi1>, vector<17x32xf32>
    %cst_89 = arith.constant 1.000000e+00 : f32
    %275 = vector.broadcast %cst_89 : f32 to vector<17x32xf32>
    %276 = arith.addf %275, %274 : vector<17x32xf32>
    %277 = arith.mulf %239, %276 : vector<17x32xf32>
    %278 = arith.addf %115, %277 : vector<17x32xf32>
    %279 = arith.truncf %189 : vector<17x32xf32> to vector<17x32xbf16>
    %cst_90 = arith.constant dense<0.000000e+00> : vector<17x128xf32>
    %280 = tpu.matmul %279, %14, %cst_90 {dimension_numbers = #tpu.dot_dimension_numbers<[1], [0], [0], [1], [0, 0, 1, 1], [], []>} : vector<17x32xbf16>, vector<32x128xbf16>, vector<17x128xf32> -> vector<17x128xf32>
    %281 = vector.broadcast %17 : vector<1x128xf32> to vector<17x128xf32>
    %282 = arith.addf %280, %281 : vector<17x128xf32>
    %cst_91 = arith.constant 5.000000e-01 : f32
    %283 = vector.broadcast %cst_91 : f32 to vector<17x128xf32>
    %284 = arith.mulf %283, %282 : vector<17x128xf32>
    %cst_92 = arith.constant 0.707106769 : f32
    %285 = vector.broadcast %cst_92 : f32 to vector<17x128xf32>
    %286 = arith.mulf %282, %285 : vector<17x128xf32>
    %287 = math.absf %286 : vector<17x128xf32>
    %cst_93 = arith.constant 0.327591091 : f32
    %288 = vector.broadcast %cst_93 : f32 to vector<17x128xf32>
    %289 = arith.mulf %288, %287 : vector<17x128xf32>
    %cst_94 = arith.constant 1.000000e+00 : f32
    %290 = vector.broadcast %cst_94 : f32 to vector<17x128xf32>
    %291 = arith.addf %290, %289 : vector<17x128xf32>
    %cst_95 = arith.constant 1.000000e+00 : f32
    %292 = vector.broadcast %cst_95 : f32 to vector<17x128xf32>
    %293 = arith.divf %292, %291 : vector<17x128xf32>
    %cst_96 = arith.constant 1.06140542 : f32
    %294 = vector.broadcast %cst_96 : f32 to vector<17x128xf32>
    %295 = arith.mulf %294, %293 : vector<17x128xf32>
    %cst_97 = arith.constant -1.45315206 : f32
    %296 = vector.broadcast %cst_97 : f32 to vector<17x128xf32>
    %297 = arith.addf %295, %296 : vector<17x128xf32>
    %298 = arith.mulf %297, %293 : vector<17x128xf32>
    %cst_98 = arith.constant 1.42141378 : f32
    %299 = vector.broadcast %cst_98 : f32 to vector<17x128xf32>
    %300 = arith.addf %298, %299 : vector<17x128xf32>
    %301 = arith.mulf %300, %293 : vector<17x128xf32>
    %cst_99 = arith.constant -0.284496725 : f32
    %302 = vector.broadcast %cst_99 : f32 to vector<17x128xf32>
    %303 = arith.addf %301, %302 : vector<17x128xf32>
    %304 = arith.mulf %303, %293 : vector<17x128xf32>
    %cst_100 = arith.constant 0.254829586 : f32
    %305 = vector.broadcast %cst_100 : f32 to vector<17x128xf32>
    %306 = arith.addf %304, %305 : vector<17x128xf32>
    %307 = arith.mulf %306, %293 : vector<17x128xf32>
    %cst_101 = arith.constant 0.000000e+00 : f32
    %308 = vector.broadcast %cst_101 : f32 to vector<17x128xf32>
    %309 = arith.subf %308, %287 : vector<17x128xf32>
    %310 = arith.mulf %309, %287 : vector<17x128xf32>
    %311 = math.exp %310 : vector<17x128xf32>
    %312 = arith.mulf %307, %311 : vector<17x128xf32>
    %cst_102 = arith.constant 1.000000e+00 : f32
    %313 = vector.broadcast %cst_102 : f32 to vector<17x128xf32>
    %314 = arith.subf %313, %312 : vector<17x128xf32>
    %cst_103 = arith.constant 0.000000e+00 : f32
    %315 = vector.broadcast %cst_103 : f32 to vector<17x128xf32>
    %316 = arith.cmpf oge, %286, %315 : vector<17x128xf32>
    %cst_104 = arith.constant 0.000000e+00 : f32
    %317 = vector.broadcast %cst_104 : f32 to vector<17x128xf32>
    %318 = arith.subf %317, %314 : vector<17x128xf32>
    %319 = arith.select %316, %314, %318 : vector<17x128xi1>, vector<17x128xf32>
    %cst_105 = arith.constant 1.000000e+00 : f32
    %320 = vector.broadcast %cst_105 : f32 to vector<17x128xf32>
    %321 = arith.addf %320, %319 : vector<17x128xf32>
    %322 = arith.mulf %284, %321 : vector<17x128xf32>
    %323 = arith.truncf %322 : vector<17x128xf32> to vector<17x128xbf16>
    %cst_106 = arith.constant dense<0.000000e+00> : vector<17x32xf32>
    %324 = tpu.matmul %323, %15, %cst_106 {dimension_numbers = #tpu.dot_dimension_numbers<[1], [0], [0], [1], [0, 0, 1, 1], [], []>} : vector<17x128xbf16>, vector<128x32xbf16>, vector<17x32xf32> -> vector<17x32xf32>
    %325 = vector.broadcast %18 : vector<1x32xf32> to vector<17x32xf32>
    %326 = arith.addf %324, %325 : vector<17x32xf32>
    %cst_107 = arith.constant 5.000000e-01 : f32
    %327 = vector.broadcast %cst_107 : f32 to vector<17x32xf32>
    %328 = arith.mulf %327, %326 : vector<17x32xf32>
    %cst_108 = arith.constant 0.707106769 : f32
    %329 = vector.broadcast %cst_108 : f32 to vector<17x32xf32>
    %330 = arith.mulf %326, %329 : vector<17x32xf32>
    %331 = math.absf %330 : vector<17x32xf32>
    %cst_109 = arith.constant 0.327591091 : f32
    %332 = vector.broadcast %cst_109 : f32 to vector<17x32xf32>
    %333 = arith.mulf %332, %331 : vector<17x32xf32>
    %cst_110 = arith.constant 1.000000e+00 : f32
    %334 = vector.broadcast %cst_110 : f32 to vector<17x32xf32>
    %335 = arith.addf %334, %333 : vector<17x32xf32>
    %cst_111 = arith.constant 1.000000e+00 : f32
    %336 = vector.broadcast %cst_111 : f32 to vector<17x32xf32>
    %337 = arith.divf %336, %335 : vector<17x32xf32>
    %cst_112 = arith.constant 1.06140542 : f32
    %338 = vector.broadcast %cst_112 : f32 to vector<17x32xf32>
    %339 = arith.mulf %338, %337 : vector<17x32xf32>
    %cst_113 = arith.constant -1.45315206 : f32
    %340 = vector.broadcast %cst_113 : f32 to vector<17x32xf32>
    %341 = arith.addf %339, %340 : vector<17x32xf32>
    %342 = arith.mulf %341, %337 : vector<17x32xf32>
    %cst_114 = arith.constant 1.42141378 : f32
    %343 = vector.broadcast %cst_114 : f32 to vector<17x32xf32>
    %344 = arith.addf %342, %343 : vector<17x32xf32>
    %345 = arith.mulf %344, %337 : vector<17x32xf32>
    %cst_115 = arith.constant -0.284496725 : f32
    %346 = vector.broadcast %cst_115 : f32 to vector<17x32xf32>
    %347 = arith.addf %345, %346 : vector<17x32xf32>
    %348 = arith.mulf %347, %337 : vector<17x32xf32>
    %cst_116 = arith.constant 0.254829586 : f32
    %349 = vector.broadcast %cst_116 : f32 to vector<17x32xf32>
    %350 = arith.addf %348, %349 : vector<17x32xf32>
    %351 = arith.mulf %350, %337 : vector<17x32xf32>
    %cst_117 = arith.constant 0.000000e+00 : f32
    %352 = vector.broadcast %cst_117 : f32 to vector<17x32xf32>
    %353 = arith.subf %352, %331 : vector<17x32xf32>
    %354 = arith.mulf %353, %331 : vector<17x32xf32>
    %355 = math.exp %354 : vector<17x32xf32>
    %356 = arith.mulf %351, %355 : vector<17x32xf32>
    %cst_118 = arith.constant 1.000000e+00 : f32
    %357 = vector.broadcast %cst_118 : f32 to vector<17x32xf32>
    %358 = arith.subf %357, %356 : vector<17x32xf32>
    %cst_119 = arith.constant 0.000000e+00 : f32
    %359 = vector.broadcast %cst_119 : f32 to vector<17x32xf32>
    %360 = arith.cmpf oge, %330, %359 : vector<17x32xf32>
    %cst_120 = arith.constant 0.000000e+00 : f32
    %361 = vector.broadcast %cst_120 : f32 to vector<17x32xf32>
    %362 = arith.subf %361, %358 : vector<17x32xf32>
    %363 = arith.select %360, %358, %362 : vector<17x32xi1>, vector<17x32xf32>
    %cst_121 = arith.constant 1.000000e+00 : f32
    %364 = vector.broadcast %cst_121 : f32 to vector<17x32xf32>
    %365 = arith.addf %364, %363 : vector<17x32xf32>
    %366 = arith.mulf %328, %365 : vector<17x32xf32>
    %367 = arith.addf %189, %366 : vector<17x32xf32>
    %c272 = arith.constant 272 : index
    %c0_122 = arith.constant 0 : index
    %368 = vector.load %arg1[%c272, %c0_122] : memref<528x128xbf16, #tpu.memory_space<vmem>>, vector<32x96xbf16>
    %c304 = arith.constant 304 : index
    %c0_123 = arith.constant 0 : index
    %369 = vector.load %arg1[%c304, %c0_123] : memref<528x128xbf16, #tpu.memory_space<vmem>>, vector<32x32xbf16>
    %c336 = arith.constant 336 : index
    %c0_124 = arith.constant 0 : index
    %370 = vector.load %arg1[%c336, %c0_124] : memref<528x128xbf16, #tpu.memory_space<vmem>>, vector<32x128xbf16>
    %c368 = arith.constant 368 : index
    %c0_125 = arith.constant 0 : index
    %371 = vector.load %arg1[%c368, %c0_125] : memref<528x128xbf16, #tpu.memory_space<vmem>>, vector<128x32xbf16>
    %c20 = arith.constant 20 : index
    %c0_126 = arith.constant 0 : index
    %372 = vector.load %arg2[%c20, %c0_126] : memref<26x128xf32, #tpu.memory_space<vmem>>, vector<1x32xf32>
    %c21 = arith.constant 21 : index
    %c0_127 = arith.constant 0 : index
    %373 = vector.load %arg2[%c21, %c0_127] : memref<26x128xf32, #tpu.memory_space<vmem>>, vector<1x128xf32>
    %c22 = arith.constant 22 : index
    %c0_128 = arith.constant 0 : index
    %374 = vector.load %arg2[%c22, %c0_128] : memref<26x128xf32, #tpu.memory_space<vmem>>, vector<1x32xf32>
    %375 = arith.truncf %278 : vector<17x32xf32> to vector<17x32xbf16>
    %cst_129 = arith.constant dense<0.000000e+00> : vector<17x96xf32>
    %376 = tpu.matmul %375, %368, %cst_129 {dimension_numbers = #tpu.dot_dimension_numbers<[1], [0], [0], [1], [0, 0, 1, 1], [], []>} : vector<17x32xbf16>, vector<32x96xbf16>, vector<17x96xf32> -> vector<17x96xf32>
    %377 = arith.truncf %367 : vector<17x32xf32> to vector<17x32xbf16>
    %cst_130 = arith.constant dense<0.000000e+00> : vector<17x96xf32>
    %378 = tpu.matmul %377, %368, %cst_130 {dimension_numbers = #tpu.dot_dimension_numbers<[1], [0], [0], [1], [0, 0, 1, 1], [], []>} : vector<17x32xbf16>, vector<32x96xbf16>, vector<17x96xf32> -> vector<17x96xf32>
    %cst_131 = arith.constant 0.000000e+00 : f32
    %379 = vector.broadcast %cst_131 : f32 to vector<17x96xf32>
    %380 = arith.subf %376, %379 : vector<17x96xf32>
    %cst_132 = arith.constant 5.000000e-01 : f32
    %381 = vector.broadcast %cst_132 : f32 to vector<17x96xf32>
    %382 = arith.mulf %380, %381 : vector<17x96xf32>
    %383 = arith.addf %379, %382 : vector<17x96xf32>
    %cst_133 = arith.constant 1.000000e+00 : f32
    %384 = vector.broadcast %cst_133 : f32 to vector<17x96xf32>
    %385 = arith.cmpf oge, %383, %384 : vector<17x96xf32>
    %386 = arith.extui %385 : vector<17x96xi1> to vector<17x96xi32>
    %387 = arith.sitofp %386 : vector<17x96xi32> to vector<17x96xf32>
    %cst_134 = arith.constant 0.000000e+00 : f32
    %388 = vector.broadcast %cst_134 : f32 to vector<17x96xf32>
    %389 = arith.select %385, %388, %383 : vector<17x96xi1>, vector<17x96xf32>
    %390 = arith.subf %378, %389 : vector<17x96xf32>
    %cst_135 = arith.constant 5.000000e-01 : f32
    %391 = vector.broadcast %cst_135 : f32 to vector<17x96xf32>
    %392 = arith.mulf %390, %391 : vector<17x96xf32>
    %393 = arith.addf %389, %392 : vector<17x96xf32>
    %cst_136 = arith.constant 1.000000e+00 : f32
    %394 = vector.broadcast %cst_136 : f32 to vector<17x96xf32>
    %395 = arith.cmpf oge, %393, %394 : vector<17x96xf32>
    %396 = arith.extui %395 : vector<17x96xi1> to vector<17x96xi32>
    %397 = arith.sitofp %396 : vector<17x96xi32> to vector<17x96xf32>
    %398 = vector.extract_strided_slice %387 {offsets = [0, 0], sizes = [17, 8], strides = [1, 1]} : vector<17x96xf32> to vector<17x8xf32>
    %399 = vector.extract_strided_slice %387 {offsets = [0, 32], sizes = [17, 8], strides = [1, 1]} : vector<17x96xf32> to vector<17x8xf32>
    %400 = vector.extract_strided_slice %387 {offsets = [0, 64], sizes = [17, 8], strides = [1, 1]} : vector<17x96xf32> to vector<17x8xf32>
    %401 = arith.truncf %398 : vector<17x8xf32> to vector<17x8xbf16>
    %402 = arith.truncf %399 : vector<17x8xf32> to vector<17x8xbf16>
    %cst_137 = arith.constant dense<0.000000e+00> : vector<17x17xf32>
    %403 = tpu.matmul %401, %402, %cst_137 {dimension_numbers = #tpu.dot_dimension_numbers<[1], [1], [0], [0], [0, 0, 1, 0], [], []>} : vector<17x8xbf16>, vector<17x8xbf16>, vector<17x17xf32> -> vector<17x17xf32>
    %cst_138 = arith.constant 0.353553385 : f32
    %404 = vector.broadcast %cst_138 : f32 to vector<17x17xf32>
    %405 = arith.mulf %403, %404 : vector<17x17xf32>
    %406 = math.exp %405 : vector<17x17xf32>
    %cst_139 = arith.constant dense<0.000000e+00> : vector<17xf32>
    %407 = vector.multi_reduction <add>, %406, %cst_139 [1] : vector<17x17xf32> to vector<17xf32>
    %408 = vector.shape_cast %407 : vector<17xf32> to vector<17x1xf32>
    %409 = tpu.reciprocal %408 {approx = true} : vector<17x1xf32> -> vector<17x1xf32>
    %410 = vector.broadcast %409 : vector<17x1xf32> to vector<17x17xf32>
    %411 = arith.mulf %406, %410 : vector<17x17xf32>
    %412 = arith.truncf %411 : vector<17x17xf32> to vector<17x17xbf16>
    %413 = arith.truncf %400 : vector<17x8xf32> to vector<17x8xbf16>
    %cst_140 = arith.constant dense<0.000000e+00> : vector<17x8xf32>
    %414 = tpu.matmul %412, %413, %cst_140 {dimension_numbers = #tpu.dot_dimension_numbers<[1], [0], [0], [1], [0, 0, 1, 1], [], []>} : vector<17x17xbf16>, vector<17x8xbf16>, vector<17x8xf32> -> vector<17x8xf32>
    %415 = vector.extract_strided_slice %387 {offsets = [0, 8], sizes = [17, 8], strides = [1, 1]} : vector<17x96xf32> to vector<17x8xf32>
    %416 = vector.extract_strided_slice %387 {offsets = [0, 40], sizes = [17, 8], strides = [1, 1]} : vector<17x96xf32> to vector<17x8xf32>
    %417 = vector.extract_strided_slice %387 {offsets = [0, 72], sizes = [17, 8], strides = [1, 1]} : vector<17x96xf32> to vector<17x8xf32>
    %418 = arith.truncf %415 : vector<17x8xf32> to vector<17x8xbf16>
    %419 = arith.truncf %416 : vector<17x8xf32> to vector<17x8xbf16>
    %cst_141 = arith.constant dense<0.000000e+00> : vector<17x17xf32>
    %420 = tpu.matmul %418, %419, %cst_141 {dimension_numbers = #tpu.dot_dimension_numbers<[1], [1], [0], [0], [0, 0, 1, 0], [], []>} : vector<17x8xbf16>, vector<17x8xbf16>, vector<17x17xf32> -> vector<17x17xf32>
    %cst_142 = arith.constant 0.353553385 : f32
    %421 = vector.broadcast %cst_142 : f32 to vector<17x17xf32>
    %422 = arith.mulf %420, %421 : vector<17x17xf32>
    %423 = math.exp %422 : vector<17x17xf32>
    %cst_143 = arith.constant dense<0.000000e+00> : vector<17xf32>
    %424 = vector.multi_reduction <add>, %423, %cst_143 [1] : vector<17x17xf32> to vector<17xf32>
    %425 = vector.shape_cast %424 : vector<17xf32> to vector<17x1xf32>
    %426 = tpu.reciprocal %425 {approx = true} : vector<17x1xf32> -> vector<17x1xf32>
    %427 = vector.broadcast %426 : vector<17x1xf32> to vector<17x17xf32>
    %428 = arith.mulf %423, %427 : vector<17x17xf32>
    %429 = arith.truncf %428 : vector<17x17xf32> to vector<17x17xbf16>
    %430 = arith.truncf %417 : vector<17x8xf32> to vector<17x8xbf16>
    %cst_144 = arith.constant dense<0.000000e+00> : vector<17x8xf32>
    %431 = tpu.matmul %429, %430, %cst_144 {dimension_numbers = #tpu.dot_dimension_numbers<[1], [0], [0], [1], [0, 0, 1, 1], [], []>} : vector<17x17xbf16>, vector<17x8xbf16>, vector<17x8xf32> -> vector<17x8xf32>
    %432 = vector.extract_strided_slice %387 {offsets = [0, 16], sizes = [17, 8], strides = [1, 1]} : vector<17x96xf32> to vector<17x8xf32>
    %433 = vector.extract_strided_slice %387 {offsets = [0, 48], sizes = [17, 8], strides = [1, 1]} : vector<17x96xf32> to vector<17x8xf32>
    %434 = vector.extract_strided_slice %387 {offsets = [0, 80], sizes = [17, 8], strides = [1, 1]} : vector<17x96xf32> to vector<17x8xf32>
    %435 = arith.truncf %432 : vector<17x8xf32> to vector<17x8xbf16>
    %436 = arith.truncf %433 : vector<17x8xf32> to vector<17x8xbf16>
    %cst_145 = arith.constant dense<0.000000e+00> : vector<17x17xf32>
    %437 = tpu.matmul %435, %436, %cst_145 {dimension_numbers = #tpu.dot_dimension_numbers<[1], [1], [0], [0], [0, 0, 1, 0], [], []>} : vector<17x8xbf16>, vector<17x8xbf16>, vector<17x17xf32> -> vector<17x17xf32>
    %cst_146 = arith.constant 0.353553385 : f32
    %438 = vector.broadcast %cst_146 : f32 to vector<17x17xf32>
    %439 = arith.mulf %437, %438 : vector<17x17xf32>
    %440 = math.exp %439 : vector<17x17xf32>
    %cst_147 = arith.constant dense<0.000000e+00> : vector<17xf32>
    %441 = vector.multi_reduction <add>, %440, %cst_147 [1] : vector<17x17xf32> to vector<17xf32>
    %442 = vector.shape_cast %441 : vector<17xf32> to vector<17x1xf32>
    %443 = tpu.reciprocal %442 {approx = true} : vector<17x1xf32> -> vector<17x1xf32>
    %444 = vector.broadcast %443 : vector<17x1xf32> to vector<17x17xf32>
    %445 = arith.mulf %440, %444 : vector<17x17xf32>
    %446 = arith.truncf %445 : vector<17x17xf32> to vector<17x17xbf16>
    %447 = arith.truncf %434 : vector<17x8xf32> to vector<17x8xbf16>
    %cst_148 = arith.constant dense<0.000000e+00> : vector<17x8xf32>
    %448 = tpu.matmul %446, %447, %cst_148 {dimension_numbers = #tpu.dot_dimension_numbers<[1], [0], [0], [1], [0, 0, 1, 1], [], []>} : vector<17x17xbf16>, vector<17x8xbf16>, vector<17x8xf32> -> vector<17x8xf32>
    %449 = vector.extract_strided_slice %387 {offsets = [0, 24], sizes = [17, 8], strides = [1, 1]} : vector<17x96xf32> to vector<17x8xf32>
    %450 = vector.extract_strided_slice %387 {offsets = [0, 56], sizes = [17, 8], strides = [1, 1]} : vector<17x96xf32> to vector<17x8xf32>
    %451 = vector.extract_strided_slice %387 {offsets = [0, 88], sizes = [17, 8], strides = [1, 1]} : vector<17x96xf32> to vector<17x8xf32>
    %452 = arith.truncf %449 : vector<17x8xf32> to vector<17x8xbf16>
    %453 = arith.truncf %450 : vector<17x8xf32> to vector<17x8xbf16>
    %cst_149 = arith.constant dense<0.000000e+00> : vector<17x17xf32>
    %454 = tpu.matmul %452, %453, %cst_149 {dimension_numbers = #tpu.dot_dimension_numbers<[1], [1], [0], [0], [0, 0, 1, 0], [], []>} : vector<17x8xbf16>, vector<17x8xbf16>, vector<17x17xf32> -> vector<17x17xf32>
    %cst_150 = arith.constant 0.353553385 : f32
    %455 = vector.broadcast %cst_150 : f32 to vector<17x17xf32>
    %456 = arith.mulf %454, %455 : vector<17x17xf32>
    %457 = math.exp %456 : vector<17x17xf32>
    %cst_151 = arith.constant dense<0.000000e+00> : vector<17xf32>
    %458 = vector.multi_reduction <add>, %457, %cst_151 [1] : vector<17x17xf32> to vector<17xf32>
    %459 = vector.shape_cast %458 : vector<17xf32> to vector<17x1xf32>
    %460 = tpu.reciprocal %459 {approx = true} : vector<17x1xf32> -> vector<17x1xf32>
    %461 = vector.broadcast %460 : vector<17x1xf32> to vector<17x17xf32>
    %462 = arith.mulf %457, %461 : vector<17x17xf32>
    %463 = arith.truncf %462 : vector<17x17xf32> to vector<17x17xbf16>
    %464 = arith.truncf %451 : vector<17x8xf32> to vector<17x8xbf16>
    %cst_152 = arith.constant dense<0.000000e+00> : vector<17x8xf32>
    %465 = tpu.matmul %463, %464, %cst_152 {dimension_numbers = #tpu.dot_dimension_numbers<[1], [0], [0], [1], [0, 0, 1, 1], [], []>} : vector<17x17xbf16>, vector<17x8xbf16>, vector<17x8xf32> -> vector<17x8xf32>
    %466 = tpu.concatenate %414, %431, %448, %465 in 1 : vector<17x8xf32>, vector<17x8xf32>, vector<17x8xf32>, vector<17x8xf32> -> vector<17x32xf32>
    %467 = arith.truncf %466 : vector<17x32xf32> to vector<17x32xbf16>
    %cst_153 = arith.constant dense<0.000000e+00> : vector<17x32xf32>
    %468 = tpu.matmul %467, %369, %cst_153 {dimension_numbers = #tpu.dot_dimension_numbers<[1], [0], [0], [1], [0, 0, 1, 1], [], []>} : vector<17x32xbf16>, vector<32x32xbf16>, vector<17x32xf32> -> vector<17x32xf32>
    %469 = arith.addf %278, %468 : vector<17x32xf32>
    %470 = vector.broadcast %372 : vector<1x32xf32> to vector<17x32xf32>
    %471 = arith.addf %469, %470 : vector<17x32xf32>
    %472 = vector.extract_strided_slice %397 {offsets = [0, 0], sizes = [17, 8], strides = [1, 1]} : vector<17x96xf32> to vector<17x8xf32>
    %473 = vector.extract_strided_slice %397 {offsets = [0, 32], sizes = [17, 8], strides = [1, 1]} : vector<17x96xf32> to vector<17x8xf32>
    %474 = vector.extract_strided_slice %397 {offsets = [0, 64], sizes = [17, 8], strides = [1, 1]} : vector<17x96xf32> to vector<17x8xf32>
    %475 = arith.truncf %472 : vector<17x8xf32> to vector<17x8xbf16>
    %476 = arith.truncf %473 : vector<17x8xf32> to vector<17x8xbf16>
    %cst_154 = arith.constant dense<0.000000e+00> : vector<17x17xf32>
    %477 = tpu.matmul %475, %476, %cst_154 {dimension_numbers = #tpu.dot_dimension_numbers<[1], [1], [0], [0], [0, 0, 1, 0], [], []>} : vector<17x8xbf16>, vector<17x8xbf16>, vector<17x17xf32> -> vector<17x17xf32>
    %cst_155 = arith.constant 0.353553385 : f32
    %478 = vector.broadcast %cst_155 : f32 to vector<17x17xf32>
    %479 = arith.mulf %477, %478 : vector<17x17xf32>
    %480 = math.exp %479 : vector<17x17xf32>
    %cst_156 = arith.constant dense<0.000000e+00> : vector<17xf32>
    %481 = vector.multi_reduction <add>, %480, %cst_156 [1] : vector<17x17xf32> to vector<17xf32>
    %482 = vector.shape_cast %481 : vector<17xf32> to vector<17x1xf32>
    %483 = tpu.reciprocal %482 {approx = true} : vector<17x1xf32> -> vector<17x1xf32>
    %484 = vector.broadcast %483 : vector<17x1xf32> to vector<17x17xf32>
    %485 = arith.mulf %480, %484 : vector<17x17xf32>
    %486 = arith.truncf %485 : vector<17x17xf32> to vector<17x17xbf16>
    %487 = arith.truncf %474 : vector<17x8xf32> to vector<17x8xbf16>
    %cst_157 = arith.constant dense<0.000000e+00> : vector<17x8xf32>
    %488 = tpu.matmul %486, %487, %cst_157 {dimension_numbers = #tpu.dot_dimension_numbers<[1], [0], [0], [1], [0, 0, 1, 1], [], []>} : vector<17x17xbf16>, vector<17x8xbf16>, vector<17x8xf32> -> vector<17x8xf32>
    %489 = vector.extract_strided_slice %397 {offsets = [0, 8], sizes = [17, 8], strides = [1, 1]} : vector<17x96xf32> to vector<17x8xf32>
    %490 = vector.extract_strided_slice %397 {offsets = [0, 40], sizes = [17, 8], strides = [1, 1]} : vector<17x96xf32> to vector<17x8xf32>
    %491 = vector.extract_strided_slice %397 {offsets = [0, 72], sizes = [17, 8], strides = [1, 1]} : vector<17x96xf32> to vector<17x8xf32>
    %492 = arith.truncf %489 : vector<17x8xf32> to vector<17x8xbf16>
    %493 = arith.truncf %490 : vector<17x8xf32> to vector<17x8xbf16>
    %cst_158 = arith.constant dense<0.000000e+00> : vector<17x17xf32>
    %494 = tpu.matmul %492, %493, %cst_158 {dimension_numbers = #tpu.dot_dimension_numbers<[1], [1], [0], [0], [0, 0, 1, 0], [], []>} : vector<17x8xbf16>, vector<17x8xbf16>, vector<17x17xf32> -> vector<17x17xf32>
    %cst_159 = arith.constant 0.353553385 : f32
    %495 = vector.broadcast %cst_159 : f32 to vector<17x17xf32>
    %496 = arith.mulf %494, %495 : vector<17x17xf32>
    %497 = math.exp %496 : vector<17x17xf32>
    %cst_160 = arith.constant dense<0.000000e+00> : vector<17xf32>
    %498 = vector.multi_reduction <add>, %497, %cst_160 [1] : vector<17x17xf32> to vector<17xf32>
    %499 = vector.shape_cast %498 : vector<17xf32> to vector<17x1xf32>
    %500 = tpu.reciprocal %499 {approx = true} : vector<17x1xf32> -> vector<17x1xf32>
    %501 = vector.broadcast %500 : vector<17x1xf32> to vector<17x17xf32>
    %502 = arith.mulf %497, %501 : vector<17x17xf32>
    %503 = arith.truncf %502 : vector<17x17xf32> to vector<17x17xbf16>
    %504 = arith.truncf %491 : vector<17x8xf32> to vector<17x8xbf16>
    %cst_161 = arith.constant dense<0.000000e+00> : vector<17x8xf32>
    %505 = tpu.matmul %503, %504, %cst_161 {dimension_numbers = #tpu.dot_dimension_numbers<[1], [0], [0], [1], [0, 0, 1, 1], [], []>} : vector<17x17xbf16>, vector<17x8xbf16>, vector<17x8xf32> -> vector<17x8xf32>
    %506 = vector.extract_strided_slice %397 {offsets = [0, 16], sizes = [17, 8], strides = [1, 1]} : vector<17x96xf32> to vector<17x8xf32>
    %507 = vector.extract_strided_slice %397 {offsets = [0, 48], sizes = [17, 8], strides = [1, 1]} : vector<17x96xf32> to vector<17x8xf32>
    %508 = vector.extract_strided_slice %397 {offsets = [0, 80], sizes = [17, 8], strides = [1, 1]} : vector<17x96xf32> to vector<17x8xf32>
    %509 = arith.truncf %506 : vector<17x8xf32> to vector<17x8xbf16>
    %510 = arith.truncf %507 : vector<17x8xf32> to vector<17x8xbf16>
    %cst_162 = arith.constant dense<0.000000e+00> : vector<17x17xf32>
    %511 = tpu.matmul %509, %510, %cst_162 {dimension_numbers = #tpu.dot_dimension_numbers<[1], [1], [0], [0], [0, 0, 1, 0], [], []>} : vector<17x8xbf16>, vector<17x8xbf16>, vector<17x17xf32> -> vector<17x17xf32>
    %cst_163 = arith.constant 0.353553385 : f32
    %512 = vector.broadcast %cst_163 : f32 to vector<17x17xf32>
    %513 = arith.mulf %511, %512 : vector<17x17xf32>
    %514 = math.exp %513 : vector<17x17xf32>
    %cst_164 = arith.constant dense<0.000000e+00> : vector<17xf32>
    %515 = vector.multi_reduction <add>, %514, %cst_164 [1] : vector<17x17xf32> to vector<17xf32>
    %516 = vector.shape_cast %515 : vector<17xf32> to vector<17x1xf32>
    %517 = tpu.reciprocal %516 {approx = true} : vector<17x1xf32> -> vector<17x1xf32>
    %518 = vector.broadcast %517 : vector<17x1xf32> to vector<17x17xf32>
    %519 = arith.mulf %514, %518 : vector<17x17xf32>
    %520 = arith.truncf %519 : vector<17x17xf32> to vector<17x17xbf16>
    %521 = arith.truncf %508 : vector<17x8xf32> to vector<17x8xbf16>
    %cst_165 = arith.constant dense<0.000000e+00> : vector<17x8xf32>
    %522 = tpu.matmul %520, %521, %cst_165 {dimension_numbers = #tpu.dot_dimension_numbers<[1], [0], [0], [1], [0, 0, 1, 1], [], []>} : vector<17x17xbf16>, vector<17x8xbf16>, vector<17x8xf32> -> vector<17x8xf32>
    %523 = vector.extract_strided_slice %397 {offsets = [0, 24], sizes = [17, 8], strides = [1, 1]} : vector<17x96xf32> to vector<17x8xf32>
    %524 = vector.extract_strided_slice %397 {offsets = [0, 56], sizes = [17, 8], strides = [1, 1]} : vector<17x96xf32> to vector<17x8xf32>
    %525 = vector.extract_strided_slice %397 {offsets = [0, 88], sizes = [17, 8], strides = [1, 1]} : vector<17x96xf32> to vector<17x8xf32>
    %526 = arith.truncf %523 : vector<17x8xf32> to vector<17x8xbf16>
    %527 = arith.truncf %524 : vector<17x8xf32> to vector<17x8xbf16>
    %cst_166 = arith.constant dense<0.000000e+00> : vector<17x17xf32>
    %528 = tpu.matmul %526, %527, %cst_166 {dimension_numbers = #tpu.dot_dimension_numbers<[1], [1], [0], [0], [0, 0, 1, 0], [], []>} : vector<17x8xbf16>, vector<17x8xbf16>, vector<17x17xf32> -> vector<17x17xf32>
    %cst_167 = arith.constant 0.353553385 : f32
    %529 = vector.broadcast %cst_167 : f32 to vector<17x17xf32>
    %530 = arith.mulf %528, %529 : vector<17x17xf32>
    %531 = math.exp %530 : vector<17x17xf32>
    %cst_168 = arith.constant dense<0.000000e+00> : vector<17xf32>
    %532 = vector.multi_reduction <add>, %531, %cst_168 [1] : vector<17x17xf32> to vector<17xf32>
    %533 = vector.shape_cast %532 : vector<17xf32> to vector<17x1xf32>
    %534 = tpu.reciprocal %533 {approx = true} : vector<17x1xf32> -> vector<17x1xf32>
    %535 = vector.broadcast %534 : vector<17x1xf32> to vector<17x17xf32>
    %536 = arith.mulf %531, %535 : vector<17x17xf32>
    %537 = arith.truncf %536 : vector<17x17xf32> to vector<17x17xbf16>
    %538 = arith.truncf %525 : vector<17x8xf32> to vector<17x8xbf16>
    %cst_169 = arith.constant dense<0.000000e+00> : vector<17x8xf32>
    %539 = tpu.matmul %537, %538, %cst_169 {dimension_numbers = #tpu.dot_dimension_numbers<[1], [0], [0], [1], [0, 0, 1, 1], [], []>} : vector<17x17xbf16>, vector<17x8xbf16>, vector<17x8xf32> -> vector<17x8xf32>
    %540 = tpu.concatenate %488, %505, %522, %539 in 1 : vector<17x8xf32>, vector<17x8xf32>, vector<17x8xf32>, vector<17x8xf32> -> vector<17x32xf32>
    %541 = arith.truncf %540 : vector<17x32xf32> to vector<17x32xbf16>
    %cst_170 = arith.constant dense<0.000000e+00> : vector<17x32xf32>
    %542 = tpu.matmul %541, %369, %cst_170 {dimension_numbers = #tpu.dot_dimension_numbers<[1], [0], [0], [1], [0, 0, 1, 1], [], []>} : vector<17x32xbf16>, vector<32x32xbf16>, vector<17x32xf32> -> vector<17x32xf32>
    %543 = arith.addf %367, %542 : vector<17x32xf32>
    %544 = vector.broadcast %372 : vector<1x32xf32> to vector<17x32xf32>
    %545 = arith.addf %543, %544 : vector<17x32xf32>
    %546 = arith.truncf %471 : vector<17x32xf32> to vector<17x32xbf16>
    %cst_171 = arith.constant dense<0.000000e+00> : vector<17x128xf32>
    %547 = tpu.matmul %546, %370, %cst_171 {dimension_numbers = #tpu.dot_dimension_numbers<[1], [0], [0], [1], [0, 0, 1, 1], [], []>} : vector<17x32xbf16>, vector<32x128xbf16>, vector<17x128xf32> -> vector<17x128xf32>
    %548 = vector.broadcast %373 : vector<1x128xf32> to vector<17x128xf32>
    %549 = arith.addf %547, %548 : vector<17x128xf32>
    %cst_172 = arith.constant 5.000000e-01 : f32
    %550 = vector.broadcast %cst_172 : f32 to vector<17x128xf32>
    %551 = arith.mulf %550, %549 : vector<17x128xf32>
    %cst_173 = arith.constant 0.707106769 : f32
    %552 = vector.broadcast %cst_173 : f32 to vector<17x128xf32>
    %553 = arith.mulf %549, %552 : vector<17x128xf32>
    %554 = math.absf %553 : vector<17x128xf32>
    %cst_174 = arith.constant 0.327591091 : f32
    %555 = vector.broadcast %cst_174 : f32 to vector<17x128xf32>
    %556 = arith.mulf %555, %554 : vector<17x128xf32>
    %cst_175 = arith.constant 1.000000e+00 : f32
    %557 = vector.broadcast %cst_175 : f32 to vector<17x128xf32>
    %558 = arith.addf %557, %556 : vector<17x128xf32>
    %cst_176 = arith.constant 1.000000e+00 : f32
    %559 = vector.broadcast %cst_176 : f32 to vector<17x128xf32>
    %560 = arith.divf %559, %558 : vector<17x128xf32>
    %cst_177 = arith.constant 1.06140542 : f32
    %561 = vector.broadcast %cst_177 : f32 to vector<17x128xf32>
    %562 = arith.mulf %561, %560 : vector<17x128xf32>
    %cst_178 = arith.constant -1.45315206 : f32
    %563 = vector.broadcast %cst_178 : f32 to vector<17x128xf32>
    %564 = arith.addf %562, %563 : vector<17x128xf32>
    %565 = arith.mulf %564, %560 : vector<17x128xf32>
    %cst_179 = arith.constant 1.42141378 : f32
    %566 = vector.broadcast %cst_179 : f32 to vector<17x128xf32>
    %567 = arith.addf %565, %566 : vector<17x128xf32>
    %568 = arith.mulf %567, %560 : vector<17x128xf32>
    %cst_180 = arith.constant -0.284496725 : f32
    %569 = vector.broadcast %cst_180 : f32 to vector<17x128xf32>
    %570 = arith.addf %568, %569 : vector<17x128xf32>
    %571 = arith.mulf %570, %560 : vector<17x128xf32>
    %cst_181 = arith.constant 0.254829586 : f32
    %572 = vector.broadcast %cst_181 : f32 to vector<17x128xf32>
    %573 = arith.addf %571, %572 : vector<17x128xf32>
    %574 = arith.mulf %573, %560 : vector<17x128xf32>
    %cst_182 = arith.constant 0.000000e+00 : f32
    %575 = vector.broadcast %cst_182 : f32 to vector<17x128xf32>
    %576 = arith.subf %575, %554 : vector<17x128xf32>
    %577 = arith.mulf %576, %554 : vector<17x128xf32>
    %578 = math.exp %577 : vector<17x128xf32>
    %579 = arith.mulf %574, %578 : vector<17x128xf32>
    %cst_183 = arith.constant 1.000000e+00 : f32
    %580 = vector.broadcast %cst_183 : f32 to vector<17x128xf32>
    %581 = arith.subf %580, %579 : vector<17x128xf32>
    %cst_184 = arith.constant 0.000000e+00 : f32
    %582 = vector.broadcast %cst_184 : f32 to vector<17x128xf32>
    %583 = arith.cmpf oge, %553, %582 : vector<17x128xf32>
    %cst_185 = arith.constant 0.000000e+00 : f32
    %584 = vector.broadcast %cst_185 : f32 to vector<17x128xf32>
    %585 = arith.subf %584, %581 : vector<17x128xf32>
    %586 = arith.select %583, %581, %585 : vector<17x128xi1>, vector<17x128xf32>
    %cst_186 = arith.constant 1.000000e+00 : f32
    %587 = vector.broadcast %cst_186 : f32 to vector<17x128xf32>
    %588 = arith.addf %587, %586 : vector<17x128xf32>
    %589 = arith.mulf %551, %588 : vector<17x128xf32>
    %590 = arith.truncf %589 : vector<17x128xf32> to vector<17x128xbf16>
    %cst_187 = arith.constant dense<0.000000e+00> : vector<17x32xf32>
    %591 = tpu.matmul %590, %371, %cst_187 {dimension_numbers = #tpu.dot_dimension_numbers<[1], [0], [0], [1], [0, 0, 1, 1], [], []>} : vector<17x128xbf16>, vector<128x32xbf16>, vector<17x32xf32> -> vector<17x32xf32>
    %592 = vector.broadcast %374 : vector<1x32xf32> to vector<17x32xf32>
    %593 = arith.addf %591, %592 : vector<17x32xf32>
    %cst_188 = arith.constant 5.000000e-01 : f32
    %594 = vector.broadcast %cst_188 : f32 to vector<17x32xf32>
    %595 = arith.mulf %594, %593 : vector<17x32xf32>
    %cst_189 = arith.constant 0.707106769 : f32
    %596 = vector.broadcast %cst_189 : f32 to vector<17x32xf32>
    %597 = arith.mulf %593, %596 : vector<17x32xf32>
    %598 = math.absf %597 : vector<17x32xf32>
    %cst_190 = arith.constant 0.327591091 : f32
    %599 = vector.broadcast %cst_190 : f32 to vector<17x32xf32>
    %600 = arith.mulf %599, %598 : vector<17x32xf32>
    %cst_191 = arith.constant 1.000000e+00 : f32
    %601 = vector.broadcast %cst_191 : f32 to vector<17x32xf32>
    %602 = arith.addf %601, %600 : vector<17x32xf32>
    %cst_192 = arith.constant 1.000000e+00 : f32
    %603 = vector.broadcast %cst_192 : f32 to vector<17x32xf32>
    %604 = arith.divf %603, %602 : vector<17x32xf32>
    %cst_193 = arith.constant 1.06140542 : f32
    %605 = vector.broadcast %cst_193 : f32 to vector<17x32xf32>
    %606 = arith.mulf %605, %604 : vector<17x32xf32>
    %cst_194 = arith.constant -1.45315206 : f32
    %607 = vector.broadcast %cst_194 : f32 to vector<17x32xf32>
    %608 = arith.addf %606, %607 : vector<17x32xf32>
    %609 = arith.mulf %608, %604 : vector<17x32xf32>
    %cst_195 = arith.constant 1.42141378 : f32
    %610 = vector.broadcast %cst_195 : f32 to vector<17x32xf32>
    %611 = arith.addf %609, %610 : vector<17x32xf32>
    %612 = arith.mulf %611, %604 : vector<17x32xf32>
    %cst_196 = arith.constant -0.284496725 : f32
    %613 = vector.broadcast %cst_196 : f32 to vector<17x32xf32>
    %614 = arith.addf %612, %613 : vector<17x32xf32>
    %615 = arith.mulf %614, %604 : vector<17x32xf32>
    %cst_197 = arith.constant 0.254829586 : f32
    %616 = vector.broadcast %cst_197 : f32 to vector<17x32xf32>
    %617 = arith.addf %615, %616 : vector<17x32xf32>
    %618 = arith.mulf %617, %604 : vector<17x32xf32>
    %cst_198 = arith.constant 0.000000e+00 : f32
    %619 = vector.broadcast %cst_198 : f32 to vector<17x32xf32>
    %620 = arith.subf %619, %598 : vector<17x32xf32>
    %621 = arith.mulf %620, %598 : vector<17x32xf32>
    %622 = math.exp %621 : vector<17x32xf32>
    %623 = arith.mulf %618, %622 : vector<17x32xf32>
    %cst_199 = arith.constant 1.000000e+00 : f32
    %624 = vector.broadcast %cst_199 : f32 to vector<17x32xf32>
    %625 = arith.subf %624, %623 : vector<17x32xf32>
    %cst_200 = arith.constant 0.000000e+00 : f32
    %626 = vector.broadcast %cst_200 : f32 to vector<17x32xf32>
    %627 = arith.cmpf oge, %597, %626 : vector<17x32xf32>
    %cst_201 = arith.constant 0.000000e+00 : f32
    %628 = vector.broadcast %cst_201 : f32 to vector<17x32xf32>
    %629 = arith.subf %628, %625 : vector<17x32xf32>
    %630 = arith.select %627, %625, %629 : vector<17x32xi1>, vector<17x32xf32>
    %cst_202 = arith.constant 1.000000e+00 : f32
    %631 = vector.broadcast %cst_202 : f32 to vector<17x32xf32>
    %632 = arith.addf %631, %630 : vector<17x32xf32>
    %633 = arith.mulf %595, %632 : vector<17x32xf32>
    %634 = arith.addf %471, %633 : vector<17x32xf32>
    %635 = arith.truncf %545 : vector<17x32xf32> to vector<17x32xbf16>
    %cst_203 = arith.constant dense<0.000000e+00> : vector<17x128xf32>
    %636 = tpu.matmul %635, %370, %cst_203 {dimension_numbers = #tpu.dot_dimension_numbers<[1], [0], [0], [1], [0, 0, 1, 1], [], []>} : vector<17x32xbf16>, vector<32x128xbf16>, vector<17x128xf32> -> vector<17x128xf32>
    %637 = vector.broadcast %373 : vector<1x128xf32> to vector<17x128xf32>
    %638 = arith.addf %636, %637 : vector<17x128xf32>
    %cst_204 = arith.constant 5.000000e-01 : f32
    %639 = vector.broadcast %cst_204 : f32 to vector<17x128xf32>
    %640 = arith.mulf %639, %638 : vector<17x128xf32>
    %cst_205 = arith.constant 0.707106769 : f32
    %641 = vector.broadcast %cst_205 : f32 to vector<17x128xf32>
    %642 = arith.mulf %638, %641 : vector<17x128xf32>
    %643 = math.absf %642 : vector<17x128xf32>
    %cst_206 = arith.constant 0.327591091 : f32
    %644 = vector.broadcast %cst_206 : f32 to vector<17x128xf32>
    %645 = arith.mulf %644, %643 : vector<17x128xf32>
    %cst_207 = arith.constant 1.000000e+00 : f32
    %646 = vector.broadcast %cst_207 : f32 to vector<17x128xf32>
    %647 = arith.addf %646, %645 : vector<17x128xf32>
    %cst_208 = arith.constant 1.000000e+00 : f32
    %648 = vector.broadcast %cst_208 : f32 to vector<17x128xf32>
    %649 = arith.divf %648, %647 : vector<17x128xf32>
    %cst_209 = arith.constant 1.06140542 : f32
    %650 = vector.broadcast %cst_209 : f32 to vector<17x128xf32>
    %651 = arith.mulf %650, %649 : vector<17x128xf32>
    %cst_210 = arith.constant -1.45315206 : f32
    %652 = vector.broadcast %cst_210 : f32 to vector<17x128xf32>
    %653 = arith.addf %651, %652 : vector<17x128xf32>
    %654 = arith.mulf %653, %649 : vector<17x128xf32>
    %cst_211 = arith.constant 1.42141378 : f32
    %655 = vector.broadcast %cst_211 : f32 to vector<17x128xf32>
    %656 = arith.addf %654, %655 : vector<17x128xf32>
    %657 = arith.mulf %656, %649 : vector<17x128xf32>
    %cst_212 = arith.constant -0.284496725 : f32
    %658 = vector.broadcast %cst_212 : f32 to vector<17x128xf32>
    %659 = arith.addf %657, %658 : vector<17x128xf32>
    %660 = arith.mulf %659, %649 : vector<17x128xf32>
    %cst_213 = arith.constant 0.254829586 : f32
    %661 = vector.broadcast %cst_213 : f32 to vector<17x128xf32>
    %662 = arith.addf %660, %661 : vector<17x128xf32>
    %663 = arith.mulf %662, %649 : vector<17x128xf32>
    %cst_214 = arith.constant 0.000000e+00 : f32
    %664 = vector.broadcast %cst_214 : f32 to vector<17x128xf32>
    %665 = arith.subf %664, %643 : vector<17x128xf32>
    %666 = arith.mulf %665, %643 : vector<17x128xf32>
    %667 = math.exp %666 : vector<17x128xf32>
    %668 = arith.mulf %663, %667 : vector<17x128xf32>
    %cst_215 = arith.constant 1.000000e+00 : f32
    %669 = vector.broadcast %cst_215 : f32 to vector<17x128xf32>
    %670 = arith.subf %669, %668 : vector<17x128xf32>
    %cst_216 = arith.constant 0.000000e+00 : f32
    %671 = vector.broadcast %cst_216 : f32 to vector<17x128xf32>
    %672 = arith.cmpf oge, %642, %671 : vector<17x128xf32>
    %cst_217 = arith.constant 0.000000e+00 : f32
    %673 = vector.broadcast %cst_217 : f32 to vector<17x128xf32>
    %674 = arith.subf %673, %670 : vector<17x128xf32>
    %675 = arith.select %672, %670, %674 : vector<17x128xi1>, vector<17x128xf32>
    %cst_218 = arith.constant 1.000000e+00 : f32
    %676 = vector.broadcast %cst_218 : f32 to vector<17x128xf32>
    %677 = arith.addf %676, %675 : vector<17x128xf32>
    %678 = arith.mulf %640, %677 : vector<17x128xf32>
    %679 = arith.truncf %678 : vector<17x128xf32> to vector<17x128xbf16>
    %cst_219 = arith.constant dense<0.000000e+00> : vector<17x32xf32>
    %680 = tpu.matmul %679, %371, %cst_219 {dimension_numbers = #tpu.dot_dimension_numbers<[1], [0], [0], [1], [0, 0, 1, 1], [], []>} : vector<17x128xbf16>, vector<128x32xbf16>, vector<17x32xf32> -> vector<17x32xf32>
    %681 = vector.broadcast %374 : vector<1x32xf32> to vector<17x32xf32>
    %682 = arith.addf %680, %681 : vector<17x32xf32>
    %cst_220 = arith.constant 5.000000e-01 : f32
    %683 = vector.broadcast %cst_220 : f32 to vector<17x32xf32>
    %684 = arith.mulf %683, %682 : vector<17x32xf32>
    %cst_221 = arith.constant 0.707106769 : f32
    %685 = vector.broadcast %cst_221 : f32 to vector<17x32xf32>
    %686 = arith.mulf %682, %685 : vector<17x32xf32>
    %687 = math.absf %686 : vector<17x32xf32>
    %cst_222 = arith.constant 0.327591091 : f32
    %688 = vector.broadcast %cst_222 : f32 to vector<17x32xf32>
    %689 = arith.mulf %688, %687 : vector<17x32xf32>
    %cst_223 = arith.constant 1.000000e+00 : f32
    %690 = vector.broadcast %cst_223 : f32 to vector<17x32xf32>
    %691 = arith.addf %690, %689 : vector<17x32xf32>
    %cst_224 = arith.constant 1.000000e+00 : f32
    %692 = vector.broadcast %cst_224 : f32 to vector<17x32xf32>
    %693 = arith.divf %692, %691 : vector<17x32xf32>
    %cst_225 = arith.constant 1.06140542 : f32
    %694 = vector.broadcast %cst_225 : f32 to vector<17x32xf32>
    %695 = arith.mulf %694, %693 : vector<17x32xf32>
    %cst_226 = arith.constant -1.45315206 : f32
    %696 = vector.broadcast %cst_226 : f32 to vector<17x32xf32>
    %697 = arith.addf %695, %696 : vector<17x32xf32>
    %698 = arith.mulf %697, %693 : vector<17x32xf32>
    %cst_227 = arith.constant 1.42141378 : f32
    %699 = vector.broadcast %cst_227 : f32 to vector<17x32xf32>
    %700 = arith.addf %698, %699 : vector<17x32xf32>
    %701 = arith.mulf %700, %693 : vector<17x32xf32>
    %cst_228 = arith.constant -0.284496725 : f32
    %702 = vector.broadcast %cst_228 : f32 to vector<17x32xf32>
    %703 = arith.addf %701, %702 : vector<17x32xf32>
    %704 = arith.mulf %703, %693 : vector<17x32xf32>
    %cst_229 = arith.constant 0.254829586 : f32
    %705 = vector.broadcast %cst_229 : f32 to vector<17x32xf32>
    %706 = arith.addf %704, %705 : vector<17x32xf32>
    %707 = arith.mulf %706, %693 : vector<17x32xf32>
    %cst_230 = arith.constant 0.000000e+00 : f32
    %708 = vector.broadcast %cst_230 : f32 to vector<17x32xf32>
    %709 = arith.subf %708, %687 : vector<17x32xf32>
    %710 = arith.mulf %709, %687 : vector<17x32xf32>
    %711 = math.exp %710 : vector<17x32xf32>
    %712 = arith.mulf %707, %711 : vector<17x32xf32>
    %cst_231 = arith.constant 1.000000e+00 : f32
    %713 = vector.broadcast %cst_231 : f32 to vector<17x32xf32>
    %714 = arith.subf %713, %712 : vector<17x32xf32>
    %cst_232 = arith.constant 0.000000e+00 : f32
    %715 = vector.broadcast %cst_232 : f32 to vector<17x32xf32>
    %716 = arith.cmpf oge, %686, %715 : vector<17x32xf32>
    %cst_233 = arith.constant 0.000000e+00 : f32
    %717 = vector.broadcast %cst_233 : f32 to vector<17x32xf32>
    %718 = arith.subf %717, %714 : vector<17x32xf32>
    %719 = arith.select %716, %714, %718 : vector<17x32xi1>, vector<17x32xf32>
    %cst_234 = arith.constant 1.000000e+00 : f32
    %720 = vector.broadcast %cst_234 : f32 to vector<17x32xf32>
    %721 = arith.addf %720, %719 : vector<17x32xf32>
    %722 = arith.mulf %684, %721 : vector<17x32xf32>
    %723 = arith.addf %545, %722 : vector<17x32xf32>
    %724 = vector.extract_strided_slice %634 {offsets = [0, 0], sizes = [1, 32], strides = [1, 1]} : vector<17x32xf32> to vector<1x32xf32>
    %725 = vector.extract_strided_slice %723 {offsets = [0, 0], sizes = [1, 32], strides = [1, 1]} : vector<17x32xf32> to vector<1x32xf32>
    %726 = tpu.concatenate %724, %725 in 0 : vector<1x32xf32>, vector<1x32xf32> -> vector<2x32xf32>
    %cst_235 = arith.constant dense<0.000000e+00> : vector<2xf32>
    %727 = vector.multi_reduction <add>, %726, %cst_235 [1] : vector<2x32xf32> to vector<2xf32>
    %728 = vector.shape_cast %727 : vector<2xf32> to vector<2x1xf32>
    %cst_236 = arith.constant 3.200000e+01 : f32
    %729 = vector.broadcast %cst_236 : f32 to vector<2x1xf32>
    %730 = arith.divf %728, %729 : vector<2x1xf32>
    %731 = vector.broadcast %730 : vector<2x1xf32> to vector<2x32xf32>
    %732 = arith.subf %726, %731 : vector<2x32xf32>
    %733 = arith.mulf %732, %732 : vector<2x32xf32>
    %cst_237 = arith.constant dense<0.000000e+00> : vector<2xf32>
    %734 = vector.multi_reduction <add>, %733, %cst_237 [1] : vector<2x32xf32> to vector<2xf32>
    %735 = vector.shape_cast %734 : vector<2xf32> to vector<2x1xf32>
    %cst_238 = arith.constant 3.200000e+01 : f32
    %736 = vector.broadcast %cst_238 : f32 to vector<2x1xf32>
    %737 = arith.divf %735, %736 : vector<2x1xf32>
    %738 = vector.broadcast %730 : vector<2x1xf32> to vector<2x32xf32>
    %739 = arith.subf %726, %738 : vector<2x32xf32>
    %cst_239 = arith.constant 9.99999974E-6 : f32
    %740 = vector.broadcast %cst_239 : f32 to vector<2x1xf32>
    %741 = arith.addf %737, %740 : vector<2x1xf32>
    %742 = math.rsqrt %741 : vector<2x1xf32>
    %743 = vector.broadcast %742 : vector<2x1xf32> to vector<2x32xf32>
    %744 = arith.mulf %739, %743 : vector<2x32xf32>
    %c23 = arith.constant 23 : index
    %c0_240 = arith.constant 0 : index
    %745 = vector.load %arg2[%c23, %c0_240] : memref<26x128xf32, #tpu.memory_space<vmem>>, vector<1x32xf32>
    %746 = vector.broadcast %745 : vector<1x32xf32> to vector<2x32xf32>
    %747 = arith.mulf %744, %746 : vector<2x32xf32>
    %c24 = arith.constant 24 : index
    %c0_241 = arith.constant 0 : index
    %748 = vector.load %arg2[%c24, %c0_241] : memref<26x128xf32, #tpu.memory_space<vmem>>, vector<1x32xf32>
    %749 = vector.broadcast %748 : vector<1x32xf32> to vector<2x32xf32>
    %750 = arith.addf %747, %749 : vector<2x32xf32>
    %c496 = arith.constant 496 : index
    %c0_242 = arith.constant 0 : index
    %751 = vector.load %arg1[%c496, %c0_242] : memref<528x128xbf16, #tpu.memory_space<vmem>>, vector<32x128xbf16>
    %c25 = arith.constant 25 : index
    %c0_243 = arith.constant 0 : index
    %752 = vector.load %arg2[%c25, %c0_243] : memref<26x128xf32, #tpu.memory_space<vmem>>, vector<1x128xf32>
    %753 = arith.truncf %750 : vector<2x32xf32> to vector<2x32xbf16>
    %cst_244 = arith.constant dense<0.000000e+00> : vector<2x128xf32>
    %754 = tpu.matmul %753, %751, %cst_244 {dimension_numbers = #tpu.dot_dimension_numbers<[1], [0], [0], [1], [0, 0, 1, 1], [], []>} : vector<2x32xbf16>, vector<32x128xbf16>, vector<2x128xf32> -> vector<2x128xf32>
    %755 = vector.broadcast %752 : vector<1x128xf32> to vector<2x128xf32>
    %756 = arith.addf %754, %755 : vector<2x128xf32>
    %c0_245 = arith.constant 0 : index
    %c0_246 = arith.constant 0 : index
    %757 = vector.load %arg3[%c0_245, %c0_246] : memref<2x128xf32, #tpu.memory_space<vmem>>, vector<2x128xf32>
    tpu.vector_store %arg3[%c0_245, %c0_246], %756 {strides = array<i32>} : memref<2x128xf32, #tpu.memory_space<vmem>>, vector<2x128xf32>,
    return
  }
}

</mosaic_0001>

<bundles_post_ra>
// kernel: spiking_vit_forward.1
= control target key start
LH: loop header
LB: loop body
LE: loop exit
PB: predicated region body
PF: predicated region fallthrough
CT: control target
= control target key end

     0   :  { %vm48_vm0 = vcmask 392192   ;;  %s7247_s0 = inlined_call_operand.vmem [shape: f32[2,17,48], index: 0, kind: input, shape index: {}]   ;;  %s7248_s1 = inlined_call_operand.vmem [shape: bf16[528,128], index: 1, kind: input, shape index: {}]   ;;  %s7249_s2 = inlined_call_operand.vmem [shape: f32[26,128], index: 2, kind: input, shape index: {}]   ;;  %s7250_s3 = inlined_call_operand.hbm [shape: f32[2,128], index: 3, kind: output, shape index: {}]  }
   0x1   :  { %v5674_v0 = vld [vmem:[%s7248_s1] sm:$0xff]   ;;  %v5675_v1 = vld [vmem:[%s7248_s1 + $0x8] sm:$0xff]   ;;  %v5676_v4 = vld [vmem:[%s7248_s1 + $0x10] sm:$0xff]  }
   0x2   :  { %5104 = vmatprep.subr.bf16.mxu0 %v5674_v0  ;;  %5114 = vmatprep.subr.bf16.mxu1 %v5674_v0  ;;  %v25_v2 = vld [vmem:[%s7247_s0] sm:$0xff]  ;;  %v26_v3 = vld [vmem:[%s7247_s0 + $0x8] sm:$0xff]  ;;  %v4730_v6 = vld [vmem:[%s7247_s0 + $0x18] sm:$0xff] }
   0x3   :  { %5105 = vmatpush3.bf16.msra.mxu0 %v5674_v0  ;;  %5115 = vmatpush3.bf16.msra.mxu1 %v5674_v0  ;;  %v28_v5 = vpack.c.bf16 %v26_v3, %v25_v2  ;;  %v4731_v7 = vld [vmem:[%s7247_s0 + $0x20] sm:$0xff]  ;;  %v27_v8 = vld [vmem:[%s7247_s0 + $0x10] sm:$0x1]  ;;  %v4732_v10 = vld [vmem:[%s7247_s0 + $0x28] sm:$0x1] }
   0x4   :  { %5106 = vmatprep.subr.bf16.mxu0 %v5675_v1  ;;  %5116 = vmatprep.subr.bf16.mxu1 %v5675_v1  ;;  %v107_v9 = vpack.c.bf16 %v4731_v7, %v4730_v6  ;;  %v29_v11 = vpack.c.bf16 %v27_v8, %v27_v8  ;;  %v108_v12 = vpack.c.bf16 %v4732_v10, %v4732_v10 }
   0x5   :  { %5110 = vmatprep.mubr.msk.bf16.mxu0 %vm48_vm0, %v28_v5 }
   0x6   :  { %5120 = vmatprep.mubr.msk.bf16.mxu1 %vm48_vm0, %v107_v9 }
   0x7   :  { %5107 = vmatpush3.bf16.msra.mxu0 %v5675_v1  ;;  %5117 = vmatpush3.bf16.msra.mxu1 %v5675_v1 }
   0x8   :  { %5108 = vmatprep.subr.bf16.mxu0 %v5676_v4  ;;  %5118 = vmatprep.subr.bf16.mxu1 %v5676_v4 }
   0xb   :  { %5109 = vmatpush3.bf16.msra.mxu0 %v5676_v4  ;;  %5119 = vmatpush3.bf16.msra.mxu1 %v5676_v4 }
   0xe   :  { %5111 = vmatmul.mubr.msk.bf16.vlgmr.msra.gmra.mrb[0].mxu0 %vm48_vm0, %v29_v11  ;;  %5121 = vmatmul.mubr.msk.bf16.vlgmr.msra.gmra.mrb[0].mxu1 %vm48_vm0, %v108_v12 }
   0xf   :  { %8 = vsyncpa [#allocation3], 0  ;;  %v5677_v13 = vld [vmem:[%s7248_s1 + $0x18] sm:$0xff]   ;;  %v5678_v14 = vld [vmem:[%s7248_s1 + $0x20] sm:$0xff]   ;;  %vm208_vm1 = vcmask 261120   ;;  %v6005_v52 = vmov 0.0  }
  0x10   :  { %5124 = vmatprep.subr.bf16.mxu0 %v5677_v13  ;;  %5132 = vmatprep.subr.bf16.mxu1 %v5677_v13  ;;  %v18_v15 = vld [vmem:[%s7249_s2 + $0x10] sm:$0x1]  ;;  %v16_v19 = vld [vmem:[%s7249_s2] sm:$0xff]  ;;  %v17_v20 = vld [vmem:[%s7249_s2 + $0x8] sm:$0xff]  ;;  %vm363_vm5 = vcmask 64512   ;;  %s6006_s12 = smov 64  }
  0x11   :  { %5125 = vmatpush3.bf16.msra.mxu0 %v5677_v13  ;;  %5133 = vmatpush3.bf16.msra.mxu1 %v5677_v13  ;;  %s6007_s13 = smov 96   ;;  %vm463_vm8 = vcmask 1040384   ;;  %v6008_v7 = vmov 0   ;;  %vm440_vm9 = vcmask 131072   ;;  %vm433_vm10 = vcmask 138240   ;;  %s6009_s14 = smov 120  }
  0x12   :  { %5126 = vmatprep.subr.bf16.mxu0 %v5678_v14  ;;  %5134 = vmatprep.subr.bf16.mxu1 %v5678_v14  ;;  %v6141_v8 = vsel %vm463_vm8, 65535, %v6008_v7  ;;  %s6010_s15 = smov 88   ;;  %s6011_s16 = smov 56   ;;  %vm1024_vm12 = vcmask 130048   ;;  %vm1028_vm13 = vcmask 195584  }
  0x13   :  { %s6012_s17 = smov 80   ;;  %s6013_s18 = smov 112  }
  0x14   :  { %s6014_s19 = smov 48   ;;  %s6015_s20 = smov 72  }
  0x15   :  { %5127 = vmatpush3.bf16.msra.mxu0 %v5678_v14  ;;  %5135 = vmatpush3.bf16.msra.mxu1 %v5678_v14  ;;  %s6016_s21 = smov 104   ;;  %s6017_s22 = smov 40  }
  0x16   :  { %s6018_s23 = smov 8   ;;  %s6019_s24 = smov 16  }
  0x17   :  { %s6020_s29 = smov 24  }
  0xe1   :  { %v5112_v16 = vpop.f32.mrb[0].mxu0  ;;  %v5122_v17 = vpop.f32.mrb[0].mxu1 }
  0xe2   :  { %v89_v18 = vpop.f32.mrb[1].mxu0  ;;  %v6089_v21 = vadd.f32 %v5122_v17, %v18_v15  ;;  %v149_v22 = vpop.f32.mrb[1].mxu1  ;;  %v6093_v26 = vadd.f32 %v5112_v16, %v18_v15 }
  0xe3   :  { %v5113_v23 = vpop.f32.mrb[2].mxu0  ;;  %v6091_v24 = vadd.f32 %v149_v22, %v16_v19  ;;  %v5123_v25 = vpop.f32.mrb[2].mxu1  ;;  %v6095_v29 = vadd.f32 %v89_v18, %v16_v19 }
  0xe4   :  { %v92_v27 = vpop.f32.mrb[3].mxu0  ;;  %v152_v28 = vpop.f32.mrb[3].mxu1  ;;  %v264_v32 = vpack.c.bf16 %v6089_v21, %v6089_v21  ;;  %v195_v35 = vpack.c.bf16 %v6093_v26, %v6093_v26 }
  0xe5   :  { %v6097_v30 = vadd.f32 %v92_v27, %v17_v20  ;;  %v6099_v31 = vadd.f32 %v152_v28, %v17_v20 }
  0xe7   :  { %v194_v33 = vpack.c.bf16 %v6097_v30, %v6095_v29  ;;  %v263_v34 = vpack.c.bf16 %v6099_v31, %v6091_v24 }
  0xe9   :  { %5128 = vmatprep.mubr.msk.bf16.mxu0 %vm208_vm1, %v194_v33  ;;  %5136 = vmatprep.mubr.msk.bf16.mxu1 %vm208_vm1, %v263_v34 }
  0xea   :  { %5129 = vmatmul.mubr.msk.bf16.vlgmr.msra.gmra.mrb[4].mxu0 %vm208_vm1, %v195_v35  ;;  %5137 = vmatmul.mubr.msk.bf16.vlgmr.msra.gmra.mrb[4].mxu1 %vm208_vm1, %v264_v32 }
 0x1bd   :  { %v5130_v36 = vpop.f32.mrb[4].mxu0  ;;  %v5138_v37 = vpop.f32.mrb[4].mxu1 }
 0x1be   :  { %v321_v38 = vmul.f32 0.5, %v5130_v36  ;;  %v249_v39 = vpop.f32.mrb[5].mxu0  ;;  %v305_v40 = vpop.f32.mrb[5].mxu1 }
 0x1bf   :  { %v319_v41 = vmul.f32 0.5, %v249_v39  ;;  %v5131_v42 = vpop.f32.mrb[6].mxu0  ;;  %v5139_v43 = vpop.f32.mrb[6].mxu1 }
 0x1c0   :  { %v252_v44 = vpop.f32.mrb[7].mxu0  ;;  %vm327_vm2 = vcmp.ge.f32.partialorder %v321_v38, 1.0  ;;  %v308_v45 = vpop.f32.mrb[7].mxu1 }
 0x1c1   :  { %v320_v46 = vmul.f32 0.5, %v252_v44  ;;  %v336_v47 = vsel %vm327_vm2, 0.0, %v321_v38  ;;  %vm325_vm3 = vcmp.ge.f32.partialorder %v319_v41, 1.0  ;;  %v4743_v59 = vsel %vm327_vm2, 1.0, %v6005_v52 }
 0x1c2   :  { %v339_v48 = vsub.f32 %v5138_v37, %v336_v47  ;;  %v334_v49 = vsel %vm325_vm3, 0.0, %v319_v41  ;;  %v4741_v53 = vsel %vm325_vm3, 1.0, %v6005_v52  ;;  %v6128_v63 = vpack.c.bf16 %v4743_v59, %v4743_v59 }
 0x1c3   :  { %v337_v50 = vsub.f32 %v305_v40, %v334_v49  ;;  %vm326_vm4 = vcmp.ge.f32.partialorder %v320_v46, 1.0 }
 0x1c4   :  { %v342_v51 = vmul.f32 0.5, %v339_v48  ;;  %v4742_v54 = vsel %vm326_vm4, 1.0, %v6005_v52  ;;  %v335_v55 = vsel %vm326_vm4, 0.0, %v320_v46 }
 0x1c5   :  { %v340_v56 = vmul.f32 0.5, %v337_v50  ;;  %v338_v57 = vsub.f32 %v308_v45, %v335_v55  ;;  %v6116_v58 = vpack.c.bf16 %v4742_v54, %v4741_v53 }
 0x1c6   :  { %v6120_v60 = vadd.f32 %v342_v51, %v336_v47 }
 0x1c7   :  { %v343_v61 = vadd.f32 %v340_v56, %v334_v49  ;;  %v341_v62 = vmul.f32 0.5, %v338_v57  ;;  %452 = vrot.lane.b32.xlu1 %v6116_v58, %s6006_s12  ;;  %359 = vrot.lane.b32.xlu0 %v6116_v58, %s6007_s13 }
 0x1c8   :  { %5144 = vmatprep.mubr.msk.bf16.mxu0 %vm363_vm5, %v6116_v58  ;;  %vm348_vm11 = vcmp.ge.f32.partialorder %v6120_v60, 1.0 }
 0x1c9   :  { %vm346_vm6 = vcmp.ge.f32.partialorder %v343_v61, 1.0  ;;  %v344_v0 = vadd.f32 %v341_v62, %v335_v55 }
 0x1ca   :  { %v4744_v1 = vsel %vm346_vm6, 1.0, %v6005_v52 }
 0x1cb   :  { %vm347_vm7 = vcmp.ge.f32.partialorder %v344_v0, 1.0  ;;  %454 = vrot.lane.b32.xlu1 %v6128_v63, %s6006_s12  ;;  %361 = vrot.lane.b32.xlu0 %v6128_v63, %s6007_s13 }
 0x1cc   :  { %v4745_v2 = vsel %vm347_vm7, 1.0, %v6005_v52 }
 0x1cd   :  { %v6136_v3 = vpack.c.bf16 %v4745_v2, %v4744_v1 }
 0x239   :  { %v453_v4 = vpop.permute.xlu1 %452  ;;  %v360_v5 = vpop.permute.xlu0 %359 }
 0x23a   :  { %5564 = vmatprep.subr.msk.bf16.mxu0 %vm363_vm5, %v360_v5  ;;  %5148 = vmatprep.subr.bf16.mxu1 %v453_v4  ;;  %v371_v6 = vsel %vm363_vm5, %v360_v5, 0 }
 0x23b   :  { %5141 = vmatpush3.bf16.xpose.msra.mxu0 %v371_v6  ;;  %5149 = vmatpush3.bf16.msra.mxu1 %v453_v4 }
 0x23d   :  { %v455_v9 = vpop.permute.xlu1 %454  ;;  %v362_v10 = vpop.permute.xlu0 %361 }
 0x23e   :  { %v467_v11 = vand.u32 %v6141_v8, %v455_v9  ;;  %5565 = vmatprep.subr.msk.bf16.mxu0 %vm363_vm5, %v362_v10  ;;  %v374_v12 = vsel %vm363_vm5, %v362_v10, 0 }
 0x240   :  { %5150 = vmatprep.subr.bf16.mxu1 %v467_v11 }
 0x241   :  { %5151 = vmatpush3.bf16.msra.mxu1 %v467_v11 }
 0x243   :  { %5143 = vmatpush3.bf16.xpose.msra.mxu0 %v374_v12 }
 0x24a   :  { %5145 = vmatmul.mubr.msk.bf16.vlgmr.msra.gmra.mrb[8].mxu0 %vm363_vm5, %v6128_v63 }
 0x31d   :  { %v5146_v13 = vpop.f32.mrb[8].mxu0 }
 0x31e   :  { %v426_v14 = vmul.f32 0.35355338, %v5146_v13  ;;  %v410_v15 = vpop.f32.mrb[9].mxu0 }
 0x31f   :  { %v424_v16 = vmul.f32 0.35355338, %v410_v15  ;;  %v5147_v17 = vpop.f32.mrb[10].mxu0 }
 0x320   :  { %v431_v18 = vmul.f32 1.442695, %v426_v14  ;;  %v413_v19 = vpop.f32.mrb[11].mxu0 }
 0x321   :  { %v427_v20 = vmul.f32 1.442695, %v424_v16  ;;  %v425_v22 = vmul.f32 0.35355338, %v413_v19 }
 0x322   :  { %5707 = vpow2.f32 %v431_v18 }
 0x323   :  { %5709 = vpow2.f32 %v427_v20  ;;  %v429_v23 = vmul.f32 1.442695, %v425_v22 }
 0x325   :  { %5711 = vpow2.f32 %v429_v23 }
 0x32c   :  { %v5708_v25 = vpop.eup %5707 }
 0x32d   :  { %v5710_v27 = vpop.eup %5709  ;;  %v441_v28 = vsel %vm440_vm9, %v5708_v25, 0.0 }
 0x32e   :  { %442 = vadd.xlane.f32.xlu0 %v441_v28  ;;  %v434_v32 = vsel %vm433_vm10, %v5710_v27, 0.0 }
 0x32f   :  { %v5712_v33 = vpop.eup %5711  ;;  %435 = vadd.xlane.f32.xlu1 %v434_v32 }
 0x330   :  { %v437_v34 = vsel %vm433_vm10, %v5712_v33, 0.0 }
 0x333   :  { %438 = vadd.xlane.f32.xlu1 %v437_v34 }
 0x344   :  { %519 = vrot.lane.b32.xlu0 %v6128_v63, %s6009_s14  ;;  %521 = vrot.lane.b32.xlu1 %v6116_v58, %s6010_s15 }
 0x348   :  { %523 = vrot.lane.b32.xlu1 %v6128_v63, %s6010_s15 }
 0x34c   :  { %517 = vrot.lane.b32.xlu1 %v6116_v58, %s6009_s14 }
 0x350   :  { %611 = vrot.lane.b32.xlu1 %v6116_v58, %s6011_s16 }
 0x3bb   :  { %v443_v35 = vpop.xlane.xlu0 %442 }
 0x3bc   :  { %v436_v36 = vpop.xlane.xlu1 %435  ;;  %5713 = vrcp.f32 %v443_v35 }
 0x3bd   :  { %5715 = vrcp.f32 %v436_v36 }
 0x3bf   :  { %v520_v53 = vpop.permute.xlu0 %519 }
 0x3c0   :  { %v439_v37 = vpop.xlane.xlu1 %438 }
 0x3c1   :  { %5717 = vrcp.f32 %v439_v37 }
 0x3c4   :  { %v522_v38 = vpop.permute.xlu1 %521 }
 0x3c5   :  { %5566 = vmatprep.subr.msk.bf16.mxu1 %vm363_vm5, %v522_v38  ;;  %v532_v50 = vsel %vm363_vm5, %v522_v38, 0 }
 0x3c6   :  { %v5714_v39 = vpop.eup %5713 }
 0x3c7   :  { %v5716_v41 = vpop.eup %5715  ;;  %v449_v43 = vmul.f32 %v5714_v39, %v5708_v25 }
 0x3c8   :  { %v524_v40 = vpop.permute.xlu1 %523  ;;  %v447_v45 = vmul.f32 %v5716_v41, %v5710_v27 }
 0x3c9   :  { %v451_v48 = vpack.c.bf16 %v449_v43, %v449_v43  ;;  %v535_v51 = vsel %vm363_vm5, %v524_v40, 0 }
 0x3cb   :  { %v5718_v42 = vpop.eup %5717 }
 0x3cc   :  { %v518_v44 = vpop.permute.xlu1 %517  ;;  %v448_v46 = vmul.f32 %v5718_v42, %v5712_v33 }
 0x3ce   :  { %v450_v47 = vpack.c.bf16 %v448_v46, %v447_v45 }
 0x3d0   :  { %5152 = vmatprep.mubr.msk.bf16.mxu1 %vm433_vm10, %v450_v47  ;;  %v612_v49 = vpop.permute.xlu1 %611 }
 0x3d1   :  { %5153 = vmatmul.mubr.msk.bf16.vlgmr.msra.gmra.mrb[8].mxu1 %vm433_vm10, %v451_v48  ;;  %5164 = vmatprep.subr.bf16.mxu0 %v612_v49 }
 0x3d2   :  { %5157 = vmatpush3.bf16.xpose.msra.mxu1 %v532_v50  ;;  %5160 = vmatprep.mubr.msk.bf16.mxu1 %vm363_vm5, %v518_v44 }
 0x3d3   :  { %5567 = vmatprep.subr.msk.bf16.mxu1 %vm363_vm5, %v524_v40  ;;  %5165 = vmatpush3.bf16.msra.mxu0 %v612_v49 }
 0x3da   :  { %5159 = vmatpush3.bf16.xpose.msra.mxu1 %v535_v51 }
 0x3e1   :  { %5161 = vmatmul.mubr.msk.bf16.vlgmr.msra.gmra.mrb[12].mxu1 %vm363_vm5, %v520_v53 }
 0x4a4   :  { %v6169_v54 = vpop.f32.mrb[8].mxu1 }
 0x4a5   :  { %v6171_v55 = vpop.f32.mrb[9].mxu1 }
 0x4a6   :  { %v5155_v56 = vpop.f32.mrb[10].mxu1 }
 0x4a7   :  { %v6173_v57 = vpop.f32.mrb[11].mxu1 }
 0x4b4   :  { %v5162_v59 = vpop.f32.mrb[12].mxu1 }
 0x4b5   :  { %v587_v61 = vmul.f32 0.35355338, %v5162_v59  ;;  %v571_v62 = vpop.f32.mrb[13].mxu1 }
 0x4b6   :  { %v585_v0 = vmul.f32 0.35355338, %v571_v62  ;;  %v5163_v1 = vpop.f32.mrb[14].mxu1 }
 0x4b7   :  { %v592_v2 = vmul.f32 1.442695, %v587_v61  ;;  %v574_v4 = vpop.f32.mrb[15].mxu1 }
 0x4b8   :  { %v588_v5 = vmul.f32 1.442695, %v585_v0  ;;  %v586_v6 = vmul.f32 0.35355338, %v574_v4 }
 0x4b9   :  { %5719 = vpow2.f32 %v592_v2 }
 0x4ba   :  { %v590_v7 = vmul.f32 1.442695, %v586_v6  ;;  %5721 = vpow2.f32 %v588_v5  ;;  %v4746_v5 = vsel %vm348_vm11, 1.0, %v6005_v52 }
 0x4bb   :  { %v6224_v6 = vpack.c.bf16 %v4746_v5, %v4746_v5 }
 0x4bc   :  { %5723 = vpow2.f32 %v590_v7 }
 0x4c3   :  { %v5720_v9 = vpop.eup %5719 }
 0x4c4   :  { %v600_v10 = vsel %vm440_vm9, %v5720_v9, 0.0  ;;  %v5722_v11 = vpop.eup %5721 }
 0x4c5   :  { %601 = vadd.xlane.f32.xlu1 %v600_v10  ;;  %v594_v14 = vsel %vm433_vm10, %v5722_v11, 0.0 }
 0x4c6   :  { %v5724_v12 = vpop.eup %5723 }
 0x4c7   :  { %v597_v13 = vsel %vm433_vm10, %v5724_v12, 0.0 }
 0x4c8   :  { %598 = vadd.xlane.f32.xlu0 %v597_v13 }
 0x4c9   :  { %595 = vadd.xlane.f32.xlu1 %v594_v14 }
 0x4da   :  { %677 = vrot.lane.b32.xlu1 %v6116_v58, %s6012_s17 }
 0x4de   :  { %679 = vrot.lane.b32.xlu1 %v6128_v63, %s6012_s17  ;;  %613 = vrot.lane.b32.xlu0 %v6128_v63, %s6011_s16 }
 0x4e2   :  { %673 = vrot.lane.b32.xlu1 %v6116_v58, %s6013_s18 }
 0x4e6   :  { %675 = vrot.lane.b32.xlu1 %v6128_v63, %s6013_s18 }
 0x4ea   :  { %769 = vrot.lane.b32.xlu1 %v6128_v63, %s6014_s19 }
 0x552   :  { %v602_v15 = vpop.xlane.xlu1 %601 }
 0x553   :  { %5725 = vrcp.f32 %v602_v15 }
 0x555   :  { %v599_v16 = vpop.xlane.xlu0 %598 }
 0x556   :  { %5727 = vrcp.f32 %v599_v16  ;;  %v596_v17 = vpop.xlane.xlu1 %595 }
 0x557   :  { %5729 = vrcp.f32 %v596_v17 }
 0x559   :  { %v614_v18 = vpop.permute.xlu0 %613 }
 0x55a   :  { %v623_v19 = vand.u32 %v614_v18, %v6141_v8  ;;  %v678_v20 = vpop.permute.xlu1 %677 }
 0x55b   :  { %v688_v37 = vsel %vm363_vm5, %v678_v20, 0 }
 0x55c   :  { %5166 = vmatprep.subr.bf16.mxu0 %v623_v19 }
 0x55d   :  { %5167 = vmatpush3.bf16.msra.mxu0 %v623_v19  ;;  %v5726_v22 = vpop.eup %5725 }
 0x55e   :  { %5568 = vmatprep.subr.msk.bf16.mxu0 %vm363_vm5, %v678_v20  ;;  %v680_v27 = vpop.permute.xlu1 %679  ;;  %v608_v32 = vmul.f32 %v5726_v22, %v5720_v9 }
 0x55f   :  { %v691_v38 = vsel %vm363_vm5, %v680_v27, 0 }
 0x560   :  { %v5728_v23 = vpop.eup %5727  ;;  %v610_v35 = vpack.c.bf16 %v608_v32, %v608_v32 }
 0x561   :  { %v5730_v25 = vpop.eup %5729  ;;  %v607_v28 = vmul.f32 %v5728_v23, %v5724_v12 }
 0x562   :  { %v606_v33 = vmul.f32 %v5730_v25, %v5722_v11  ;;  %v674_v36 = vpop.permute.xlu1 %673 }
 0x564   :  { %v609_v34 = vpack.c.bf16 %v607_v28, %v606_v33 }
 0x566   :  { %5168 = vmatprep.mubr.msk.bf16.mxu0 %vm433_vm10, %v609_v34  ;;  %v676_v39 = vpop.permute.xlu1 %675 }
 0x567   :  { %5169 = vmatmul.mubr.msk.bf16.vlgmr.msra.gmra.mrb[12].mxu0 %vm433_vm10, %v610_v35 }
 0x568   :  { %5173 = vmatpush3.bf16.xpose.msra.mxu0 %v688_v37  ;;  %5176 = vmatprep.mubr.msk.bf16.mxu0 %vm363_vm5, %v674_v36 }
 0x569   :  { %5569 = vmatprep.subr.msk.bf16.mxu0 %vm363_vm5, %v680_v27 }
 0x56a   :  { %v770_v7 = vpop.permute.xlu1 %769 }
 0x56b   :  { %v779_v12 = vand.u32 %v770_v7, %v6141_v8 }
 0x570   :  { %5175 = vmatpush3.bf16.xpose.msra.mxu0 %v691_v38 }
 0x577   :  { %5177 = vmatmul.mubr.msk.bf16.vlgmr.msra.gmra.mrb[16].mxu0 %vm363_vm5, %v676_v39 }
 0x63a   :  { %v6199_v40 = vpop.f32.mrb[12].mxu0 }
 0x63b   :  { %v6201_v41 = vpop.f32.mrb[13].mxu0 }
 0x63c   :  { %v5171_v42 = vpop.f32.mrb[14].mxu0 }
 0x63d   :  { %v6203_v43 = vpop.f32.mrb[15].mxu0 }
 0x63e   :  { %v5614_v44 = vpack.i.bf16 %v6203_v43, %v6201_v41 }
 0x64a   :  { %v5178_v45 = vpop.f32.mrb[16].mxu0 }
 0x64b   :  { %v743_v46 = vmul.f32 0.35355338, %v5178_v45  ;;  %v727_v47 = vpop.f32.mrb[17].mxu0 }
 0x64c   :  { %v741_v48 = vmul.f32 0.35355338, %v727_v47  ;;  %v5179_v49 = vpop.f32.mrb[18].mxu0 }
 0x64d   :  { %v748_v50 = vmul.f32 1.442695, %v743_v46  ;;  %v730_v51 = vpop.f32.mrb[19].mxu0 }
 0x64e   :  { %v744_v53 = vmul.f32 1.442695, %v741_v48  ;;  %v742_v56 = vmul.f32 0.35355338, %v730_v51 }
 0x64f   :  { %5731 = vpow2.f32 %v748_v50 }
 0x650   :  { %v746_v59 = vmul.f32 1.442695, %v742_v56  ;;  %5733 = vpow2.f32 %v744_v53 }
 0x652   :  { %5735 = vpow2.f32 %v746_v59 }
 0x659   :  { %v5732_v61 = vpop.eup %5731 }
 0x65a   :  { %v756_v62 = vsel %vm440_vm9, %v5732_v61, 0.0  ;;  %v5734_v0 = vpop.eup %5733 }
 0x65b   :  { %757 = vadd.xlane.f32.xlu0 %v756_v62  ;;  %v750_v4 = vsel %vm433_vm10, %v5734_v0, 0.0 }
 0x65c   :  { %v5736_v1 = vpop.eup %5735 }
 0x65d   :  { %v753_v2 = vsel %vm433_vm10, %v5736_v1, 0.0 }
 0x65e   :  { %754 = vadd.xlane.f32.xlu1 %v753_v2 }
 0x65f   :  { %751 = vadd.xlane.f32.xlu0 %v750_v4 }
 0x66f   :  { %833 = vrot.lane.b32.xlu1 %v6116_v58, %s6015_s20 }
 0x673   :  { %829 = vrot.lane.b32.xlu1 %v6116_v58, %s6016_s21 }
 0x675   :  { %767 = vrot.lane.b32.xlu0 %v6116_v58, %s6014_s19 }
 0x677   :  { %1114 = vrot.lane.b32.xlu1 %v6136_v3, %s6007_s13 }
 0x679   :  { %835 = vrot.lane.b32.xlu0 %v6128_v63, %s6015_s20 }
 0x67d   :  { %831 = vrot.lane.b32.xlu0 %v6128_v63, %s6016_s21 }
 0x681   :  { %1116 = vrot.lane.b32.xlu0 %v6224_v6, %s6007_s13 }
 0x6e8   :  { %v758_v9 = vpop.xlane.xlu0 %757 }
 0x6e9   :  { %5737 = vrcp.f32 %v758_v9 }
 0x6eb   :  { %v755_v10 = vpop.xlane.xlu1 %754 }
 0x6ec   :  { %5739 = vrcp.f32 %v755_v10  ;;  %v752_v11 = vpop.xlane.xlu0 %751 }
 0x6ed   :  { %5741 = vrcp.f32 %v752_v11 }
 0x6ef   :  { %v834_v15 = vpop.permute.xlu1 %833 }
 0x6f0   :  { %v768_v60 = vpop.permute.xlu0 %767  ;;  %v844_v25 = vsel %vm363_vm5, %v834_v15, 0 }
 0x6f1   :  { %5180 = vmatprep.subr.bf16.mxu1 %v768_v60 }
 0x6f2   :  { %5181 = vmatpush3.bf16.msra.mxu1 %v768_v60 }
 0x6f3   :  { %5182 = vmatprep.subr.bf16.mxu1 %v779_v12  ;;  %v5738_v13 = vpop.eup %5737  ;;  %v830_v23 = vpop.permute.xlu1 %829 }
 0x6f4   :  { %v764_v18 = vmul.f32 %v5738_v13, %v5732_v61  ;;  %v836_v27 = vpop.permute.xlu0 %835 }
 0x6f5   :  { %v847_v28 = vsel %vm363_vm5, %v836_v27, 0 }
 0x6f6   :  { %v5740_v14 = vpop.eup %5739  ;;  %5183 = vmatpush3.bf16.msra.mxu1 %v779_v12  ;;  %v766_v22 = vpack.c.bf16 %v764_v18, %v764_v18 }
 0x6f7   :  { %v5742_v16 = vpop.eup %5741  ;;  %5570 = vmatprep.subr.msk.bf16.mxu1 %vm363_vm5, %v834_v15  ;;  %v763_v17 = vmul.f32 %v5740_v14, %v5736_v1  ;;  %v1115_v32 = vpop.permute.xlu1 %1114 }
 0x6f8   :  { %v762_v19 = vmul.f32 %v5742_v16, %v5734_v0  ;;  %v832_v33 = vpop.permute.xlu0 %831  ;;  %v1125_v34 = vsel %vm363_vm5, %v1115_v32, 0 }
 0x6fa   :  { %v765_v20 = vpack.c.bf16 %v763_v17, %v762_v19 }
 0x6fc   :  { %5184 = vmatprep.mubr.msk.bf16.mxu1 %vm433_vm10, %v765_v20  ;;  %v1117_v35 = vpop.permute.xlu0 %1116 }
 0x6fd   :  { %5185 = vmatmul.mubr.msk.bf16.vlgmr.msra.gmra.mrb[16].mxu1 %vm433_vm10, %v766_v22  ;;  %v1128_v36 = vsel %vm363_vm5, %v1117_v35, 0 }
 0x6fe   :  { %5192 = vmatprep.mubr.msk.bf16.mxu1 %vm363_vm5, %v830_v23 }
 0x6ff   :  { %5189 = vmatpush3.bf16.xpose.msra.mxu1 %v844_v25 }
 0x700   :  { %5571 = vmatprep.subr.msk.bf16.mxu1 %vm363_vm5, %v836_v27 }
 0x707   :  { %5191 = vmatpush3.bf16.xpose.msra.mxu1 %v847_v28 }
 0x708   :  { %5572 = vmatprep.subr.msk.bf16.mxu1 %vm363_vm5, %v1115_v32 }
 0x70e   :  { %5193 = vmatmul.mubr.msk.bf16.vlgmr.msra.gmra.mrb[20].mxu1 %vm363_vm5, %v832_v33 }
 0x70f   :  { %5213 = vmatpush3.bf16.xpose.msra.mxu1 %v1125_v34  ;;  %5216 = vmatprep.mubr.msk.bf16.mxu1 %vm363_vm5, %v6136_v3 }
 0x710   :  { %5573 = vmatprep.subr.msk.bf16.mxu1 %vm363_vm5, %v1117_v35 }
 0x717   :  { %5215 = vmatpush3.bf16.xpose.msra.mxu1 %v1128_v36 }
 0x71e   :  { %5217 = vmatmul.mubr.msk.bf16.vlgmr.msra.gmra.mrb[24].mxu1 %vm363_vm5, %v6224_v6 }
 0x7d0   :  { %v5186_v37 = vpop.f32.mrb[16].mxu1 }
 0x7d1   :  { %v815_v38 = vpop.f32.mrb[17].mxu1 }
 0x7d2   :  { %v5187_v39 = vpop.f32.mrb[18].mxu1 }
 0x7d3   :  { %v818_v42 = vpop.f32.mrb[19].mxu1 }
 0x7d4   :  { %v5619_v45 = vpack.i.bf16 %v818_v42, %v815_v38  ;;  %v6285_v38 = vld [vmem:[%s7248_s1 + $0x30] sm:$0xff]  }
 0x7e1   :  { %v5194_v46 = vpop.f32.mrb[20].mxu1 }
 0x7e2   :  { %v899_v47 = vmul.f32 0.35355338, %v5194_v46  ;;  %v883_v48 = vpop.f32.mrb[21].mxu1 }
 0x7e3   :  { %v897_v49 = vmul.f32 0.35355338, %v883_v48  ;;  %v5195_v50 = vpop.f32.mrb[22].mxu1 }
 0x7e4   :  { %v904_v51 = vmul.f32 1.442695, %v899_v47  ;;  %v886_v53 = vpop.f32.mrb[23].mxu1 }
 0x7e5   :  { %v900_v56 = vmul.f32 1.442695, %v897_v49  ;;  %v898_v59 = vmul.f32 0.35355338, %v886_v53 }
 0x7e6   :  { %5743 = vpow2.f32 %v904_v51 }
 0x7e7   :  { %5745 = vpow2.f32 %v900_v56  ;;  %v902_v61 = vmul.f32 1.442695, %v898_v59 }
 0x7e9   :  { %5747 = vpow2.f32 %v902_v61 }
 0x7f0   :  { %v5744_v62 = vpop.eup %5743 }
 0x7f1   :  { %v5746_v0 = vpop.eup %5745  ;;  %v5218_v1 = vpop.f32.mrb[24].mxu1  ;;  %v912_v2 = vsel %vm440_vm9, %v5744_v62, 0.0 }
 0x7f2   :  { %913 = vadd.xlane.f32.xlu0 %v912_v2  ;;  %v1164_v4 = vpop.f32.mrb[25].mxu1  ;;  %v906_v5 = vsel %vm433_vm10, %v5746_v0, 0.0  ;;  %v1180_v60 = vmul.f32 0.35355338, %v5218_v1 }
 0x7f3   :  { %v5748_v7 = vpop.eup %5747  ;;  %907 = vadd.xlane.f32.xlu1 %v906_v5  ;;  %v5219_v9 = vpop.f32.mrb[26].mxu1  ;;  %v1178_v13 = vmul.f32 0.35355338, %v1164_v4 }
 0x7f4   :  { %v1167_v10 = vpop.f32.mrb[27].mxu1  ;;  %v909_v11 = vsel %vm433_vm10, %v5748_v7, 0.0 }
 0x7f5   :  { %v1179_v12 = vmul.f32 0.35355338, %v1167_v10 }
 0x7f6   :  { %910 = vadd.xlane.f32.xlu0 %v909_v11 }
 0x7f7   :  { %v1183_v14 = vmul.f32 1.442695, %v1179_v12 }
 0x804   :  { %923 = vrot.lane.b32.xlu1 %v6116_v58, %s6017_s22  ;;  %v1185_v58 = vmul.f32 1.442695, %v1180_v60 }
 0x806   :  { %5749 = vpow2.f32 %v1185_v58 }
 0x807   :  { %5751 = vpow2.f32 %v1183_v14 }
 0x808   :  { %992 = vrot.lane.b32.xlu1 %v6199_v40, %s6018_s23  ;;  %v1181_v40 = vmul.f32 1.442695, %v1178_v13 }
 0x80a   :  { %5753 = vpow2.f32 %v1181_v40 }
 0x80c   :  { %5620 = vrot.lane.b32.xlu1 %v5619_v45, %s6019_s24  ;;  %925 = vrot.lane.b32.xlu0 %v6128_v63, %s6017_s22 }
 0x810   :  { %5615 = vrot.lane.b32.xlu0 %v5614_v44, %s6018_s23  ;;  %v6260_v15 = vpop.eup %5749 }
 0x811   :  { %v6262_v16 = vpop.eup %5751  ;;  %v1193_v63 = vsel %vm440_vm9, %v6260_v15, 0.0 }
 0x812   :  { %v1190_v43 = vsel %vm433_vm10, %v6262_v16, 0.0 }
 0x814   :  { %1004 = vrot.lane.b32.xlu0 %v5186_v37, %s6019_s24  ;;  %v6266_v41 = vpop.eup %5753  ;;  %v6278_v37 = vld [vmem:[%s7248_s1 + $0x28] sm:$0xff]  }
 0x815   :  { %v1187_v44 = vsel %vm433_vm10, %v6266_v41, 0.0 }
 0x830   :  { %1194 = vadd.xlane.f32.xlu1 %v1193_v63 }
 0x833   :  { %1191 = vadd.xlane.f32.xlu0 %v1190_v43 }
 0x834   :  { %1188 = vadd.xlane.f32.xlu1 %v1187_v44 }
 0x87f   :  { %v914_v17 = vpop.xlane.xlu0 %913 }
 0x880   :  { %v908_v18 = vpop.xlane.xlu1 %907  ;;  %5755 = vrcp.f32 %v914_v17 }
 0x881   :  { %5757 = vrcp.f32 %v908_v18 }
 0x883   :  { %v911_v19 = vpop.xlane.xlu0 %910 }
 0x884   :  { %5759 = vrcp.f32 %v911_v19  ;;  %v924_v20 = vpop.permute.xlu1 %923 }
 0x885   :  { %5196 = vmatprep.subr.bf16.mxu0 %v924_v20 }
 0x886   :  { %5197 = vmatpush3.bf16.msra.mxu0 %v924_v20 }
 0x887   :  { %v926_v22 = vpop.permute.xlu0 %925 }
 0x888   :  { %v935_v23 = vand.u32 %v926_v22, %v6141_v8  ;;  %v993_v48 = vpop.permute.xlu1 %992 }
 0x889   :  { %v1023_v10 = vsel %vm363_vm5, %v6169_v54, %v993_v48 }
 0x88a   :  { %5198 = vmatprep.subr.bf16.mxu0 %v935_v23  ;;  %v5756_v25 = vpop.eup %5755 }
 0x88b   :  { %5199 = vmatpush3.bf16.msra.mxu0 %v935_v23  ;;  %v5758_v27 = vpop.eup %5757  ;;  %v920_v32 = vmul.f32 %v5756_v25, %v5744_v62  ;;  %v5616_v49 = vpop.permute.xlu0 %5615 }
 0x88c   :  { %v918_v33 = vmul.f32 %v5758_v27, %v5746_v0  ;;  %5204 = vmatprep.subr.bf16.mxu0 %v6278_v37  ;;  %v5621_v50 = vpop.permute.xlu1 %5620  ;;  %v5618_v61 = vunpack.i.h.bf16 %v5616_v49  ;;  %v5617_v62 = vunpack.i.l.bf16 %v5616_v49 }
 0x88d   :  { %v922_v36 = vpack.c.bf16 %v920_v32, %v920_v32  ;;  %v5623_v0 = vunpack.i.h.bf16 %v5621_v50  ;;  %v5622_v4 = vunpack.i.l.bf16 %v5621_v50 }
 0x88e   :  { %v5760_v28 = vpop.eup %5759  ;;  %v1022_v2 = vsel %vm363_vm5, %v6173_v57, %v5618_v61  ;;  %v1021_v9 = vsel %vm363_vm5, %v6171_v55, %v5617_v62 }
 0x88f   :  { %v919_v34 = vmul.f32 %v5760_v28, %v5748_v7  ;;  %v1005_v53 = vpop.permute.xlu0 %1004  ;;  %v1026_v60 = vsel %vm1024_vm12, %v1022_v2, %v5623_v0  ;;  %v1025_v57 = vsel %vm1024_vm12, %v1021_v9, %v5622_v4 }
 0x890   :  { %v1027_v12 = vsel %vm1024_vm12, %v1023_v10, %v1005_v53 }
 0x891   :  { %v921_v35 = vpack.c.bf16 %v919_v34, %v918_v33 }
 0x893   :  { %5200 = vmatprep.mubr.msk.bf16.mxu0 %vm433_vm10, %v921_v35 }
 0x894   :  { %5201 = vmatmul.mubr.msk.bf16.vlgmr.msra.gmra.mrb[20].mxu0 %vm433_vm10, %v922_v36 }
 0x895   :  { %5205 = vmatpush3.bf16.msra.mxu0 %v6278_v37 }
 0x896   :  { %5206 = vmatprep.subr.bf16.mxu0 %v6285_v38 }
 0x899   :  { %5207 = vmatpush3.bf16.msra.mxu0 %v6285_v38 }
 0x8bd   :  { %v1195_v51 = vpop.xlane.xlu1 %1194 }
 0x8c0   :  { %v1192_v56 = vpop.xlane.xlu0 %1191 }
 0x8c1   :  { %v1189_v59 = vpop.xlane.xlu1 %1188  ;;  %5761 = vrcp.f32 %v1192_v56 }
 0x8c2   :  { %5763 = vrcp.f32 %v1189_v59 }
 0x8c3   :  { %5765 = vrcp.f32 %v1195_v51 }
 0x8cb   :  { %v5762_v1 = vpop.eup %5761 }
 0x8cc   :  { %v5764_v7 = vpop.eup %5763  ;;  %v1200_v63 = vmul.f32 %v5762_v1, %v6262_v16 }
 0x8cd   :  { %v1199_v40 = vmul.f32 %v5764_v7, %v6266_v41  ;;  %v5766_v19 = vpop.eup %5765 }
 0x8ce   :  { %v1201_v16 = vmul.f32 %v5766_v19, %v6260_v15 }
 0x8cf   :  { %v1202_v20 = vpack.c.bf16 %v1200_v63, %v1199_v40 }
 0x8d0   :  { %v1203_v25 = vpack.c.bf16 %v1201_v16, %v1201_v16 }
 0x967   :  { %v5202_v39 = vpop.f32.mrb[20].mxu0 }
 0x968   :  { %1016 = vrot.lane.b32.xlu0 %v5202_v39, %s6020_s29  ;;  %v971_v42 = vpop.f32.mrb[21].mxu0 }
 0x969   :  { %v5203_v45 = vpop.f32.mrb[22].mxu0 }
 0x96a   :  { %v974_v46 = vpop.f32.mrb[23].mxu0 }
 0x96b   :  { %v5624_v47 = vpack.i.bf16 %v974_v46, %v971_v42 }
 0x96c   :  { %1206 = vrot.lane.b32.xlu0 %v6224_v6, %s6006_s12 }
 0x96d   :  { %5625 = vrot.lane.b32.xlu1 %v5624_v47, %s6020_s29 }
 0x970   :  { %1272 = vrot.lane.b32.xlu0 %v6224_v6, %s6010_s15 }
 0x971   :  { %1204 = vrot.lane.b32.xlu1 %v6136_v3, %s6006_s12 }
 0x974   :  { %1268 = vrot.lane.b32.xlu0 %v6224_v6, %s6009_s14 }
 0x975   :  { %1270 = vrot.lane.b32.xlu1 %v6136_v3, %s6010_s15 }
 0x979   :  { %1266 = vrot.lane.b32.xlu1 %v6136_v3, %s6009_s14 }
 0x97d   :  { %1360 = vrot.lane.b32.xlu1 %v6136_v3, %s6011_s16 }
 0x9da   :  { %v1017_v5 = vpop.permute.xlu0 %1016 }
 0x9db   :  { %v1031_v14 = vsel %vm1028_vm13, %v1027_v12, %v1017_v5 }
 0x9dc   :  { %v1033_v18 = vpack.c.bf16 %v1031_v14, %v1031_v14 }
 0x9de   :  { %v1207_v54 = vpop.permute.xlu0 %1206 }
 0x9df   :  { %v5626_v11 = vpop.permute.xlu1 %5625  ;;  %v1216_v22 = vand.u32 %v1207_v54, %v6141_v8 }
 0x9e0   :  { %v5628_v58 = vunpack.i.h.bf16 %v5626_v11  ;;  %v5627_v13 = vunpack.i.l.bf16 %v5626_v11 }
 0x9e2   :  { %v1029_v55 = vsel %vm1028_vm13, %v1025_v57, %v5627_v13  ;;  %v1030_v43 = vsel %vm1028_vm13, %v1026_v60, %v5628_v58  ;;  %v1273_v32 = vpop.permute.xlu0 %1272 }
 0x9e3   :  { %v1205_v44 = vpop.permute.xlu1 %1204  ;;  %v1032_v17 = vpack.c.bf16 %v1030_v43, %v1029_v55  ;;  %v1284_v15 = vsel %vm363_vm5, %v1273_v32, 0 }
 0x9e4   :  { %5220 = vmatprep.subr.bf16.mxu0 %v1205_v44 }
 0x9e5   :  { %5208 = vmatprep.mubr.msk.bf16.mxu0 %vm208_vm1, %v1032_v17 }
 0x9e6   :  { %5209 = vmatmul.mubr.msk.bf16.vlgmr.msra.gmra.mrb[24].mxu0 %vm208_vm1, %v1033_v18  ;;  %v1269_v33 = vpop.permute.xlu0 %1268 }
 0x9e7   :  { %5221 = vmatpush3.bf16.msra.mxu0 %v1205_v44  ;;  %v1271_v41 = vpop.permute.xlu1 %1270  ;;  %5224 = vmatprep.mubr.msk.bf16.mxu0 %vm433_vm10, %v1202_v20 }
 0x9e8   :  { %5222 = vmatprep.subr.bf16.mxu0 %v1216_v22  ;;  %v1281_v28 = vsel %vm363_vm5, %v1271_v41, 0 }
 0x9eb   :  { %5223 = vmatpush3.bf16.msra.mxu0 %v1216_v22  ;;  %v1267_v23 = vpop.permute.xlu1 %1266 }
 0x9ec   :  { %5574 = vmatprep.subr.msk.bf16.mxu0 %vm363_vm5, %v1271_v41 }
 0x9ee   :  { %5225 = vmatmul.mubr.msk.bf16.vlgmr.msra.gmra.mrb[28].mxu0 %vm433_vm10, %v1203_v25 }
 0x9ef   :  { %v1361_v27 = vpop.permute.xlu1 %1360  ;;  %5232 = vmatprep.mubr.msk.bf16.mxu0 %vm363_vm5, %v1267_v23 }
 0x9f0   :  { %5236 = vmatprep.subr.bf16.mxu1 %v1361_v27 }
 0x9f1   :  { %5237 = vmatpush3.bf16.msra.mxu1 %v1361_v27 }
 0x9f4   :  { %5229 = vmatpush3.bf16.xpose.msra.mxu0 %v1281_v28 }
 0x9f5   :  { %5575 = vmatprep.subr.msk.bf16.mxu0 %vm363_vm5, %v1273_v32 }
 0x9fc   :  { %5231 = vmatpush3.bf16.xpose.msra.mxu0 %v1284_v15 }
 0xa03   :  { %5233 = vmatmul.mubr.msk.bf16.vlgmr.msra.gmra.mrb[32].mxu0 %vm363_vm5, %v1269_v33 }
 0xab9   :  { %v6331_v34 = vpop.f32.mrb[24].mxu0 }
 0xaba   :  { %v6333_v35 = vpop.f32.mrb[25].mxu0 }
 0xabb   :  { %v5211_v36 = vpop.f32.mrb[26].mxu0 }
 0xabc   :  { %v6335_v39 = vpop.f32.mrb[27].mxu0 }
 0xac1   :  { %v6337_v42 = vpop.f32.mrb[28].mxu0 }
 0xac2   :  { %v6339_v45 = vpop.f32.mrb[29].mxu0 }
 0xac3   :  { %v5227_v46 = vpop.f32.mrb[30].mxu0 }
 0xac4   :  { %v6341_v47 = vpop.f32.mrb[31].mxu0 }
 0xad6   :  { %v5234_v48 = vpop.f32.mrb[32].mxu0 }
 0xad7   :  { %v1336_v49 = vmul.f32 0.35355338, %v5234_v48  ;;  %v1320_v50 = vpop.f32.mrb[33].mxu0 }
 0xad8   :  { %v1334_v51 = vmul.f32 0.35355338, %v1320_v50  ;;  %v5235_v53 = vpop.f32.mrb[34].mxu0 }
 0xad9   :  { %v1341_v56 = vmul.f32 1.442695, %v1336_v49  ;;  %v1323_v59 = vpop.f32.mrb[35].mxu0 }
 0xada   :  { %v1337_v61 = vmul.f32 1.442695, %v1334_v51  ;;  %v1335_v62 = vmul.f32 0.35355338, %v1323_v59 }
 0xadb   :  { %5767 = vpow2.f32 %v1341_v56 }
 0xadc   :  { %5769 = vpow2.f32 %v1337_v61  ;;  %v1339_v0 = vmul.f32 1.442695, %v1335_v62 }
 0xade   :  { %5771 = vpow2.f32 %v1339_v0 }
 0xae5   :  { %v5768_v1 = vpop.eup %5767 }
 0xae6   :  { %v5770_v2 = vpop.eup %5769  ;;  %v1349_v4 = vsel %vm440_vm9, %v5768_v1, 0.0 }
 0xae7   :  { %1350 = vadd.xlane.f32.xlu0 %v1349_v4  ;;  %v1343_v5 = vsel %vm433_vm10, %v5770_v2, 0.0 }
 0xae8   :  { %v5772_v7 = vpop.eup %5771  ;;  %1344 = vadd.xlane.f32.xlu1 %v1343_v5 }
 0xae9   :  { %v1346_v9 = vsel %vm433_vm10, %v5772_v7, 0.0 }
 0xaeb   :  { %1347 = vadd.xlane.f32.xlu0 %v1346_v9 }
 0xaf9   :  { %1426 = vrot.lane.b32.xlu1 %v6136_v3, %s6012_s17 }
 0xafd   :  { %1428 = vrot.lane.b32.xlu1 %v6224_v6, %s6012_s17 }
 0xb01   :  { %1424 = vrot.lane.b32.xlu1 %v6224_v6, %s6013_s18  ;;  %1362 = vrot.lane.b32.xlu0 %v6224_v6, %s6011_s16 }
 0xb05   :  { %1518 = vrot.lane.b32.xlu1 %v6224_v6, %s6014_s19  ;;  %1422 = vrot.lane.b32.xlu0 %v6136_v3, %s6013_s18 }
 0xb74   :  { %v1351_v10 = vpop.xlane.xlu0 %1350 }
 0xb75   :  { %v1345_v11 = vpop.xlane.xlu1 %1344  ;;  %5773 = vrcp.f32 %v1351_v10 }
 0xb76   :  { %5775 = vrcp.f32 %v1345_v11 }
 0xb78   :  { %v1348_v60 = vpop.xlane.xlu0 %1347 }
 0xb79   :  { %5777 = vrcp.f32 %v1348_v60  ;;  %v1427_v57 = vpop.permute.xlu1 %1426 }
 0xb7a   :  { %v1437_v18 = vsel %vm363_vm5, %v1427_v57, 0 }
 0xb7c   :  { %v1363_v12 = vpop.permute.xlu0 %1362 }
 0xb7d   :  { %v1372_v58 = vand.u32 %v1363_v12, %v6141_v8  ;;  %v1429_v19 = vpop.permute.xlu1 %1428 }
 0xb7e   :  { %v1440_v20 = vsel %vm363_vm5, %v1429_v19, 0 }
 0xb7f   :  { %5238 = vmatprep.subr.bf16.mxu1 %v1372_v58  ;;  %v5774_v13 = vpop.eup %5773 }
 0xb80   :  { %5239 = vmatpush3.bf16.msra.mxu1 %v1372_v58  ;;  %v5776_v14 = vpop.eup %5775  ;;  %v1357_v63 = vmul.f32 %v5774_v13, %v5768_v1  ;;  %v1423_v17 = vpop.permute.xlu0 %1422 }
 0xb81   :  { %5576 = vmatprep.subr.msk.bf16.mxu1 %vm363_vm5, %v1427_v57  ;;  %v1355_v55 = vmul.f32 %v5776_v14, %v5770_v2  ;;  %v1425_v22 = vpop.permute.xlu1 %1424 }
 0xb82   :  { %v1359_v44 = vpack.c.bf16 %v1357_v63, %v1357_v63 }
 0xb83   :  { %v5778_v40 = vpop.eup %5777 }
 0xb84   :  { %v1356_v43 = vmul.f32 %v5778_v40, %v5772_v7 }
 0xb85   :  { %v1519_v1 = vpop.permute.xlu1 %1518 }
 0xb86   :  { %v1358_v54 = vpack.c.bf16 %v1356_v43, %v1355_v55  ;;  %v1528_v9 = vand.u32 %v1519_v1, %v6141_v8 }
 0xb88   :  { %5240 = vmatprep.mubr.msk.bf16.mxu1 %vm433_vm10, %v1358_v54  ;;  %v5681_v54 = vld [vmem:[%s7248_s1 + $0x38] sm:$0xff]  }
 0xb89   :  { %5241 = vmatmul.mubr.msk.bf16.vlgmr.msra.gmra.mrb[28].mxu1 %vm433_vm10, %v1359_v44  ;;  %v1101_v44 = vadd.f32 %v6335_v39, %v6097_v30  ;;  %v1102_v30 = vadd.f32 %v6331_v34, %v6093_v26 }
 0xb8a   :  { %5245 = vmatpush3.bf16.xpose.msra.mxu1 %v1437_v18  ;;  %5248 = vmatprep.mubr.msk.bf16.mxu1 %vm363_vm5, %v1423_v17  ;;  %v1100_v18 = vadd.f32 %v6333_v35, %v6095_v29  ;;  %v5682_v29 = vld [vmem:[%s7248_s1 + $0x40] sm:$0xff]  }
 0xb8b   :  { %5577 = vmatprep.subr.msk.bf16.mxu1 %vm363_vm5, %v1429_v19  ;;  %v6406_v19 = vld [vmem:[%s7249_s2 + $0x11] ss:$0 sm:$0xff] }
 0xb92   :  { %5247 = vmatpush3.bf16.xpose.msra.mxu1 %v1440_v20  ;;  %v6409_v20 = vadd.f32 %v6406_v19, %v1101_v44 }
 0xb99   :  { %5249 = vmatmul.mubr.msk.bf16.vlgmr.msra.gmra.mrb[32].mxu1 %vm363_vm5, %v1425_v22  ;;  %v6412_v22 = vadd.f32 %v6406_v19, %v1100_v18 }
 0xb9b   :  { %v1841_v35 = vpack.c.bf16 %v6409_v20, %v6412_v22 }
 0xc5c   :  { %v6367_v41 = vpop.f32.mrb[28].mxu1 }
 0xc5d   :  { %v6369_v16 = vpop.f32.mrb[29].mxu1 }
 0xc5e   :  { %v5243_v23 = vpop.f32.mrb[30].mxu1 }
 0xc5f   :  { %v6371_v25 = vpop.f32.mrb[31].mxu1  ;;  %v6424_v23 = vadd.f32 %v6406_v19, %v1102_v30 }
 0xc60   :  { %v5629_v27 = vpack.i.bf16 %v6371_v25, %v6369_v16 }
 0xc61   :  { %v1842_v26 = vpack.c.bf16 %v6424_v23, %v6424_v23 }
 0xc6c   :  { %v5250_v28 = vpop.f32.mrb[32].mxu1 }
 0xc6d   :  { %v1492_v32 = vmul.f32 0.35355338, %v5250_v28  ;;  %v1476_v15 = vpop.f32.mrb[33].mxu1 }
 0xc6e   :  { %v1490_v33 = vmul.f32 0.35355338, %v1476_v15  ;;  %v5251_v36 = vpop.f32.mrb[34].mxu1 }
 0xc6f   :  { %v1497_v46 = vmul.f32 1.442695, %v1492_v32  ;;  %v1479_v48 = vpop.f32.mrb[35].mxu1 }
 0xc70   :  { %v1493_v49 = vmul.f32 1.442695, %v1490_v33  ;;  %v1491_v50 = vmul.f32 0.35355338, %v1479_v48 }
 0xc71   :  { %5779 = vpow2.f32 %v1497_v46 }
 0xc72   :  { %v1495_v51 = vmul.f32 1.442695, %v1491_v50  ;;  %5781 = vpow2.f32 %v1493_v49 }
 0xc74   :  { %5783 = vpow2.f32 %v1495_v51 }
 0xc7b   :  { %v5780_v53 = vpop.eup %5779 }
 0xc7c   :  { %v1505_v56 = vsel %vm440_vm9, %v5780_v53, 0.0  ;;  %v5782_v59 = vpop.eup %5781 }
 0xc7d   :  { %1506 = vadd.xlane.f32.xlu0 %v1505_v56  ;;  %v1499_v0 = vsel %vm433_vm10, %v5782_v59, 0.0 }
 0xc7e   :  { %v5784_v61 = vpop.eup %5783 }
 0xc7f   :  { %v1502_v62 = vsel %vm433_vm10, %v5784_v61, 0.0 }
 0xc80   :  { %1503 = vadd.xlane.f32.xlu1 %v1502_v62  ;;  %v6440_v62 = vld [vmem:[%s7249_s2 + $0x12] ss:$0 sm:$0xff] }
 0xc81   :  { %1500 = vadd.xlane.f32.xlu0 %v1499_v0 }
 0xc91   :  { %1582 = vrot.lane.b32.xlu1 %v6136_v3, %s6015_s20 }
 0xc95   :  { %1578 = vrot.lane.b32.xlu1 %v6136_v3, %s6016_s21 }
 0xc97   :  { %1516 = vrot.lane.b32.xlu0 %v6136_v3, %s6014_s19 }
 0xc9b   :  { %1584 = vrot.lane.b32.xlu0 %v6224_v6, %s6015_s20 }
 0xc9f   :  { %1580 = vrot.lane.b32.xlu0 %v6224_v6, %s6016_s21 }
 0xd0a   :  { %v1507_v2 = vpop.xlane.xlu0 %1506 }
 0xd0b   :  { %5785 = vrcp.f32 %v1507_v2 }
 0xd0d   :  { %v1504_v4 = vpop.xlane.xlu1 %1503 }
 0xd0e   :  { %5787 = vrcp.f32 %v1504_v4  ;;  %v1501_v5 = vpop.xlane.xlu0 %1500 }
 0xd0f   :  { %5789 = vrcp.f32 %v1501_v5 }
 0xd11   :  { %v1583_v60 = vpop.permute.xlu1 %1582 }
 0xd12   :  { %v1517_v7 = vpop.permute.xlu0 %1516  ;;  %v1593_v55 = vsel %vm363_vm5, %v1583_v60, 0 }
 0xd13   :  { %5252 = vmatprep.subr.bf16.mxu0 %v1517_v7 }
 0xd14   :  { %5253 = vmatpush3.bf16.msra.mxu0 %v1517_v7 }
 0xd15   :  { %5254 = vmatprep.subr.bf16.mxu0 %v1528_v9  ;;  %v5786_v10 = vpop.eup %5785  ;;  %v1579_v63 = vpop.permute.xlu1 %1578 }
 0xd16   :  { %v1513_v13 = vmul.f32 %v5786_v10, %v5780_v53  ;;  %v1585_v43 = vpop.permute.xlu0 %1584 }
 0xd17   :  { %v1596_v17 = vsel %vm363_vm5, %v1585_v43, 0 }
 0xd18   :  { %v5788_v11 = vpop.eup %5787  ;;  %5255 = vmatpush3.bf16.msra.mxu0 %v1528_v9  ;;  %v1515_v40 = vpack.c.bf16 %v1513_v13, %v1513_v13 }
 0xd19   :  { %v5790_v12 = vpop.eup %5789  ;;  %5578 = vmatprep.subr.msk.bf16.mxu0 %vm363_vm5, %v1583_v60  ;;  %v1512_v58 = vmul.f32 %v5788_v11, %v5784_v61 }
 0xd1a   :  { %v1511_v57 = vmul.f32 %v5790_v12, %v5782_v59  ;;  %v1581_v39 = vpop.permute.xlu0 %1580 }
 0xd1c   :  { %v1514_v14 = vpack.c.bf16 %v1512_v58, %v1511_v57 }
 0xd1e   :  { %5256 = vmatprep.mubr.msk.bf16.mxu0 %vm433_vm10, %v1514_v14 }
 0xd1f   :  { %5257 = vmatmul.mubr.msk.bf16.vlgmr.msra.gmra.mrb[36].mxu0 %vm433_vm10, %v1515_v40 }
 0xd20   :  { %5264 = vmatprep.mubr.msk.bf16.mxu0 %vm363_vm5, %v1579_v63 }
 0xd21   :  { %5261 = vmatpush3.bf16.xpose.msra.mxu0 %v1593_v55 }
 0xd22   :  { %5579 = vmatprep.subr.msk.bf16.mxu0 %vm363_vm5, %v1585_v43 }
 0xd29   :  { %5263 = vmatpush3.bf16.xpose.msra.mxu0 %v1596_v17 }
 0xd2a   :  { %5284 = vmatprep.subr.bf16.mxu0 %v5681_v54 }
 0xd30   :  { %5265 = vmatmul.mubr.msk.bf16.vlgmr.msra.gmra.mrb[40].mxu0 %vm363_vm5, %v1581_v39 }
 0xd31   :  { %5285 = vmatpush3.bf16.msra.mxu0 %v5681_v54  ;;  %5288 = vmatprep.mubr.msk.bf16.mxu0 %vm208_vm1, %v1841_v35 }
 0xd32   :  { %5286 = vmatprep.subr.bf16.mxu0 %v5682_v29 }
 0xd35   :  { %5287 = vmatpush3.bf16.msra.mxu0 %v5682_v29 }
 0xd36   :  { %5312 = vmatprep.subr.bf16.mxu0 %v5681_v54 }
 0xd38   :  { %5289 = vmatmul.mubr.msk.bf16.vlgmr.msra.gmra.mrb[44].mxu0 %vm208_vm1, %v1842_v26 }
 0xd39   :  { %5313 = vmatpush3.bf16.msra.mxu0 %v5681_v54 }
 0xd3a   :  { %5314 = vmatprep.subr.bf16.mxu0 %v5682_v29 }
 0xd3d   :  { %5315 = vmatpush3.bf16.msra.mxu0 %v5682_v29 }
 0xdf2   :  { %v6429_v34 = vpop.f32.mrb[36].mxu0 }
 0xdf3   :  { %v6431_v28 = vpop.f32.mrb[37].mxu0 }
 0xdf4   :  { %v5259_v32 = vpop.f32.mrb[38].mxu0 }
 0xdf5   :  { %v6433_v15 = vpop.f32.mrb[39].mxu0 }
 0xdf6   :  { %v5634_v33 = vpack.i.bf16 %v6433_v15, %v6431_v28 }
 0xe03   :  { %v5266_v36 = vpop.f32.mrb[40].mxu0 }
 0xe04   :  { %v1648_v46 = vmul.f32 0.35355338, %v5266_v36  ;;  %v1632_v48 = vpop.f32.mrb[41].mxu0 }
 0xe05   :  { %v1646_v49 = vmul.f32 0.35355338, %v1632_v48  ;;  %v5267_v50 = vpop.f32.mrb[42].mxu0 }
 0xe06   :  { %v1653_v51 = vmul.f32 1.442695, %v1648_v46  ;;  %v1635_v53 = vpop.f32.mrb[43].mxu0 }
 0xe07   :  { %v1649_v56 = vmul.f32 1.442695, %v1646_v49  ;;  %v1647_v59 = vmul.f32 0.35355338, %v1635_v53 }
 0xe08   :  { %5791 = vpow2.f32 %v1653_v51 }
 0xe09   :  { %5793 = vpow2.f32 %v1649_v56  ;;  %v1651_v61 = vmul.f32 1.442695, %v1647_v59 }
 0xe0b   :  { %5795 = vpow2.f32 %v1651_v61  ;;  %v6442_v0 = vpop.f32.mrb[44].mxu0 }
 0xe0c   :  { %v1899_v1 = vpop.f32.mrb[45].mxu0 }
 0xe0d   :  { %v6445_v2 = vadd.f32 %v6440_v62, %v1899_v1  ;;  %v5291_v4 = vpop.f32.mrb[46].mxu0 }
 0xe0e   :  { %v1902_v5 = vpop.f32.mrb[47].mxu0 }
 0xe0f   :  { %v6448_v7 = vmul.f32 0.70710677, %v6445_v2  ;;  %v6451_v9 = vadd.f32 %v6440_v62, %v1902_v5 }
 0xe11   :  { %v1919_v10 = vand.u32 2147483647, %v6448_v7  ;;  %v6455_v11 = vmul.f32 0.70710677, %v6451_v9  ;;  %vm1979_vm14 = vcmp.ge.f32.partialorder %v6448_v7, 0.0  ;;  %v1914_v28 = vmul.f32 0.5, %v6451_v9 }
 0xe12   :  { %v6457_v60 = vpop.eup %5791 }
 0xe13   :  { %v6459_v12 = vpop.eup %5793  ;;  %v1922_v58 = vmul.f32 0.3275911, %v1919_v10  ;;  %v1920_v13 = vand.u32 2147483647, %v6455_v11  ;;  %v1661_v57 = vsel %vm440_vm9, %v6457_v60, 0.0  ;;  %v1961_v44 = vsub.f32 0.0, %v1919_v10 }
 0xe14   :  { %v1655_v14 = vsel %vm433_vm10, %v6459_v12, 0.0  ;;  %1662 = vadd.xlane.f32.xlu0 %v1661_v57  ;;  %vm1980_vm15 = vcmp.ge.f32.partialorder %v6455_v11, 0.0 }
 0xe15   :  { %v6466_v40 = vpop.eup %5795  ;;  %v1925_v63 = vadd.f32 1.0, %v1922_v58  ;;  %v1923_v55 = vmul.f32 0.3275911, %v1920_v13  ;;  %1656 = vadd.xlane.f32.xlu1 %v1655_v14  ;;  %v1962_v17 = vsub.f32 0.0, %v1920_v13  ;;  %v1964_v30 = vmul.f32 %v1961_v44, %v1919_v10 }
 0xe16   :  { %v1658_v43 = vsel %vm433_vm10, %v6466_v40, 0.0 }
 0xe17   :  { %5797 = vrcp.f32 %v1925_v63  ;;  %v1926_v54 = vadd.f32 1.0, %v1923_v55  ;;  %v1965_v26 = vmul.f32 %v1962_v17, %v1920_v13  ;;  %v1967_v32 = vmul.f32 1.442695, %v1964_v30 }
 0xe18   :  { %1659 = vadd.xlane.f32.xlu0 %v1658_v43 }
 0xe19   :  { %5799 = vrcp.f32 %v1926_v54  ;;  %v1969_v50 = vmul.f32 1.442695, %v1965_v26  ;;  %v1913_v54 = vmul.f32 0.5, %v6445_v2 }
 0xe1a   :  { %5801 = vpow2.f32 %v1967_v32 }
 0xe1b   :  { %5803 = vpow2.f32 %v1969_v50 }
 0xe21   :  { %v5798_v18 = vpop.eup %5797 }
 0xe22   :  { %v1934_v29 = vmul.f32 1.0614054, %v5798_v18 }
 0xe23   :  { %v5800_v35 = vpop.eup %5799 }
 0xe24   :  { %v1937_v39 = vadd.f32 -1.4531521, %v1934_v29  ;;  %v1935_v36 = vmul.f32 1.0614054, %v5800_v35  ;;  %v5802_v16 = vpop.eup %5801 }
 0xe26   :  { %v1940_v46 = vmul.f32 %v5798_v18, %v1937_v39  ;;  %1672 = vrot.lane.b32.xlu1 %v6136_v3, %s6017_s22  ;;  %v1938_v48 = vadd.f32 -1.4531521, %v1935_v36 }
 0xe28   :  { %v1943_v49 = vadd.f32 1.4214138, %v1940_v46  ;;  %v1941_v51 = vmul.f32 %v5800_v35, %v1938_v48 }
 0xe2a   :  { %v1946_v53 = vmul.f32 %v5798_v18, %v1943_v49  ;;  %5630 = vrot.lane.b32.xlu1 %v5629_v27, %s6018_s23  ;;  %v1944_v56 = vadd.f32 1.4214138, %v1941_v51 }
 0xe2c   :  { %v1949_v59 = vadd.f32 -0.28449672, %v1946_v53  ;;  %v1947_v61 = vmul.f32 %v5800_v35, %v1944_v56 }
 0xe2e   :  { %v1952_v1 = vmul.f32 %v5798_v18, %v1949_v59  ;;  %1741 = vrot.lane.b32.xlu1 %v6367_v41, %s6018_s23  ;;  %v1950_v3 = vadd.f32 -0.28449672, %v1947_v61  ;;  %1674 = vrot.lane.b32.xlu0 %v6224_v6, %s6017_s22  ;;  %v5804_v41 = vpop.eup %5803 }
 0xe30   :  { %v1955_v4 = vadd.f32 0.2548296, %v1952_v1  ;;  %v1953_v5 = vmul.f32 %v5800_v35, %v1950_v3 }
 0xe32   :  { %v1958_v10 = vmul.f32 %v5798_v18, %v1955_v4  ;;  %1753 = vrot.lane.b32.xlu1 %v6429_v34, %s6019_s24  ;;  %v1956_v25 = vadd.f32 0.2548296, %v1953_v5  ;;  %5635 = vrot.lane.b32.xlu0 %v5634_v33, %s6019_s24 }
 0xe34   :  { %v1973_v27 = vmul.f32 %v5802_v16, %v1958_v10  ;;  %v1959_v58 = vmul.f32 %v5800_v35, %v1956_v25 }
 0xe36   :  { %v1976_v13 = vsub.f32 1.0, %v1973_v27  ;;  %v1974_v57 = vmul.f32 %v5804_v41, %v1959_v58 }
 0xe38   :  { %v1982_v14 = vsub.f32 0.0, %v1976_v13  ;;  %v1977_v6 = vsub.f32 1.0, %v1974_v57 }
 0xe3a   :  { %v1985_v63 = vsel %vm1979_vm14, %v1976_v13, %v1982_v14  ;;  %v1983_v55 = vsub.f32 0.0, %v1977_v6 }
 0xe3b   :  { %v1988_v43 = vadd.f32 1.0, %v1985_v63 }
 0xe3c   :  { %v1986_v34 = vsel %vm1980_vm15, %v1977_v6, %v1983_v55 }
 0xe3d   :  { %v1989_v15 = vadd.f32 1.0, %v1986_v34  ;;  %v6490_v33 = vmul.f32 %v1988_v43, %v1913_v54 }
 0xe3f   :  { %v6492_v44 = vmul.f32 %v1989_v15, %v1914_v28 }
 0xe41   :  { %v1994_v17 = vpack.c.bf16 %v6492_v44, %v6490_v33  ;;  %v5687_v33 = vld [vmem:[%s7248_s1 + $0x68] sm:$0xff]  }
 0xea1   :  { %v1663_v7 = vpop.xlane.xlu0 %1662 }
 0xea2   :  { %v1657_v18 = vpop.xlane.xlu1 %1656  ;;  %5805 = vrcp.f32 %v1663_v7 }
 0xea3   :  { %5807 = vrcp.f32 %v1657_v18 }
 0xea5   :  { %v1660_v30 = vpop.xlane.xlu0 %1659 }
 0xea6   :  { %v1673_v29 = vpop.permute.xlu1 %1672  ;;  %5809 = vrcp.f32 %v1660_v30 }
 0xea7   :  { %5268 = vmatprep.subr.bf16.mxu1 %v1673_v29 }
 0xea8   :  { %5269 = vmatpush3.bf16.msra.mxu1 %v1673_v29 }
 0xea9   :  { %v1675_v2 = vpop.permute.xlu0 %1674 }
 0xeaa   :  { %v1684_v9 = vand.u32 %v1675_v2, %v6141_v8  ;;  %v5631_v4 = vpop.permute.xlu1 %5630 }
 0xeab   :  { %v5633_v13 = vunpack.i.h.bf16 %v5631_v4  ;;  %v5632_v57 = vunpack.i.l.bf16 %v5631_v4 }
 0xeac   :  { %5270 = vmatprep.subr.bf16.mxu1 %v1684_v9  ;;  %v5806_v11 = vpop.eup %5805 }
 0xead   :  { %5271 = vmatpush3.bf16.msra.mxu1 %v1684_v9  ;;  %v5808_v35 = vpop.eup %5807  ;;  %v1669_v26 = vmul.f32 %v5806_v11, %v6457_v60  ;;  %v6509_v60 = vld [vmem:[%s7248_s1 + $0x48] sm:$0xff]   ;;  %v1771_v34 = vsel %vm363_vm5, %v6341_v47, %v5633_v13  ;;  %v1770_v15 = vsel %vm363_vm5, %v6339_v45, %v5632_v57  ;;  %v5684_v45 = vld [vmem:[%s7248_s1 + $0x50] sm:$0xff]  }
 0xeae   :  { %5276 = vmatprep.subr.bf16.mxu1 %v6278_v37  ;;  %v1667_v32 = vmul.f32 %v5808_v35, %v6459_v12  ;;  %5320 = vmatprep.subr.bf16.mxu0 %v6509_v60  ;;  %v1742_v10 = vpop.permute.xlu1 %1741 }
 0xeaf   :  { %v1671_v48 = vpack.c.bf16 %v1669_v26, %v1669_v26  ;;  %v1772_v54 = vsel %vm363_vm5, %v6337_v42, %v1742_v10 }
 0xeb0   :  { %v5810_v39 = vpop.eup %5809 }
 0xeb1   :  { %v1668_v36 = vmul.f32 %v5810_v39, %v6466_v40 }
 0xeb2   :  { %v1754_v41 = vpop.permute.xlu1 %1753 }
 0xeb3   :  { %v1670_v46 = vpack.c.bf16 %v1668_v36, %v1667_v32  ;;  %v1775_v7 = vsel %vm1024_vm12, %v1772_v54, %v1754_v41  ;;  %v5685_v32 = vld [vmem:[%s7248_s1 + $0x58] sm:$0xff]  }
 0xeb5   :  { %5272 = vmatprep.mubr.msk.bf16.mxu1 %vm433_vm10, %v1670_v46 }
 0xeb6   :  { %5273 = vmatmul.mubr.msk.bf16.vlgmr.msra.gmra.mrb[36].mxu1 %vm433_vm10, %v1671_v48  ;;  %v5686_v48 = vld [vmem:[%s7248_s1 + $0x60] sm:$0xff]  }
 0xeb7   :  { %5277 = vmatpush3.bf16.msra.mxu1 %v6278_v37 }
 0xeb8   :  { %5278 = vmatprep.subr.bf16.mxu1 %v6285_v38 }
 0xebb   :  { %5279 = vmatpush3.bf16.msra.mxu1 %v6285_v38  ;;  %v6517_v38 = vadd.f32 %v6442_v0, %v6440_v62  ;;  %v5636_v0 = vpop.permute.xlu0 %5635 }
 0xebc   :  { %5292 = vmatprep.subr.bf16.mxu1 %v6509_v60  ;;  %v5638_v6 = vunpack.i.h.bf16 %v5636_v0  ;;  %v5637_v63 = vunpack.i.l.bf16 %v5636_v0 }
 0xebd   :  { %v6520_v51 = vmul.f32 0.70710677, %v6517_v38 }
 0xebe   :  { %v1774_v2 = vsel %vm1024_vm12, %v1771_v34, %v5638_v6  ;;  %v1773_v9 = vsel %vm1024_vm12, %v1770_v15, %v5637_v63 }
 0xebf   :  { %v1921_v53 = vand.u32 2147483647, %v6520_v51  ;;  %vm1981_vm0 = vcmp.ge.f32.partialorder %v6520_v51, 0.0 }
 0xec1   :  { %v1924_v56 = vmul.f32 0.3275911, %v1921_v53  ;;  %v1963_v25 = vsub.f32 0.0, %v1921_v53 }
 0xec3   :  { %v1927_v59 = vadd.f32 1.0, %v1924_v56  ;;  %v1966_v58 = vmul.f32 %v1963_v25, %v1921_v53  ;;  %v5690_v53 = vld [vmem:[%s7248_s1 + $0x80] sm:$0xff]   ;;  %v1915_v56 = vmul.f32 0.5, %v6517_v38 }
 0xec5   :  { %5811 = vrcp.f32 %v1927_v59  ;;  %v1971_v55 = vmul.f32 1.442695, %v1966_v58 }
 0xec7   :  { %5813 = vpow2.f32 %v1971_v55 }
 0xecf   :  { %v5812_v61 = vpop.eup %5811 }
 0xed0   :  { %v1936_v1 = vmul.f32 1.0614054, %v5812_v61 }
 0xed1   :  { %v5814_v46 = vpop.eup %5813 }
 0xed2   :  { %v1939_v3 = vadd.f32 -1.4531521, %v1936_v1  ;;  %v6574_v1 = vld [vmem:[%s7248_s1 + $0x90] sm:$0xff]  }
 0xed4   :  { %v1942_v5 = vmul.f32 %v5812_v61, %v1939_v3 }
 0xed6   :  { %v1945_v16 = vadd.f32 1.4214138, %v1942_v5 }
 0xed8   :  { %v1948_v27 = vmul.f32 %v5812_v61, %v1945_v16 }
 0xeda   :  { %v1951_v14 = vadd.f32 -0.28449672, %v1948_v27 }
 0xedc   :  { %v1954_v29 = vmul.f32 %v5812_v61, %v1951_v14 }
 0xede   :  { %v1957_v26 = vadd.f32 0.2548296, %v1954_v29 }
 0xee0   :  { %v1960_v36 = vmul.f32 %v5812_v61, %v1957_v26  ;;  %v6567_v61 = vld [vmem:[%s7248_s1 + $0x88] sm:$0xff]  }
 0xf89   :  { %v5274_v12 = vpop.f32.mrb[36].mxu1 }
 0xf8a   :  { %1765 = vrot.lane.b32.xlu1 %v5274_v12, %s6020_s29  ;;  %v1720_v40 = vpop.f32.mrb[37].mxu1  ;;  %v1975_v12 = vmul.f32 %v5814_v46, %v1960_v36 }
 0xf8b   :  { %v5275_v49 = vpop.f32.mrb[38].mxu1 }
 0xf8c   :  { %v1723_v50 = vpop.f32.mrb[39].mxu1  ;;  %v1978_v44 = vsub.f32 1.0, %v1975_v12  ;;  %v5689_v49 = vld [vmem:[%s7248_s1 + $0x78] sm:$0xff]  }
 0xf8d   :  { %v5639_v37 = vpack.i.bf16 %v1723_v50, %v1720_v40 }
 0xf8e   :  { %v1984_v40 = vsub.f32 0.0, %v1978_v44 }
 0xf8f   :  { %5640 = vrot.lane.b32.xlu0 %v5639_v37, %s6020_s29 }
 0xf90   :  { %v1987_v50 = vsel %vm1981_vm0, %v1978_v44, %v1984_v40 }
 0xf91   :  { %v1990_v37 = vadd.f32 1.0, %v1987_v50 }
 0xf93   :  { %v1993_v59 = vmul.f32 %v1990_v37, %v1915_v56 }
 0xf95   :  { %v1995_v51 = vpack.c.bf16 %v1993_v59, %v1993_v59 }
 0xffc   :  { %v1766_v43 = vpop.permute.xlu1 %1765 }
 0xffd   :  { %v1778_v11 = vsel %vm1028_vm13, %v1775_v7, %v1766_v43 }
 0xffe   :  { %v1780_v39 = vpack.c.bf16 %v1778_v11, %v1778_v11 }
0x1001   :  { %v5641_v28 = vpop.permute.xlu0 %5640 }
0x1002   :  { %v5643_v18 = vunpack.i.h.bf16 %v5641_v28  ;;  %v5642_v30 = vunpack.i.l.bf16 %v5641_v28 }
0x1004   :  { %v1776_v47 = vsel %vm1028_vm13, %v1773_v9, %v5642_v30  ;;  %v1777_v42 = vsel %vm1028_vm13, %v1774_v2, %v5643_v18 }
0x1005   :  { %v1779_v35 = vpack.c.bf16 %v1777_v42, %v1776_v47 }
0x1007   :  { %5280 = vmatprep.mubr.msk.bf16.mxu1 %vm208_vm1, %v1779_v35 }
0x1008   :  { %5281 = vmatmul.mubr.msk.bf16.vlgmr.msra.gmra.mrb[40].mxu1 %vm208_vm1, %v1780_v39 }
0x1009   :  { %5293 = vmatpush3.bf16.msra.mxu1 %v6509_v60  ;;  %5308 = vmatprep.mubr.bf16.mxu1 %v1994_v17  ;;  %v5688_v17 = vld [vmem:[%s7248_s1 + $0x70] sm:$0xff]  }
0x100a   :  { %5294 = vmatprep.subr.bf16.mxu1 %v5684_v45 }
0x100d   :  { %5295 = vmatpush3.bf16.msra.mxu1 %v5684_v45 }
0x100e   :  { %5296 = vmatprep.subr.bf16.mxu1 %v5685_v32 }
0x1011   :  { %5297 = vmatpush3.bf16.msra.mxu1 %v5685_v32 }
0x1012   :  { %5298 = vmatprep.subr.bf16.mxu1 %v5686_v48 }
0x1015   :  { %5299 = vmatpush3.bf16.msra.mxu1 %v5686_v48 }
0x1016   :  { %5300 = vmatprep.subr.bf16.mxu1 %v5687_v33 }
0x1019   :  { %5301 = vmatpush3.bf16.msra.mxu1 %v5687_v33 }
0x101a   :  { %5302 = vmatprep.subr.bf16.mxu1 %v5688_v17 }
0x101d   :  { %5303 = vmatpush3.bf16.msra.mxu1 %v5688_v17 }
0x101e   :  { %5304 = vmatprep.subr.bf16.mxu1 %v5689_v49 }
0x1021   :  { %5305 = vmatpush3.bf16.msra.mxu1 %v5689_v49 }
0x1022   :  { %5306 = vmatprep.subr.bf16.mxu1 %v5690_v53 }
0x1025   :  { %5307 = vmatpush3.bf16.msra.mxu1 %v5690_v53 }
0x1026   :  { %5340 = vmatprep.subr.bf16.mxu1 %v6567_v61 }
0x1028   :  { %5309 = vmatmul.mubr.bf16.vlgmr.msra.gmra.mrb[44].mxu1 %v1995_v51 }
0x1029   :  { %5341 = vmatpush3.bf16.msra.mxu1 %v6567_v61 }
0x102a   :  { %5342 = vmatprep.subr.bf16.mxu1 %v6574_v1 }
0x102d   :  { %5343 = vmatpush3.bf16.msra.mxu1 %v6574_v1 }
0x102e   :  { %5348 = vmatprep.subr.bf16.mxu1 %v6567_v61 }
0x10db   :  { %v5282_v38 = vpop.f32.mrb[40].mxu1 }
0x10dc   :  { %v1837_v3 = vadd.f32 %v5282_v38, %v6089_v21  ;;  %v1821_v4 = vpop.f32.mrb[41].mxu1 }
0x10dd   :  { %v1835_v5 = vadd.f32 %v1821_v4, %v6091_v24  ;;  %v5283_v10 = vpop.f32.mrb[42].mxu1  ;;  %v6601_v24 = vld [vmem:[%s7249_s2 + $0x13] ss:$0 sm:$0xff] }
0x10de   :  { %v1824_v16 = vpop.f32.mrb[43].mxu1  ;;  %v6583_v27 = vadd.f32 %v6406_v19, %v1837_v3 }
0x10df   :  { %v1836_v25 = vadd.f32 %v1824_v16, %v6099_v31  ;;  %v6586_v58 = vadd.f32 %v6406_v19, %v1835_v5 }
0x10e0   :  { %v2181_v21 = vpack.c.bf16 %v6583_v27, %v6583_v27 }
0x10e1   :  { %v6589_v0 = vadd.f32 %v6406_v19, %v1836_v25 }
0x10e3   :  { %v2180_v41 = vpack.c.bf16 %v6589_v0, %v6586_v58 }
0x10e5   :  { %5316 = vmatprep.mubr.msk.bf16.mxu0 %vm208_vm1, %v2180_v41 }
0x10e6   :  { %5317 = vmatmul.mubr.msk.bf16.vlgmr.msra.gmra.mrb[48].mxu0 %vm208_vm1, %v2181_v21 }
0x10e7   :  { %5321 = vmatpush3.bf16.msra.mxu0 %v6509_v60 }
0x10e8   :  { %5322 = vmatprep.subr.bf16.mxu0 %v5684_v45 }
0x10eb   :  { %5323 = vmatpush3.bf16.msra.mxu0 %v5684_v45 }
0x10ec   :  { %5324 = vmatprep.subr.bf16.mxu0 %v5685_v32 }
0x10ef   :  { %5325 = vmatpush3.bf16.msra.mxu0 %v5685_v32 }
0x10f0   :  { %5326 = vmatprep.subr.bf16.mxu0 %v5686_v48 }
0x10f3   :  { %5327 = vmatpush3.bf16.msra.mxu0 %v5686_v48 }
0x10f4   :  { %5328 = vmatprep.subr.bf16.mxu0 %v5687_v33 }
0x10f7   :  { %5329 = vmatpush3.bf16.msra.mxu0 %v5687_v33 }
0x10f8   :  { %5330 = vmatprep.subr.bf16.mxu0 %v5688_v17 }
0x10fb   :  { %v5310_v31 = vpop.f32.mrb[44].mxu1  ;;  %5331 = vmatpush3.bf16.msra.mxu0 %v5688_v17 }
0x10fc   :  { %v6604_v19 = vadd.f32 %v5310_v31, %v6601_v24  ;;  %v2082_v60 = vpop.f32.mrb[45].mxu1  ;;  %5332 = vmatprep.subr.bf16.mxu0 %v5689_v49 }
0x10fd   :  { %v6607_v13 = vadd.f32 %v6601_v24, %v2082_v60  ;;  %v5311_v57 = vpop.f32.mrb[46].mxu1 }
0x10fe   :  { %v6610_v14 = vmul.f32 0.70710677, %v6604_v19  ;;  %v2085_v6 = vpop.f32.mrb[47].mxu1 }
0x10ff   :  { %v6613_v63 = vmul.f32 0.70710677, %v6607_v13  ;;  %v6616_v55 = vadd.f32 %v6601_v24, %v2085_v6  ;;  %5333 = vmatpush3.bf16.msra.mxu0 %v5689_v49 }
0x1100   :  { %v2104_v43 = vand.u32 2147483647, %v6610_v14  ;;  %5334 = vmatprep.subr.bf16.mxu0 %v5690_v53  ;;  %vm2164_vm2 = vcmp.ge.f32.partialorder %v6610_v14, 0.0 }
0x1101   :  { %v2102_v34 = vand.u32 2147483647, %v6613_v63  ;;  %v6621_v54 = vmul.f32 0.70710677, %v6616_v55  ;;  %vm2162_vm3 = vcmp.ge.f32.partialorder %v6613_v63, 0.0  ;;  %v2097_v14 = vmul.f32 0.5, %v6616_v55 }
0x1102   :  { %v2107_v28 = vmul.f32 0.3275911, %v2104_v43  ;;  %v2146_v9 = vsub.f32 0.0, %v2104_v43 }
0x1103   :  { %v2105_v15 = vmul.f32 0.3275911, %v2102_v34  ;;  %v2103_v7 = vand.u32 2147483647, %v6621_v54  ;;  %5335 = vmatpush3.bf16.msra.mxu0 %v5690_v53  ;;  %v2144_v11 = vsub.f32 0.0, %v2102_v34  ;;  %vm2163_vm4 = vcmp.ge.f32.partialorder %v6621_v54, 0.0 }
0x1104   :  { %v2110_v18 = vadd.f32 1.0, %v2107_v28  ;;  %v2149_v42 = vmul.f32 %v2146_v9, %v2104_v43 }
0x1105   :  { %v2108_v30 = vadd.f32 1.0, %v2105_v15  ;;  %v2106_v29 = vmul.f32 0.3275911, %v2103_v7  ;;  %v2145_v35 = vsub.f32 0.0, %v2103_v7  ;;  %v2147_v26 = vmul.f32 %v2144_v11, %v2102_v34 }
0x1106   :  { %5815 = vrcp.f32 %v2110_v18  ;;  %v2154_v48 = vmul.f32 1.442695, %v2149_v42 }
0x1107   :  { %5817 = vrcp.f32 %v2108_v30  ;;  %v2109_v2 = vadd.f32 1.0, %v2106_v29  ;;  %v2148_v33 = vmul.f32 %v2145_v35, %v2103_v7  ;;  %v2150_v17 = vmul.f32 1.442695, %v2147_v26 }
0x1109   :  { %5819 = vrcp.f32 %v2109_v2  ;;  %v2152_v56 = vmul.f32 1.442695, %v2148_v33 }
0x110a   :  { %5821 = vpow2.f32 %v2154_v48  ;;  %v2096_v48 = vmul.f32 0.5, %v6607_v13 }
0x110b   :  { %5823 = vpow2.f32 %v2150_v17 }
0x110c   :  { %5825 = vpow2.f32 %v2152_v56 }
0x1110   :  { %v5816_v47 = vpop.eup %5815 }
0x1111   :  { %v5818_v39 = vpop.eup %5817  ;;  %v2119_v45 = vmul.f32 1.0614054, %v5816_v47 }
0x1112   :  { %v2117_v32 = vmul.f32 1.0614054, %v5818_v39 }
0x1113   :  { %v2122_v36 = vadd.f32 -1.4531521, %v2119_v45  ;;  %v5820_v46 = vpop.eup %5819 }
0x1114   :  { %v2120_v12 = vadd.f32 -1.4531521, %v2117_v32  ;;  %v2118_v40 = vmul.f32 1.0614054, %v5820_v46  ;;  %v5822_v6 = vpop.eup %5821 }
0x1115   :  { %v2125_v44 = vmul.f32 %v5816_v47, %v2122_v36  ;;  %v5824_v34 = vpop.eup %5823 }
0x1116   :  { %v2123_v49 = vmul.f32 %v5818_v39, %v2120_v12  ;;  %v2121_v37 = vadd.f32 -1.4531521, %v2118_v40  ;;  %v5826_v29 = vpop.eup %5825 }
0x1117   :  { %v2128_v50 = vadd.f32 1.4214138, %v2125_v44 }
0x1118   :  { %v2126_v53 = vadd.f32 1.4214138, %v2123_v49  ;;  %v2124_v51 = vmul.f32 %v5820_v46, %v2121_v37 }
0x1119   :  { %v2131_v59 = vmul.f32 %v5816_v47, %v2128_v50 }
0x111a   :  { %v2129_v38 = vmul.f32 %v5818_v39, %v2126_v53  ;;  %v2127_v4 = vadd.f32 1.4214138, %v2124_v51 }
0x111b   :  { %v2134_v3 = vadd.f32 -0.28449672, %v2131_v59 }
0x111c   :  { %v2132_v5 = vadd.f32 -0.28449672, %v2129_v38  ;;  %v2130_v16 = vmul.f32 %v5820_v46, %v2127_v4 }
0x111d   :  { %v2137_v10 = vmul.f32 %v5816_v47, %v2134_v3 }
0x111e   :  { %v2135_v25 = vmul.f32 %v5818_v39, %v2132_v5  ;;  %v2133_v21 = vadd.f32 -0.28449672, %v2130_v16 }
0x111f   :  { %v2140_v41 = vadd.f32 0.2548296, %v2137_v10 }
0x1120   :  { %v2138_v31 = vadd.f32 0.2548296, %v2135_v25  ;;  %v2136_v57 = vmul.f32 %v5820_v46, %v2133_v21 }
0x1121   :  { %v2143_v60 = vmul.f32 %v5816_v47, %v2140_v41 }
0x1122   :  { %v2141_v43 = vmul.f32 %v5818_v39, %v2138_v31  ;;  %v2139_v15 = vadd.f32 0.2548296, %v2136_v57  ;;  %v2098_v39 = vmul.f32 0.5, %v6604_v19 }
0x1123   :  { %v2158_v28 = vmul.f32 %v5822_v6, %v2143_v60 }
0x1124   :  { %v2156_v7 = vmul.f32 %v5824_v34, %v2141_v43  ;;  %v2142_v30 = vmul.f32 %v5820_v46, %v2139_v15 }
0x1125   :  { %v2161_v18 = vsub.f32 1.0, %v2158_v28 }
0x1126   :  { %v2159_v2 = vsub.f32 1.0, %v2156_v7  ;;  %v2157_v11 = vmul.f32 %v5826_v29, %v2142_v30 }
0x1127   :  { %v2167_v9 = vsub.f32 0.0, %v2161_v18 }
0x1128   :  { %v2165_v42 = vsub.f32 0.0, %v2159_v2  ;;  %v2160_v47 = vsub.f32 1.0, %v2157_v11 }
0x1129   :  { %v2170_v35 = vsel %vm2164_vm2, %v2161_v18, %v2167_v9 }
0x112a   :  { %v2173_v45 = vadd.f32 1.0, %v2170_v35  ;;  %v2168_v26 = vsel %vm2162_vm3, %v2159_v2, %v2165_v42  ;;  %v2166_v36 = vsub.f32 0.0, %v2160_v47 }
0x112b   :  { %v2171_v32 = vadd.f32 1.0, %v2168_v26 }
0x112c   :  { %v2176_v46 = vmul.f32 %v2173_v45, %v2098_v39  ;;  %v2169_v12 = vsel %vm2163_vm4, %v2160_v47, %v2166_v36 }
0x112d   :  { %v2174_v33 = vmul.f32 %v2171_v32, %v2096_v48  ;;  %v2172_v44 = vadd.f32 1.0, %v2169_v12 }
0x112e   :  { %v6631_v63 = vadd.f32 %v2176_v46, %v6424_v23 }
0x112f   :  { %v2175_v17 = vmul.f32 %v2172_v44, %v2097_v14  ;;  %v6634_v40 = vadd.f32 %v2174_v33, %v6412_v22 }
0x1130   :  { %v2483_v54 = vpack.c.bf16 %v6631_v63, %v6631_v63 }
0x1131   :  { %v6637_v19 = vadd.f32 %v2175_v17, %v6409_v20 }
0x1133   :  { %v2482_v13 = vpack.c.bf16 %v6637_v19, %v6634_v40 }
0x1135   :  { %5344 = vmatprep.mubr.msk.bf16.mxu1 %vm208_vm1, %v2482_v13 }
0x1136   :  { %5345 = vmatmul.mubr.msk.bf16.vlgmr.msra.gmra.mrb[48].mxu1 %vm208_vm1, %v2483_v54 }
0x1137   :  { %5349 = vmatpush3.bf16.msra.mxu1 %v6567_v61 }
0x1138   :  { %5350 = vmatprep.subr.bf16.mxu1 %v6574_v1 }
0x113b   :  { %5351 = vmatpush3.bf16.msra.mxu1 %v6574_v1 }
0x11b9   :  { %v5318_v22 = vpop.f32.mrb[48].mxu0 }
0x11ba   :  { %v6649_v20 = vadd.f32 %v5318_v22, %v6440_v62  ;;  %v2222_v23 = vpop.f32.mrb[49].mxu0 }
0x11bb   :  { %v6652_v55 = vadd.f32 %v6440_v62, %v2222_v23  ;;  %v5319_v49 = vpop.f32.mrb[50].mxu0 }
0x11bc   :  { %v6655_v50 = vmul.f32 0.70710677, %v6649_v20  ;;  %v2225_v37 = vpop.f32.mrb[51].mxu0 }
0x11bd   :  { %v6658_v53 = vmul.f32 0.70710677, %v6652_v55  ;;  %v6661_v61 = vadd.f32 %v6440_v62, %v2225_v37 }
0x11be   :  { %v2244_v1 = vand.u32 2147483647, %v6655_v50  ;;  %vm2304_vm6 = vcmp.ge.f32.partialorder %v6655_v50, 0.0 }
0x11bf   :  { %v2242_v56 = vand.u32 2147483647, %v6658_v53  ;;  %v6666_v59 = vmul.f32 0.70710677, %v6661_v61  ;;  %vm2302_vm7 = vcmp.ge.f32.partialorder %v6658_v53, 0.0 }
0x11c0   :  { %v2247_v51 = vmul.f32 0.3275911, %v2244_v1  ;;  %v2286_v62 = vsub.f32 0.0, %v2244_v1 }
0x11c1   :  { %v2245_v38 = vmul.f32 0.3275911, %v2242_v56  ;;  %v2243_v3 = vand.u32 2147483647, %v6666_v59  ;;  %v2284_v25 = vsub.f32 0.0, %v2242_v56  ;;  %vm2303_vm11 = vcmp.ge.f32.partialorder %v6666_v59, 0.0 }
0x11c2   :  { %v2250_v4 = vadd.f32 1.0, %v2247_v51  ;;  %v2289_v21 = vmul.f32 %v2286_v62, %v2244_v1 }
0x11c3   :  { %v2248_v5 = vadd.f32 1.0, %v2245_v38  ;;  %v2246_v10 = vmul.f32 0.3275911, %v2243_v3  ;;  %v2285_v31 = vsub.f32 0.0, %v2243_v3  ;;  %v2287_v6 = vmul.f32 %v2284_v25, %v2242_v56 }
0x11c4   :  { %5827 = vrcp.f32 %v2250_v4  ;;  %v2294_v15 = vmul.f32 1.442695, %v2289_v21 }
0x11c5   :  { %5829 = vrcp.f32 %v2248_v5  ;;  %v2249_v16 = vadd.f32 1.0, %v2246_v10  ;;  %v2288_v18 = vmul.f32 %v2285_v31, %v2243_v3  ;;  %v2290_v29 = vmul.f32 1.442695, %v2287_v6 }
0x11c7   :  { %5831 = vrcp.f32 %v2249_v16  ;;  %v2292_v47 = vmul.f32 1.442695, %v2288_v18 }
0x11c8   :  { %5833 = vpow2.f32 %v2294_v15 }
0x11c9   :  { %5835 = vpow2.f32 %v2290_v29 }
0x11ca   :  { %5837 = vpow2.f32 %v2292_v47 }
0x11ce   :  { %v5828_v41 = vpop.eup %5827 }
0x11cf   :  { %v5830_v60 = vpop.eup %5829  ;;  %v2259_v57 = vmul.f32 1.0614054, %v5828_v41 }
0x11d0   :  { %v2257_v43 = vmul.f32 1.0614054, %v5830_v60 }
0x11d1   :  { %v2262_v34 = vadd.f32 -1.4531521, %v2259_v57  ;;  %v5832_v28 = vpop.eup %5831  ;;  %v2238_v57 = vmul.f32 0.5, %v6649_v20 }
0x11d2   :  { %v2260_v7 = vadd.f32 -1.4531521, %v2257_v43  ;;  %v2258_v2 = vmul.f32 1.0614054, %v5832_v28  ;;  %v5834_v22 = vpop.eup %5833  ;;  %v2236_v43 = vmul.f32 0.5, %v6652_v55 }
0x11d3   :  { %v2265_v30 = vmul.f32 %v5828_v41, %v2262_v34  ;;  %v5836_v49 = vpop.eup %5835  ;;  %v2237_v34 = vmul.f32 0.5, %v6661_v61 }
0x11d4   :  { %v2263_v9 = vmul.f32 %v5830_v60, %v2260_v7  ;;  %v2261_v42 = vadd.f32 -1.4531521, %v2258_v2  ;;  %v5838_v3 = vpop.eup %5837 }
0x11d5   :  { %v2268_v11 = vadd.f32 1.4214138, %v2265_v30 }
0x11d6   :  { %v2266_v35 = vadd.f32 1.4214138, %v2263_v9  ;;  %v2264_v26 = vmul.f32 %v5832_v28, %v2261_v42 }
0x11d7   :  { %v2271_v45 = vmul.f32 %v5828_v41, %v2268_v11 }
0x11d8   :  { %v2269_v39 = vmul.f32 %v5830_v60, %v2266_v35  ;;  %v2267_v36 = vadd.f32 1.4214138, %v2264_v26 }
0x11d9   :  { %v2274_v32 = vadd.f32 -0.28449672, %v2271_v45 }
0x11da   :  { %v2272_v48 = vadd.f32 -0.28449672, %v2269_v39  ;;  %v2270_v12 = vmul.f32 %v5832_v28, %v2267_v36 }
0x11db   :  { %v2277_v46 = vmul.f32 %v5828_v41, %v2274_v32 }
0x11dc   :  { %v2275_v33 = vmul.f32 %v5830_v60, %v2272_v48  ;;  %v2273_v44 = vadd.f32 -0.28449672, %v2270_v12 }
0x11dd   :  { %v2280_v14 = vadd.f32 0.2548296, %v2277_v46 }
0x11de   :  { %v2278_v17 = vadd.f32 0.2548296, %v2275_v33  ;;  %v2276_v54 = vmul.f32 %v5832_v28, %v2273_v44 }
0x11df   :  { %v2283_v13 = vmul.f32 %v5828_v41, %v2280_v14 }
0x11e0   :  { %v2281_v23 = vmul.f32 %v5830_v60, %v2278_v17  ;;  %v2279_v1 = vadd.f32 0.2548296, %v2276_v54 }
0x11e1   :  { %v2298_v37 = vmul.f32 %v5834_v22, %v2283_v13 }
0x11e2   :  { %v2296_v56 = vmul.f32 %v5836_v49, %v2281_v23  ;;  %v2282_v38 = vmul.f32 %v5832_v28, %v2279_v1 }
0x11e3   :  { %v2301_v51 = vsub.f32 1.0, %v2298_v37 }
0x11e4   :  { %v2299_v4 = vsub.f32 1.0, %v2296_v56  ;;  %v2297_v10 = vmul.f32 %v5838_v3, %v2282_v38 }
0x11e5   :  { %v2307_v5 = vsub.f32 0.0, %v2301_v51 }
0x11e6   :  { %v2305_v16 = vsub.f32 0.0, %v2299_v4  ;;  %v2300_v25 = vsub.f32 1.0, %v2297_v10 }
0x11e7   :  { %v2310_v62 = vsel %vm2304_vm6, %v2301_v51, %v2307_v5 }
0x11e8   :  { %v2308_v41 = vsel %vm2302_vm7, %v2299_v4, %v2305_v16  ;;  %v2313_v21 = vadd.f32 1.0, %v2310_v62  ;;  %v2306_v31 = vsub.f32 0.0, %v2300_v25 }
0x11e9   :  { %v2311_v60 = vadd.f32 1.0, %v2308_v41 }
0x11ea   :  { %v2309_v6 = vsel %vm2303_vm11, %v2300_v25, %v2306_v31  ;;  %v2316_v50 = vmul.f32 %v2313_v21, %v2238_v57 }
0x11eb   :  { %v2312_v28 = vadd.f32 1.0, %v2309_v6  ;;  %v2314_v15 = vmul.f32 %v2311_v60, %v2236_v43 }
0x11ec   :  { %v2318_v53 = vpack.c.bf16 %v2316_v50, %v2316_v50 }
0x11ed   :  { %v2315_v7 = vmul.f32 %v2312_v28, %v2237_v34 }
0x11ef   :  { %v2317_v18 = vpack.c.bf16 %v2315_v7, %v2314_v15 }
0x11f1   :  { %5336 = vmatprep.mubr.bf16.mxu0 %v2317_v18 }
0x11f2   :  { %5337 = vmatmul.mubr.bf16.vlgmr.msra.gmra.mrb[52].mxu0 %v2318_v53 }
0x1209   :  { %v5346_v30 = vpop.f32.mrb[48].mxu1 }
0x120a   :  { %v2608_v29 = vmul.f32 0.5, %v5346_v30  ;;  %v2536_v2 = vpop.f32.mrb[49].mxu1 }
0x120b   :  { %v2606_v9 = vmul.f32 0.5, %v2536_v2  ;;  %v5347_v59 = vpop.f32.mrb[50].mxu1 }
0x120c   :  { %vm2614_vm14 = vcmp.ge.f32.partialorder %v2608_v29, 1.0  ;;  %v2539_v20 = vpop.f32.mrb[51].mxu1 }
0x120d   :  { %v4810_v11 = vsel %vm2614_vm14, 1.0, %v6005_v52  ;;  %vm2612_vm15 = vcmp.ge.f32.partialorder %v2606_v9, 1.0  ;;  %v2607_v55 = vmul.f32 0.5, %v2539_v20  ;;  %v6676_v61 = vsel %vm2614_vm14, 0.0, %v2608_v29 }
0x120e   :  { %v6678_v42 = vpack.c.bf16 %v4810_v11, %v4810_v11  ;;  %v6680_v35 = vsel %vm2612_vm15, 0.0, %v2606_v9  ;;  %v4808_v47 = vsel %vm2612_vm15, 1.0, %v6005_v52 }
0x120f   :  { %vm2613_vm0 = vcmp.ge.f32.partialorder %v2607_v55, 1.0 }
0x1210   :  { %v4809_v45 = vsel %vm2613_vm0, 1.0, %v6005_v52  ;;  %2648 = vrot.lane.b32.xlu1 %v6678_v42, %s6007_s13  ;;  %v6686_v26 = vsel %vm2613_vm0, 0.0, %v2607_v55 }
0x1211   :  { %v6688_v39 = vpack.c.bf16 %v4809_v45, %v4808_v47 }
0x1213   :  { %2646 = vrot.lane.b32.xlu0 %v6688_v39, %s6007_s13  ;;  %5360 = vmatprep.mubr.msk.bf16.mxu0 %vm363_vm5, %v6688_v39 }
0x1214   :  { %2738 = vrot.lane.b32.xlu1 %v6678_v42, %s6006_s12 }
0x1282   :  { %v2649_v48 = vpop.permute.xlu1 %2648 }
0x1283   :  { %v2660_v46 = vsel %vm363_vm5, %v2649_v48, 0 }
0x1285   :  { %v2647_v32 = vpop.permute.xlu0 %2646 }
0x1286   :  { %v2657_v36 = vsel %vm363_vm5, %v2647_v32, 0  ;;  %5580 = vmatprep.subr.msk.bf16.mxu0 %vm363_vm5, %v2647_v32 }
0x1287   :  { %5357 = vmatpush3.bf16.xpose.msra.mxu0 %v2657_v36 }
0x1288   :  { %5581 = vmatprep.subr.msk.bf16.mxu0 %vm363_vm5, %v2649_v48 }
0x128f   :  { %5359 = vmatpush3.bf16.xpose.msra.mxu0 %v2660_v46 }
0x1296   :  { %5361 = vmatmul.mubr.msk.bf16.vlgmr.msra.gmra.mrb[56].mxu0 %vm363_vm5, %v6678_v42 }
0x12c5   :  { %v5338_v12 = vpop.f32.mrb[52].mxu0 }
0x12c6   :  { %v6703_v33 = vadd.f32 %v5338_v12, %v6601_v24  ;;  %v2353_v14 = vpop.f32.mrb[53].mxu0 }
0x12c7   :  { %v6706_v44 = vadd.f32 %v6601_v24, %v2353_v14  ;;  %v5339_v17 = vpop.f32.mrb[54].mxu0 }
0x12c8   :  { %v6709_v13 = vmul.f32 0.70710677, %v6703_v33  ;;  %v2356_v54 = vpop.f32.mrb[55].mxu0 }
0x12c9   :  { %v6712_v22 = vmul.f32 0.70710677, %v6706_v44  ;;  %v6715_v23 = vadd.f32 %v6601_v24, %v2356_v54 }
0x12ca   :  { %v2375_v49 = vand.u32 2147483647, %v6709_v13  ;;  %vm2435_vm2 = vcmp.ge.f32.partialorder %v6709_v13, 0.0 }
0x12cb   :  { %v2373_v37 = vand.u32 2147483647, %v6712_v22  ;;  %v6720_v1 = vmul.f32 0.70710677, %v6715_v23  ;;  %vm2433_vm3 = vcmp.ge.f32.partialorder %v6712_v22, 0.0  ;;  %v2368_v13 = vmul.f32 0.5, %v6715_v23 }
0x12cc   :  { %v2378_v56 = vmul.f32 0.3275911, %v2375_v49  ;;  %v2417_v24 = vsub.f32 0.0, %v2375_v49 }
0x12cd   :  { %v2376_v51 = vmul.f32 0.3275911, %v2373_v37  ;;  %v2374_v38 = vand.u32 2147483647, %v6720_v1  ;;  %v2415_v16 = vsub.f32 0.0, %v2373_v37  ;;  %vm2434_vm4 = vcmp.ge.f32.partialorder %v6720_v1, 0.0 }
0x12ce   :  { %v2381_v3 = vadd.f32 1.0, %v2378_v56  ;;  %v2420_v25 = vmul.f32 %v2417_v24, %v2375_v49 }
0x12cf   :  { %v2379_v4 = vadd.f32 1.0, %v2376_v51  ;;  %v2377_v5 = vmul.f32 0.3275911, %v2374_v38  ;;  %v2416_v41 = vsub.f32 0.0, %v2374_v38  ;;  %v2418_v60 = vmul.f32 %v2415_v16, %v2373_v37 }
0x12d0   :  { %5839 = vrcp.f32 %v2381_v3  ;;  %v2425_v34 = vmul.f32 1.442695, %v2420_v25 }
0x12d1   :  { %5841 = vrcp.f32 %v2379_v4  ;;  %v2380_v10 = vadd.f32 1.0, %v2377_v5  ;;  %v2419_v50 = vmul.f32 %v2416_v41, %v2374_v38  ;;  %v2421_v7 = vmul.f32 1.442695, %v2418_v60 }
0x12d3   :  { %5843 = vrcp.f32 %v2380_v10  ;;  %v2423_v9 = vmul.f32 1.442695, %v2419_v50 }
0x12d4   :  { %5845 = vpow2.f32 %v2425_v34 }
0x12d5   :  { %5847 = vpow2.f32 %v2421_v7 }
0x12d6   :  { %5849 = vpow2.f32 %v2423_v9 }
0x12da   :  { %v5840_v62 = vpop.eup %5839 }
0x12db   :  { %v5842_v21 = vpop.eup %5841  ;;  %v2390_v31 = vmul.f32 1.0614054, %v5840_v62 }
0x12dc   :  { %v2388_v57 = vmul.f32 1.0614054, %v5842_v21 }
0x12dd   :  { %v2393_v6 = vadd.f32 -1.4531521, %v2390_v31  ;;  %v5844_v43 = vpop.eup %5843 }
0x12de   :  { %v2391_v28 = vadd.f32 -1.4531521, %v2388_v57  ;;  %v2389_v18 = vmul.f32 1.0614054, %v5844_v43  ;;  %v5846_v49 = vpop.eup %5845 }
0x12df   :  { %v2396_v15 = vmul.f32 %v5840_v62, %v2393_v6  ;;  %v5848_v56 = vpop.eup %5847 }
0x12e0   :  { %v2394_v53 = vmul.f32 %v5842_v21, %v2391_v28  ;;  %v2392_v29 = vadd.f32 -1.4531521, %v2389_v18  ;;  %v5850_v10 = vpop.eup %5849  ;;  %v2367_v28 = vmul.f32 0.5, %v6706_v44 }
0x12e1   :  { %v2399_v30 = vadd.f32 1.4214138, %v2396_v15 }
0x12e2   :  { %v2397_v2 = vadd.f32 1.4214138, %v2394_v53  ;;  %v2395_v20 = vmul.f32 %v5844_v43, %v2392_v29 }
0x12e3   :  { %v2402_v59 = vmul.f32 %v5840_v62, %v2399_v30 }
0x12e4   :  { %v2400_v11 = vmul.f32 %v5842_v21, %v2397_v2  ;;  %v2398_v47 = vadd.f32 1.4214138, %v2395_v20 }
0x12e5   :  { %v2405_v55 = vadd.f32 -0.28449672, %v2402_v59 }
0x12e6   :  { %v2403_v45 = vadd.f32 -0.28449672, %v2400_v11  ;;  %v2401_v36 = vmul.f32 %v5844_v43, %v2398_v47 }
0x12e7   :  { %v2408_v32 = vmul.f32 %v5840_v62, %v2405_v55 }
0x12e8   :  { %v2406_v48 = vmul.f32 %v5842_v21, %v2403_v45  ;;  %v2404_v12 = vadd.f32 -0.28449672, %v2401_v36 }
0x12e9   :  { %v2411_v46 = vadd.f32 0.2548296, %v2408_v32 }
0x12ea   :  { %v2409_v14 = vadd.f32 0.2548296, %v2406_v48  ;;  %v2407_v54 = vmul.f32 %v5844_v43, %v2404_v12 }
0x12eb   :  { %v2414_v17 = vmul.f32 %v5840_v62, %v2411_v46 }
0x12ec   :  { %v2412_v37 = vmul.f32 %v5842_v21, %v2409_v14  ;;  %v2410_v38 = vadd.f32 0.2548296, %v2407_v54  ;;  %v2369_v21 = vmul.f32 0.5, %v6703_v33 }
0x12ed   :  { %v2429_v51 = vmul.f32 %v5846_v49, %v2414_v17 }
0x12ee   :  { %v2427_v3 = vmul.f32 %v5848_v56, %v2412_v37  ;;  %v2413_v5 = vmul.f32 %v5844_v43, %v2410_v38 }
0x12ef   :  { %v2432_v4 = vsub.f32 1.0, %v2429_v51 }
0x12f0   :  { %v2430_v24 = vsub.f32 1.0, %v2427_v3  ;;  %v2428_v25 = vmul.f32 %v5850_v10, %v2413_v5 }
0x12f1   :  { %v2438_v16 = vsub.f32 0.0, %v2432_v4 }
0x12f2   :  { %v2436_v41 = vsub.f32 0.0, %v2430_v24  ;;  %v2431_v62 = vsub.f32 1.0, %v2428_v25 }
0x12f3   :  { %v2441_v31 = vsel %vm2435_vm2, %v2432_v4, %v2438_v16  ;;  %v2739_v16 = vpop.permute.xlu1 %2738  ;;  %vm4618_vm2 = vcmask 254976  }
0x12f4   :  { %v2444_v60 = vadd.f32 1.0, %v2441_v31  ;;  %v2439_v57 = vsel %vm2433_vm3, %v2430_v24, %v2436_v41  ;;  %v2437_v34 = vsub.f32 0.0, %v2431_v62 }
0x12f5   :  { %v2442_v6 = vadd.f32 1.0, %v2439_v57 }
0x12f6   :  { %v2447_v43 = vmul.f32 %v2444_v60, %v2369_v21  ;;  %v2440_v50 = vsel %vm2434_vm4, %v2431_v62, %v2437_v34  ;;  %v2748_v62 = vand.u32 %v2739_v16, %v6141_v8 }
0x12f7   :  { %v2445_v15 = vmul.f32 %v2442_v6, %v2367_v28  ;;  %v2443_v7 = vadd.f32 1.0, %v2440_v50 }
0x12f8   :  { %v6730_v22 = vadd.f32 %v2447_v43, %v6583_v27 }
0x12f9   :  { %v2446_v18 = vmul.f32 %v2443_v7, %v2368_v13  ;;  %v6733_v53 = vadd.f32 %v2445_v15, %v6586_v58 }
0x12fa   :  { %v2551_v1 = vpack.c.bf16 %v6730_v22, %v6730_v22 }
0x12fb   :  { %v6736_v33 = vadd.f32 %v2446_v18, %v6589_v0 }
0x12fd   :  { %v2550_v44 = vpack.c.bf16 %v6736_v33, %v6733_v53 }
0x12ff   :  { %5352 = vmatprep.mubr.msk.bf16.mxu1 %vm208_vm1, %v2550_v44 }
0x1300   :  { %5353 = vmatmul.mubr.msk.bf16.vlgmr.msra.gmra.mrb[52].mxu1 %vm208_vm1, %v2551_v1 }
0x1369   :  { %v5362_v23 = vpop.f32.mrb[56].mxu0 }
0x136a   :  { %v2712_v30 = vmul.f32 0.35355338, %v5362_v23  ;;  %v2696_v27 = vpop.f32.mrb[57].mxu0 }
0x136b   :  { %v2710_v29 = vmul.f32 0.35355338, %v2696_v27  ;;  %v5363_v2 = vpop.f32.mrb[58].mxu0 }
0x136c   :  { %v2717_v58 = vmul.f32 1.442695, %v2712_v30  ;;  %v2699_v9 = vpop.f32.mrb[59].mxu0 }
0x136d   :  { %v2713_v59 = vmul.f32 1.442695, %v2710_v29  ;;  %v2711_v0 = vmul.f32 0.35355338, %v2699_v9 }
0x136e   :  { %5851 = vpow2.f32 %v2717_v58 }
0x136f   :  { %v2715_v20 = vmul.f32 1.442695, %v2711_v0  ;;  %5853 = vpow2.f32 %v2713_v59 }
0x1371   :  { %5855 = vpow2.f32 %v2715_v20 }
0x1378   :  { %v5852_v11 = vpop.eup %5851 }
0x1379   :  { %v2725_v55 = vsel %vm440_vm9, %v5852_v11, 0.0  ;;  %v5854_v47 = vpop.eup %5853 }
0x137a   :  { %2726 = vadd.xlane.f32.xlu0 %v2725_v55  ;;  %v2719_v36 = vsel %vm433_vm10, %v5854_v47, 0.0 }
0x137b   :  { %v5856_v45 = vpop.eup %5855 }
0x137c   :  { %v2722_v32 = vsel %vm433_vm10, %v5856_v45, 0.0 }
0x137d   :  { %2723 = vadd.xlane.f32.xlu1 %v2722_v32 }
0x137e   :  { %2720 = vadd.xlane.f32.xlu0 %v2719_v36 }
0x138e   :  { %2802 = vrot.lane.b32.xlu1 %v6688_v39, %s6010_s15 }
0x1392   :  { %2798 = vrot.lane.b32.xlu1 %v6688_v39, %s6009_s14 }
0x1394   :  { %2736 = vrot.lane.b32.xlu0 %v6688_v39, %s6006_s12 }
0x1396   :  { %2892 = vrot.lane.b32.xlu1 %v6688_v39, %s6011_s16 }
0x1398   :  { %2804 = vrot.lane.b32.xlu0 %v6678_v42, %s6010_s15 }
0x139c   :  { %2800 = vrot.lane.b32.xlu0 %v6678_v42, %s6009_s14 }
0x13d3   :  { %v5354_v48 = vpop.f32.mrb[52].mxu1 }
0x13d4   :  { %v2626_v46 = vsub.f32 %v5354_v48, %v6676_v61  ;;  %v2592_v12 = vpop.f32.mrb[53].mxu1 }
0x13d5   :  { %v2624_v14 = vsub.f32 %v2592_v12, %v6680_v35  ;;  %v5355_v17 = vpop.f32.mrb[54].mxu1 }
0x13d6   :  { %v2629_v54 = vmul.f32 0.5, %v2626_v46  ;;  %v2595_v49 = vpop.f32.mrb[55].mxu1 }
0x13d7   :  { %v2627_v37 = vmul.f32 0.5, %v2624_v14  ;;  %v2625_v56 = vsub.f32 %v2595_v49, %v6686_v26 }
0x13d8   :  { %v6763_v51 = vadd.f32 %v2629_v54, %v6676_v61 }
0x13d9   :  { %v2630_v38 = vadd.f32 %v2627_v37, %v6680_v35  ;;  %v2628_v3 = vmul.f32 0.5, %v2625_v56 }
0x13da   :  { %vm2635_vm11 = vcmp.ge.f32.partialorder %v6763_v51, 1.0 }
0x13db   :  { %vm2633_vm6 = vcmp.ge.f32.partialorder %v2630_v38, 1.0  ;;  %v2631_v4 = vadd.f32 %v2628_v3, %v6686_v26 }
0x13dc   :  { %v4811_v5 = vsel %vm2633_vm6, 1.0, %v6005_v52 }
0x13dd   :  { %vm2634_vm7 = vcmp.ge.f32.partialorder %v2631_v4, 1.0 }
0x13de   :  { %v4812_v10 = vsel %vm2634_vm7, 1.0, %v6005_v52 }
0x13df   :  { %v6769_v24 = vpack.c.bf16 %v4812_v10, %v4811_v5 }
0x1407   :  { %v2727_v25 = vpop.xlane.xlu0 %2726 }
0x1408   :  { %5857 = vrcp.f32 %v2727_v25 }
0x140a   :  { %v2724_v41 = vpop.xlane.xlu1 %2723 }
0x140b   :  { %5859 = vrcp.f32 %v2724_v41  ;;  %v2721_v61 = vpop.xlane.xlu0 %2720 }
0x140c   :  { %5861 = vrcp.f32 %v2721_v61 }
0x140e   :  { %v2803_v31 = vpop.permute.xlu1 %2802 }
0x140f   :  { %v2737_v35 = vpop.permute.xlu0 %2736  ;;  %v2813_v13 = vsel %vm363_vm5, %v2803_v31, 0 }
0x1410   :  { %5364 = vmatprep.subr.bf16.mxu1 %v2737_v35 }
0x1411   :  { %5365 = vmatpush3.bf16.msra.mxu1 %v2737_v35 }
0x1412   :  { %5366 = vmatprep.subr.bf16.mxu1 %v2748_v62  ;;  %v2799_v26 = vpop.permute.xlu1 %2798  ;;  %v5858_v60 = vpop.eup %5857 }
0x1413   :  { %v2733_v6 = vmul.f32 %v5858_v60, %v5852_v11  ;;  %v2805_v7 = vpop.permute.xlu0 %2804 }
0x1414   :  { %v2816_v18 = vsel %vm363_vm5, %v2805_v7, 0 }
0x1415   :  { %v5860_v57 = vpop.eup %5859  ;;  %5367 = vmatpush3.bf16.msra.mxu1 %v2748_v62  ;;  %v2735_v15 = vpack.c.bf16 %v2733_v6, %v2733_v6 }
0x1416   :  { %v5862_v21 = vpop.eup %5861  ;;  %5582 = vmatprep.subr.msk.bf16.mxu1 %vm363_vm5, %v2803_v31  ;;  %v2893_v34 = vpop.permute.xlu1 %2892  ;;  %v2732_v28 = vmul.f32 %v5860_v57, %v5856_v45 }
0x1417   :  { %5380 = vmatprep.subr.bf16.mxu0 %v2893_v34  ;;  %v2731_v43 = vmul.f32 %v5862_v21, %v5854_v47  ;;  %v2801_v44 = vpop.permute.xlu0 %2800 }
0x1418   :  { %5381 = vmatpush3.bf16.msra.mxu0 %v2893_v34 }
0x1419   :  { %v2734_v50 = vpack.c.bf16 %v2732_v28, %v2731_v43 }
0x141b   :  { %5368 = vmatprep.mubr.msk.bf16.mxu1 %vm433_vm10, %v2734_v50 }
0x141c   :  { %5369 = vmatmul.mubr.msk.bf16.vlgmr.msra.gmra.mrb[56].mxu1 %vm433_vm10, %v2735_v15 }
0x141d   :  { %5376 = vmatprep.mubr.msk.bf16.mxu1 %vm363_vm5, %v2799_v26 }
0x141e   :  { %5373 = vmatpush3.bf16.xpose.msra.mxu1 %v2813_v13 }
0x141f   :  { %5583 = vmatprep.subr.msk.bf16.mxu1 %vm363_vm5, %v2805_v7 }
0x1426   :  { %5375 = vmatpush3.bf16.xpose.msra.mxu1 %v2816_v18 }
0x142d   :  { %5377 = vmatmul.mubr.msk.bf16.vlgmr.msra.gmra.mrb[60].mxu1 %vm363_vm5, %v2801_v44 }
0x14ef   :  { %v6780_v1 = vpop.f32.mrb[56].mxu1 }
0x14f0   :  { %v6782_v23 = vpop.f32.mrb[57].mxu1 }
0x14f1   :  { %v5371_v30 = vpop.f32.mrb[58].mxu1 }
0x14f2   :  { %v6784_v27 = vpop.f32.mrb[59].mxu1 }
0x1500   :  { %v5378_v29 = vpop.f32.mrb[60].mxu1 }
0x1501   :  { %v2868_v2 = vmul.f32 0.35355338, %v5378_v29  ;;  %v2852_v58 = vpop.f32.mrb[61].mxu1 }
0x1502   :  { %v2866_v9 = vmul.f32 0.35355338, %v2852_v58  ;;  %v5379_v59 = vpop.f32.mrb[62].mxu1 }
0x1503   :  { %v2873_v0 = vmul.f32 1.442695, %v2868_v2  ;;  %v2855_v20 = vpop.f32.mrb[63].mxu1 }
0x1504   :  { %v2869_v11 = vmul.f32 1.442695, %v2866_v9  ;;  %v2867_v55 = vmul.f32 0.35355338, %v2855_v20 }
0x1505   :  { %5863 = vpow2.f32 %v2873_v0 }
0x1506   :  { %5865 = vpow2.f32 %v2869_v11  ;;  %v2871_v47 = vmul.f32 1.442695, %v2867_v55  ;;  %v4813_v11 = vsel %vm2635_vm11, 1.0, %v6005_v52 }
0x1507   :  { %v6835_v55 = vpack.c.bf16 %v4813_v11, %v4813_v11 }
0x1508   :  { %5867 = vpow2.f32 %v2871_v47 }
0x150f   :  { %v5864_v45 = vpop.eup %5863 }
0x1510   :  { %v5866_v32 = vpop.eup %5865  ;;  %v2881_v36 = vsel %vm440_vm9, %v5864_v45, 0.0 }
0x1511   :  { %2882 = vadd.xlane.f32.xlu0 %v2881_v36  ;;  %v2875_v48 = vsel %vm433_vm10, %v5866_v32, 0.0 }
0x1512   :  { %v5868_v46 = vpop.eup %5867  ;;  %2876 = vadd.xlane.f32.xlu1 %v2875_v48 }
0x1513   :  { %v2878_v12 = vsel %vm433_vm10, %v5868_v46, 0.0 }
0x1515   :  { %2879 = vadd.xlane.f32.xlu0 %v2878_v12 }
0x1523   :  { %2958 = vrot.lane.b32.xlu1 %v6688_v39, %s6012_s17 }
0x1527   :  { %2960 = vrot.lane.b32.xlu1 %v6678_v42, %s6012_s17 }
0x152b   :  { %2956 = vrot.lane.b32.xlu1 %v6678_v42, %s6013_s18  ;;  %2894 = vrot.lane.b32.xlu0 %v6678_v42, %s6011_s16 }
0x152f   :  { %3050 = vrot.lane.b32.xlu1 %v6678_v42, %s6014_s19  ;;  %2954 = vrot.lane.b32.xlu0 %v6688_v39, %s6013_s18 }
0x159e   :  { %v2883_v14 = vpop.xlane.xlu0 %2882 }
0x159f   :  { %v2877_v17 = vpop.xlane.xlu1 %2876  ;;  %5869 = vrcp.f32 %v2883_v14 }
0x15a0   :  { %5871 = vrcp.f32 %v2877_v17 }
0x15a2   :  { %v2880_v54 = vpop.xlane.xlu0 %2879 }
0x15a3   :  { %5873 = vrcp.f32 %v2880_v54  ;;  %v2959_v38 = vpop.permute.xlu1 %2958 }
0x15a4   :  { %v2969_v61 = vsel %vm363_vm5, %v2959_v38, 0 }
0x15a6   :  { %v2895_v49 = vpop.permute.xlu0 %2894 }
0x15a7   :  { %v2904_v37 = vand.u32 %v2895_v49, %v6141_v8  ;;  %v2961_v35 = vpop.permute.xlu1 %2960 }
0x15a8   :  { %v2972_v62 = vsel %vm363_vm5, %v2961_v35, 0 }
0x15a9   :  { %5382 = vmatprep.subr.bf16.mxu0 %v2904_v37  ;;  %v5870_v56 = vpop.eup %5869 }
0x15aa   :  { %5383 = vmatpush3.bf16.msra.mxu0 %v2904_v37  ;;  %v5872_v3 = vpop.eup %5871  ;;  %v2889_v5 = vmul.f32 %v5870_v56, %v5864_v45  ;;  %v2955_v31 = vpop.permute.xlu0 %2954 }
0x15ab   :  { %5584 = vmatprep.subr.msk.bf16.mxu0 %vm363_vm5, %v2959_v38  ;;  %v2887_v10 = vmul.f32 %v5872_v3, %v5866_v32  ;;  %v2957_v26 = vpop.permute.xlu1 %2956 }
0x15ac   :  { %v2891_v41 = vpack.c.bf16 %v2889_v5, %v2889_v5 }
0x15ad   :  { %v5874_v4 = vpop.eup %5873 }
0x15ae   :  { %v2888_v16 = vmul.f32 %v5874_v4, %v5868_v46 }
0x15af   :  { %v3051_v47 = vpop.permute.xlu1 %3050 }
0x15b0   :  { %v2890_v25 = vpack.c.bf16 %v2888_v16, %v2887_v10  ;;  %v3060_v48 = vand.u32 %v3051_v47, %v6141_v8 }
0x15b2   :  { %5384 = vmatprep.mubr.msk.bf16.mxu0 %vm433_vm10, %v2890_v25 }
0x15b3   :  { %5385 = vmatmul.mubr.msk.bf16.vlgmr.msra.gmra.mrb[60].mxu0 %vm433_vm10, %v2891_v41 }
0x15b4   :  { %5389 = vmatpush3.bf16.xpose.msra.mxu0 %v2969_v61  ;;  %5392 = vmatprep.mubr.msk.bf16.mxu0 %vm363_vm5, %v2955_v31 }
0x15b5   :  { %5585 = vmatprep.subr.msk.bf16.mxu0 %vm363_vm5, %v2961_v35 }
0x15bc   :  { %5391 = vmatpush3.bf16.xpose.msra.mxu0 %v2972_v62 }
0x15c3   :  { %5393 = vmatmul.mubr.msk.bf16.vlgmr.msra.gmra.mrb[64].mxu0 %vm363_vm5, %v2957_v26 }
0x1686   :  { %v6810_v60 = vpop.f32.mrb[60].mxu0 }
0x1687   :  { %v6812_v57 = vpop.f32.mrb[61].mxu0 }
0x1688   :  { %v5387_v21 = vpop.f32.mrb[62].mxu0 }
0x1689   :  { %v6814_v6 = vpop.f32.mrb[63].mxu0 }
0x168a   :  { %v5644_v34 = vpack.i.bf16 %v6814_v6, %v6812_v57 }
0x1696   :  { %v5394_v28 = vpop.f32.mrb[64].mxu0 }
0x1697   :  { %v3024_v43 = vmul.f32 0.35355338, %v5394_v28  ;;  %v3008_v50 = vpop.f32.mrb[65].mxu0 }
0x1698   :  { %v3022_v15 = vmul.f32 0.35355338, %v3008_v50  ;;  %v5395_v13 = vpop.f32.mrb[66].mxu0 }
0x1699   :  { %v3029_v7 = vmul.f32 1.442695, %v3024_v43  ;;  %v3011_v18 = vpop.f32.mrb[67].mxu0 }
0x169a   :  { %v3025_v44 = vmul.f32 1.442695, %v3022_v15  ;;  %v3023_v30 = vmul.f32 0.35355338, %v3011_v18 }
0x169b   :  { %5875 = vpow2.f32 %v3029_v7 }
0x169c   :  { %v3027_v29 = vmul.f32 1.442695, %v3023_v30  ;;  %5877 = vpow2.f32 %v3025_v44 }
0x169e   :  { %5879 = vpow2.f32 %v3027_v29 }
0x16a5   :  { %v5876_v2 = vpop.eup %5875 }
0x16a6   :  { %v3037_v58 = vsel %vm440_vm9, %v5876_v2, 0.0  ;;  %v5878_v9 = vpop.eup %5877 }
0x16a7   :  { %3038 = vadd.xlane.f32.xlu0 %v3037_v58  ;;  %v3031_v20 = vsel %vm433_vm10, %v5878_v9, 0.0 }
0x16a8   :  { %v5880_v59 = vpop.eup %5879 }
0x16a9   :  { %v3034_v0 = vsel %vm433_vm10, %v5880_v59, 0.0 }
0x16aa   :  { %3035 = vadd.xlane.f32.xlu1 %v3034_v0 }
0x16ab   :  { %3032 = vadd.xlane.f32.xlu0 %v3031_v20 }
0x16bb   :  { %3114 = vrot.lane.b32.xlu1 %v6688_v39, %s6015_s20 }
0x16bf   :  { %3110 = vrot.lane.b32.xlu1 %v6688_v39, %s6016_s21 }
0x16c1   :  { %3048 = vrot.lane.b32.xlu0 %v6688_v39, %s6014_s19 }
0x16c3   :  { %3393 = vrot.lane.b32.xlu1 %v6769_v24, %s6007_s13 }
0x16c5   :  { %3116 = vrot.lane.b32.xlu0 %v6678_v42, %s6015_s20 }
0x16c9   :  { %3112 = vrot.lane.b32.xlu0 %v6678_v42, %s6016_s21 }
0x16cd   :  { %3395 = vrot.lane.b32.xlu0 %v6835_v55, %s6007_s13 }
0x1734   :  { %v3039_v45 = vpop.xlane.xlu0 %3038 }
0x1735   :  { %5881 = vrcp.f32 %v3039_v45 }
0x1737   :  { %v3036_v32 = vpop.xlane.xlu1 %3035 }
0x1738   :  { %5883 = vrcp.f32 %v3036_v32  ;;  %v3033_v36 = vpop.xlane.xlu0 %3032 }
0x1739   :  { %5885 = vrcp.f32 %v3033_v36 }
0x173b   :  { %v3115_v14 = vpop.permute.xlu1 %3114 }
0x173c   :  { %v3049_v51 = vpop.permute.xlu0 %3048  ;;  %v3125_v4 = vsel %vm363_vm5, %v3115_v14, 0 }
0x173d   :  { %5396 = vmatprep.subr.bf16.mxu1 %v3049_v51 }
0x173e   :  { %5397 = vmatpush3.bf16.msra.mxu1 %v3049_v51 }
0x173f   :  { %5398 = vmatprep.subr.bf16.mxu1 %v3060_v48  ;;  %v5882_v46 = vpop.eup %5881  ;;  %v3111_v3 = vpop.permute.xlu1 %3110 }
0x1740   :  { %v3045_v54 = vmul.f32 %v5882_v46, %v5876_v2  ;;  %v3117_v5 = vpop.permute.xlu0 %3116 }
0x1741   :  { %v3128_v10 = vsel %vm363_vm5, %v3117_v5, 0 }
0x1742   :  { %v5884_v12 = vpop.eup %5883  ;;  %5399 = vmatpush3.bf16.msra.mxu1 %v3060_v48  ;;  %v3047_v38 = vpack.c.bf16 %v3045_v54, %v3045_v54 }
0x1743   :  { %v5886_v17 = vpop.eup %5885  ;;  %5586 = vmatprep.subr.msk.bf16.mxu1 %vm363_vm5, %v3115_v14  ;;  %v3044_v49 = vmul.f32 %v5884_v12, %v5880_v59  ;;  %v3394_v16 = vpop.permute.xlu1 %3393 }
0x1744   :  { %v3043_v37 = vmul.f32 %v5886_v17, %v5878_v9  ;;  %v3113_v25 = vpop.permute.xlu0 %3112  ;;  %v3404_v41 = vsel %vm363_vm5, %v3394_v16, 0 }
0x1746   :  { %v3046_v56 = vpack.c.bf16 %v3044_v49, %v3043_v37 }
0x1748   :  { %5400 = vmatprep.mubr.msk.bf16.mxu1 %vm433_vm10, %v3046_v56  ;;  %v3396_v61 = vpop.permute.xlu0 %3395 }
0x1749   :  { %5401 = vmatmul.mubr.msk.bf16.vlgmr.msra.gmra.mrb[64].mxu1 %vm433_vm10, %v3047_v38  ;;  %v3407_v31 = vsel %vm363_vm5, %v3396_v61, 0 }
0x174a   :  { %5408 = vmatprep.mubr.msk.bf16.mxu1 %vm363_vm5, %v3111_v3 }
0x174b   :  { %5405 = vmatpush3.bf16.xpose.msra.mxu1 %v3125_v4 }
0x174c   :  { %5587 = vmatprep.subr.msk.bf16.mxu1 %vm363_vm5, %v3117_v5 }
0x1753   :  { %5407 = vmatpush3.bf16.xpose.msra.mxu1 %v3128_v10 }
0x1754   :  { %5588 = vmatprep.subr.msk.bf16.mxu1 %vm363_vm5, %v3394_v16 }
0x175a   :  { %5409 = vmatmul.mubr.msk.bf16.vlgmr.msra.gmra.mrb[68].mxu1 %vm363_vm5, %v3113_v25 }
0x175b   :  { %5429 = vmatpush3.bf16.xpose.msra.mxu1 %v3404_v41  ;;  %5432 = vmatprep.mubr.msk.bf16.mxu1 %vm363_vm5, %v6769_v24 }
0x175c   :  { %5589 = vmatprep.subr.msk.bf16.mxu1 %vm363_vm5, %v3396_v61 }
0x1763   :  { %5431 = vmatpush3.bf16.xpose.msra.mxu1 %v3407_v31 }
0x176a   :  { %5433 = vmatmul.mubr.msk.bf16.vlgmr.msra.gmra.mrb[72].mxu1 %vm363_vm5, %v6835_v55 }
0x181c   :  { %v5402_v35 = vpop.f32.mrb[64].mxu1 }
0x181d   :  { %v3096_v62 = vpop.f32.mrb[65].mxu1 }
0x181e   :  { %v5403_v26 = vpop.f32.mrb[66].mxu1 }
0x181f   :  { %v3099_v21 = vpop.f32.mrb[67].mxu1 }
0x1820   :  { %v5649_v28 = vpack.i.bf16 %v3099_v21, %v3096_v62  ;;  %v6896_v62 = vld [vmem:[%s7248_s1 + $0xa0] sm:$0xff]  }
0x182d   :  { %v5410_v43 = vpop.f32.mrb[68].mxu1 }
0x182e   :  { %v3180_v50 = vmul.f32 0.35355338, %v5410_v43  ;;  %v3164_v15 = vpop.f32.mrb[69].mxu1 }
0x182f   :  { %v3178_v13 = vmul.f32 0.35355338, %v3164_v15  ;;  %v5411_v7 = vpop.f32.mrb[70].mxu1 }
0x1830   :  { %v3185_v18 = vmul.f32 1.442695, %v3180_v50  ;;  %v3167_v44 = vpop.f32.mrb[71].mxu1 }
0x1831   :  { %v3181_v30 = vmul.f32 1.442695, %v3178_v13  ;;  %v3179_v29 = vmul.f32 0.35355338, %v3167_v44 }
0x1832   :  { %5887 = vpow2.f32 %v3185_v18 }
0x1833   :  { %5889 = vpow2.f32 %v3181_v30  ;;  %v3183_v2 = vmul.f32 1.442695, %v3179_v29 }
0x1835   :  { %5891 = vpow2.f32 %v3183_v2 }
0x183c   :  { %v5888_v58 = vpop.eup %5887 }
0x183d   :  { %v5890_v9 = vpop.eup %5889  ;;  %v5434_v59 = vpop.f32.mrb[72].mxu1  ;;  %v3193_v0 = vsel %vm440_vm9, %v5888_v58, 0.0 }
0x183e   :  { %3194 = vadd.xlane.f32.xlu0 %v3193_v0  ;;  %v3443_v20 = vpop.f32.mrb[73].mxu1  ;;  %v3187_v11 = vsel %vm433_vm10, %v5890_v9, 0.0  ;;  %v3459_v51 = vmul.f32 0.35355338, %v5434_v59 }
0x183f   :  { %v5892_v47 = vpop.eup %5891  ;;  %3188 = vadd.xlane.f32.xlu1 %v3187_v11  ;;  %v5435_v45 = vpop.f32.mrb[74].mxu1  ;;  %v3457_v12 = vmul.f32 0.35355338, %v3443_v20 }
0x1840   :  { %v3446_v32 = vpop.f32.mrb[75].mxu1  ;;  %v3190_v36 = vsel %vm433_vm10, %v5892_v47, 0.0  ;;  %v3464_v46 = vmul.f32 1.442695, %v3459_v51 }
0x1841   :  { %v3458_v48 = vmul.f32 0.35355338, %v3446_v32  ;;  %v3460_v14 = vmul.f32 1.442695, %v3457_v12 }
0x1842   :  { %3191 = vadd.xlane.f32.xlu0 %v3190_v36  ;;  %5893 = vpow2.f32 %v3464_v46 }
0x1850   :  { %3204 = vrot.lane.b32.xlu1 %v6688_v39, %s6017_s22  ;;  %v3462_v39 = vmul.f32 1.442695, %v3458_v48 }
0x1852   :  { %5895 = vpow2.f32 %v3462_v39 }
0x1853   :  { %5897 = vpow2.f32 %v3460_v14 }
0x1854   :  { %3273 = vrot.lane.b32.xlu1 %v6810_v60, %s6018_s23  ;;  %v6871_v60 = vpop.eup %5893 }
0x1855   :  { %v3472_v17 = vsel %vm440_vm9, %v6871_v60, 0.0 }
0x1858   :  { %3206 = vrot.lane.b32.xlu0 %v6678_v42, %s6017_s22  ;;  %5650 = vrot.lane.b32.xlu1 %v5649_v28, %s6019_s24 }
0x185c   :  { %5645 = vrot.lane.b32.xlu0 %v5644_v34, %s6018_s23  ;;  %v6873_v42 = vpop.eup %5895 }
0x185d   :  { %v6877_v57 = vpop.eup %5897  ;;  %v3469_v6 = vsel %vm433_vm10, %v6873_v42, 0.0 }
0x185e   :  { %v3466_v34 = vsel %vm433_vm10, %v6877_v57, 0.0 }
0x1860   :  { %3285 = vrot.lane.b32.xlu0 %v5402_v35, %s6019_s24  ;;  %v6889_v35 = vld [vmem:[%s7248_s1 + $0x98] sm:$0xff]  }
0x187c   :  { %3473 = vadd.xlane.f32.xlu1 %v3472_v17 }
0x187f   :  { %3470 = vadd.xlane.f32.xlu0 %v3469_v6 }
0x1880   :  { %3467 = vadd.xlane.f32.xlu1 %v3466_v34 }
0x18cb   :  { %v3195_v54 = vpop.xlane.xlu0 %3194 }
0x18cc   :  { %v3189_v49 = vpop.xlane.xlu1 %3188  ;;  %5899 = vrcp.f32 %v3195_v54 }
0x18cd   :  { %5901 = vrcp.f32 %v3189_v49 }
0x18cf   :  { %v3192_v37 = vpop.xlane.xlu0 %3191 }
0x18d0   :  { %5903 = vrcp.f32 %v3192_v37  ;;  %v3205_v56 = vpop.permute.xlu1 %3204 }
0x18d1   :  { %5412 = vmatprep.subr.bf16.mxu0 %v3205_v56 }
0x18d2   :  { %5413 = vmatpush3.bf16.msra.mxu0 %v3205_v56 }
0x18d3   :  { %v3207_v38 = vpop.permute.xlu0 %3206 }
0x18d4   :  { %v3216_v3 = vand.u32 %v3207_v38, %v6141_v8  ;;  %v3274_v15 = vpop.permute.xlu1 %3273 }
0x18d5   :  { %v3304_v32 = vsel %vm363_vm5, %v6780_v1, %v3274_v15 }
0x18d6   :  { %5414 = vmatprep.subr.bf16.mxu0 %v3216_v3  ;;  %v5900_v4 = vpop.eup %5899 }
0x18d7   :  { %5415 = vmatpush3.bf16.msra.mxu0 %v3216_v3  ;;  %v5902_v5 = vpop.eup %5901  ;;  %v3201_v16 = vmul.f32 %v5900_v4, %v5888_v58  ;;  %v5646_v13 = vpop.permute.xlu0 %5645 }
0x18d8   :  { %v3199_v25 = vmul.f32 %v5902_v5, %v5890_v9  ;;  %5420 = vmatprep.subr.bf16.mxu0 %v6889_v35  ;;  %v5651_v7 = vpop.permute.xlu1 %5650  ;;  %v5648_v2 = vunpack.i.h.bf16 %v5646_v13  ;;  %v5647_v58 = vunpack.i.l.bf16 %v5646_v13 }
0x18d9   :  { %v3203_v31 = vpack.c.bf16 %v3201_v16, %v3201_v16  ;;  %v5653_v9 = vunpack.i.h.bf16 %v5651_v7  ;;  %v5652_v20 = vunpack.i.l.bf16 %v5651_v7 }
0x18da   :  { %v5904_v10 = vpop.eup %5903  ;;  %v3303_v0 = vsel %vm363_vm5, %v6784_v27, %v5648_v2  ;;  %v3302_v45 = vsel %vm363_vm5, %v6782_v23, %v5647_v58 }
0x18db   :  { %v3200_v41 = vmul.f32 %v5904_v10, %v5892_v47  ;;  %v3286_v44 = vpop.permute.xlu0 %3285  ;;  %v3306_v51 = vsel %vm1024_vm12, %v3303_v0, %v5653_v9  ;;  %v3305_v39 = vsel %vm1024_vm12, %v3302_v45, %v5652_v20 }
0x18dc   :  { %v3307_v48 = vsel %vm1024_vm12, %v3304_v32, %v3286_v44 }
0x18dd   :  { %v3202_v61 = vpack.c.bf16 %v3200_v41, %v3199_v25 }
0x18df   :  { %5416 = vmatprep.mubr.msk.bf16.mxu0 %vm433_vm10, %v3202_v61 }
0x18e0   :  { %5417 = vmatmul.mubr.msk.bf16.vlgmr.msra.gmra.mrb[68].mxu0 %vm433_vm10, %v3203_v31 }
0x18e1   :  { %5421 = vmatpush3.bf16.msra.mxu0 %v6889_v35 }
0x18e2   :  { %5422 = vmatprep.subr.bf16.mxu0 %v6896_v62 }
0x18e5   :  { %5423 = vmatpush3.bf16.msra.mxu0 %v6896_v62 }
0x1909   :  { %v3474_v18 = vpop.xlane.xlu1 %3473 }
0x190c   :  { %v3471_v30 = vpop.xlane.xlu0 %3470 }
0x190d   :  { %v3468_v29 = vpop.xlane.xlu1 %3467  ;;  %5905 = vrcp.f32 %v3471_v30 }
0x190e   :  { %5907 = vrcp.f32 %v3468_v29 }
0x190f   :  { %5909 = vrcp.f32 %v3474_v18 }
0x1917   :  { %v5906_v59 = vpop.eup %5905 }
0x1918   :  { %v5908_v47 = vpop.eup %5907  ;;  %v3479_v17 = vmul.f32 %v5906_v59, %v6873_v42 }
0x1919   :  { %v3478_v14 = vmul.f32 %v5908_v47, %v6877_v57  ;;  %v5910_v37 = vpop.eup %5909 }
0x191a   :  { %v3480_v42 = vmul.f32 %v5910_v37, %v6871_v60 }
0x191b   :  { %v3481_v56 = vpack.c.bf16 %v3479_v17, %v3478_v14 }
0x191c   :  { %v3482_v4 = vpack.c.bf16 %v3480_v42, %v3480_v42 }
0x19b3   :  { %v5418_v26 = vpop.f32.mrb[68].mxu0 }
0x19b4   :  { %v3252_v21 = vpop.f32.mrb[69].mxu0  ;;  %3297 = vrot.lane.b32.xlu0 %v5418_v26, %s6020_s29 }
0x19b5   :  { %v5419_v28 = vpop.f32.mrb[70].mxu0 }
0x19b6   :  { %v3255_v43 = vpop.f32.mrb[71].mxu0 }
0x19b7   :  { %v5654_v50 = vpack.i.bf16 %v3255_v43, %v3252_v21 }
0x19b8   :  { %3485 = vrot.lane.b32.xlu0 %v6835_v55, %s6006_s12 }
0x19b9   :  { %5655 = vrot.lane.b32.xlu1 %v5654_v50, %s6020_s29 }
0x19bc   :  { %3551 = vrot.lane.b32.xlu0 %v6835_v55, %s6010_s15 }
0x19bd   :  { %3483 = vrot.lane.b32.xlu1 %v6769_v24, %s6006_s12 }
0x19c0   :  { %3547 = vrot.lane.b32.xlu0 %v6835_v55, %s6009_s14 }
0x19c1   :  { %3549 = vrot.lane.b32.xlu1 %v6769_v24, %s6010_s15 }
0x19c5   :  { %3545 = vrot.lane.b32.xlu1 %v6769_v24, %s6009_s14 }
0x19c9   :  { %3639 = vrot.lane.b32.xlu1 %v6769_v24, %s6011_s16 }
0x1a26   :  { %v3298_v11 = vpop.permute.xlu0 %3297 }
0x1a27   :  { %v3310_v27 = vsel %vm1028_vm13, %v3307_v48, %v3298_v11 }
0x1a28   :  { %v3312_v49 = vpack.c.bf16 %v3310_v27, %v3310_v27 }
0x1a2a   :  { %v3486_v1 = vpop.permute.xlu0 %3485 }
0x1a2b   :  { %v5656_v36 = vpop.permute.xlu1 %5655  ;;  %v3495_v38 = vand.u32 %v3486_v1, %v6141_v8 }
0x1a2c   :  { %v5658_v46 = vunpack.i.h.bf16 %v5656_v36  ;;  %v5657_v12 = vunpack.i.l.bf16 %v5656_v36 }
0x1a2e   :  { %v3309_v23 = vsel %vm1028_vm13, %v3306_v51, %v5658_v46  ;;  %v3308_v6 = vsel %vm1028_vm13, %v3305_v39, %v5657_v12  ;;  %v3552_v16 = vpop.permute.xlu0 %3551 }
0x1a2f   :  { %v3311_v34 = vpack.c.bf16 %v3309_v23, %v3308_v6  ;;  %v3484_v54 = vpop.permute.xlu1 %3483  ;;  %v3563_v60 = vsel %vm363_vm5, %v3552_v16, 0 }
0x1a30   :  { %5436 = vmatprep.subr.bf16.mxu0 %v3484_v54 }
0x1a31   :  { %5424 = vmatprep.mubr.msk.bf16.mxu0 %vm208_vm1, %v3311_v34 }
0x1a32   :  { %5425 = vmatmul.mubr.msk.bf16.vlgmr.msra.gmra.mrb[72].mxu0 %vm208_vm1, %v3312_v49  ;;  %v3548_v25 = vpop.permute.xlu0 %3547 }
0x1a33   :  { %5437 = vmatpush3.bf16.msra.mxu0 %v3484_v54  ;;  %v3550_v57 = vpop.permute.xlu1 %3549  ;;  %5440 = vmatprep.mubr.msk.bf16.mxu0 %vm433_vm10, %v3481_v56 }
0x1a34   :  { %5438 = vmatprep.subr.bf16.mxu0 %v3495_v38  ;;  %v3560_v10 = vsel %vm363_vm5, %v3550_v57, 0 }
0x1a37   :  { %5439 = vmatpush3.bf16.msra.mxu0 %v3495_v38  ;;  %v3546_v3 = vpop.permute.xlu1 %3545 }
0x1a38   :  { %5590 = vmatprep.subr.msk.bf16.mxu0 %vm363_vm5, %v3550_v57 }
0x1a3a   :  { %5441 = vmatmul.mubr.msk.bf16.vlgmr.msra.gmra.mrb[76].mxu0 %vm433_vm10, %v3482_v4 }
0x1a3b   :  { %v3640_v5 = vpop.permute.xlu1 %3639  ;;  %5448 = vmatprep.mubr.msk.bf16.mxu0 %vm363_vm5, %v3546_v3 }
0x1a3c   :  { %5452 = vmatprep.subr.bf16.mxu1 %v3640_v5 }
0x1a3d   :  { %5453 = vmatpush3.bf16.msra.mxu1 %v3640_v5 }
0x1a40   :  { %5445 = vmatpush3.bf16.xpose.msra.mxu0 %v3560_v10 }
0x1a41   :  { %5591 = vmatprep.subr.msk.bf16.mxu0 %vm363_vm5, %v3552_v16 }
0x1a48   :  { %5447 = vmatpush3.bf16.xpose.msra.mxu0 %v3563_v60 }
0x1a4f   :  { %5449 = vmatmul.mubr.msk.bf16.vlgmr.msra.gmra.mrb[80].mxu0 %vm363_vm5, %v3548_v25 }
0x1b05   :  { %v6942_v41 = vpop.f32.mrb[72].mxu0 }
0x1b06   :  { %v6944_v61 = vpop.f32.mrb[73].mxu0 }
0x1b07   :  { %v5427_v31 = vpop.f32.mrb[74].mxu0 }
0x1b08   :  { %v6946_v26 = vpop.f32.mrb[75].mxu0 }
0x1b0d   :  { %v6948_v21 = vpop.f32.mrb[76].mxu0 }
0x1b0e   :  { %v6950_v28 = vpop.f32.mrb[77].mxu0 }
0x1b0f   :  { %v5443_v43 = vpop.f32.mrb[78].mxu0 }
0x1b10   :  { %v6952_v50 = vpop.f32.mrb[79].mxu0 }
0x1b22   :  { %v5450_v15 = vpop.f32.mrb[80].mxu0 }
0x1b23   :  { %v3615_v13 = vmul.f32 0.35355338, %v5450_v15  ;;  %v3599_v7 = vpop.f32.mrb[81].mxu0 }
0x1b24   :  { %v3613_v18 = vmul.f32 0.35355338, %v3599_v7  ;;  %v5451_v44 = vpop.f32.mrb[82].mxu0 }
0x1b25   :  { %v3620_v30 = vmul.f32 1.442695, %v3615_v13  ;;  %v3602_v29 = vpop.f32.mrb[83].mxu0 }
0x1b26   :  { %v3616_v2 = vmul.f32 1.442695, %v3613_v18  ;;  %v3614_v58 = vmul.f32 0.35355338, %v3602_v29 }
0x1b27   :  { %5911 = vpow2.f32 %v3620_v30 }
0x1b28   :  { %5913 = vpow2.f32 %v3616_v2  ;;  %v3618_v9 = vmul.f32 1.442695, %v3614_v58 }
0x1b2a   :  { %5915 = vpow2.f32 %v3618_v9 }
0x1b31   :  { %v5912_v59 = vpop.eup %5911 }
0x1b32   :  { %v5914_v0 = vpop.eup %5913  ;;  %v3628_v20 = vsel %vm440_vm9, %v5912_v59, 0.0 }
0x1b33   :  { %3629 = vadd.xlane.f32.xlu0 %v3628_v20  ;;  %v3622_v11 = vsel %vm433_vm10, %v5914_v0, 0.0 }
0x1b34   :  { %v5916_v47 = vpop.eup %5915  ;;  %3623 = vadd.xlane.f32.xlu1 %v3622_v11 }
0x1b35   :  { %v3625_v45 = vsel %vm433_vm10, %v5916_v47, 0.0 }
0x1b37   :  { %3626 = vadd.xlane.f32.xlu0 %v3625_v45 }
0x1b45   :  { %3705 = vrot.lane.b32.xlu1 %v6769_v24, %s6012_s17 }
0x1b49   :  { %3707 = vrot.lane.b32.xlu1 %v6835_v55, %s6012_s17 }
0x1b4d   :  { %3703 = vrot.lane.b32.xlu1 %v6835_v55, %s6013_s18  ;;  %3641 = vrot.lane.b32.xlu0 %v6835_v55, %s6011_s16 }
0x1b51   :  { %3797 = vrot.lane.b32.xlu1 %v6835_v55, %s6014_s19  ;;  %3701 = vrot.lane.b32.xlu0 %v6769_v24, %s6013_s18 }
0x1bc0   :  { %v3630_v32 = vpop.xlane.xlu0 %3629 }
0x1bc1   :  { %v3624_v36 = vpop.xlane.xlu1 %3623  ;;  %5917 = vrcp.f32 %v3630_v32 }
0x1bc2   :  { %5919 = vrcp.f32 %v3624_v36 }
0x1bc4   :  { %v3627_v51 = vpop.xlane.xlu0 %3626 }
0x1bc5   :  { %5921 = vrcp.f32 %v3627_v51  ;;  %v3706_v39 = vpop.permute.xlu1 %3705 }
0x1bc6   :  { %v3716_v54 = vsel %vm363_vm5, %v3706_v39, 0 }
0x1bc8   :  { %v3642_v48 = vpop.permute.xlu0 %3641 }
0x1bc9   :  { %v3651_v46 = vand.u32 %v3642_v48, %v6141_v8  ;;  %v3708_v37 = vpop.permute.xlu1 %3707 }
0x1bca   :  { %v3719_v56 = vsel %vm363_vm5, %v3708_v37, 0 }
0x1bcb   :  { %5454 = vmatprep.subr.bf16.mxu1 %v3651_v46  ;;  %v5918_v12 = vpop.eup %5917 }
0x1bcc   :  { %5455 = vmatpush3.bf16.msra.mxu1 %v3651_v46  ;;  %v5920_v27 = vpop.eup %5919  ;;  %v3636_v17 = vmul.f32 %v5918_v12, %v5912_v59  ;;  %v3702_v49 = vpop.permute.xlu0 %3701 }
0x1bcd   :  { %5592 = vmatprep.subr.msk.bf16.mxu1 %vm363_vm5, %v3706_v39  ;;  %v3634_v23 = vmul.f32 %v5920_v27, %v5914_v0  ;;  %v3704_v38 = vpop.permute.xlu1 %3703 }
0x1bce   :  { %v3638_v34 = vpack.c.bf16 %v3636_v17, %v3636_v17 }
0x1bcf   :  { %v5922_v14 = vpop.eup %5921 }
0x1bd0   :  { %v3635_v6 = vmul.f32 %v5922_v14, %v5916_v47 }
0x1bd1   :  { %v3798_v59 = vpop.permute.xlu1 %3797 }
0x1bd2   :  { %v3637_v1 = vpack.c.bf16 %v3635_v6, %v3634_v23  ;;  %v3807_v45 = vand.u32 %v3798_v59, %v6141_v8 }
0x1bd4   :  { %5456 = vmatprep.mubr.msk.bf16.mxu1 %vm433_vm10, %v3637_v1  ;;  %v5695_v1 = vld [vmem:[%s7248_s1 + $0xa8] sm:$0xff]  }
0x1bd5   :  { %5457 = vmatmul.mubr.msk.bf16.vlgmr.msra.gmra.mrb[76].mxu1 %vm433_vm10, %v3638_v34  ;;  %v3380_v34 = vadd.f32 %v6946_v26, %v6637_v19  ;;  %v3381_v19 = vadd.f32 %v6942_v41, %v6631_v63  ;;  %v5696_v26 = vld [vmem:[%s7248_s1 + $0xb0] sm:$0xff]  }
0x1bd6   :  { %5461 = vmatpush3.bf16.xpose.msra.mxu1 %v3716_v54  ;;  %5464 = vmatprep.mubr.msk.bf16.mxu1 %vm363_vm5, %v3702_v49  ;;  %v3379_v49 = vadd.f32 %v6944_v61, %v6634_v40 }
0x1bd7   :  { %5593 = vmatprep.subr.msk.bf16.mxu1 %vm363_vm5, %v3708_v37  ;;  %v7017_v37 = vld [vmem:[%s7249_s2 + $0x14] ss:$0 sm:$0xff] }
0x1bde   :  { %5463 = vmatpush3.bf16.xpose.msra.mxu1 %v3719_v56  ;;  %v3387_v56 = vadd.f32 %v7017_v37, %v3380_v34 }
0x1be5   :  { %5465 = vmatmul.mubr.msk.bf16.vlgmr.msra.gmra.mrb[80].mxu1 %vm363_vm5, %v3704_v38  ;;  %v7021_v38 = vadd.f32 %v7017_v37, %v3379_v49 }
0x1be7   :  { %v4120_v40 = vpack.c.bf16 %v3387_v56, %v7021_v38 }
0x1ca8   :  { %v6978_v57 = vpop.f32.mrb[76].mxu1 }
0x1ca9   :  { %v6980_v42 = vpop.f32.mrb[77].mxu1 }
0x1caa   :  { %v5459_v3 = vpop.f32.mrb[78].mxu1 }
0x1cab   :  { %v6982_v4 = vpop.f32.mrb[79].mxu1  ;;  %v3388_v3 = vadd.f32 %v7017_v37, %v3381_v19 }
0x1cac   :  { %v5659_v5 = vpack.i.bf16 %v6982_v4, %v6980_v42 }
0x1cb8   :  { %v5466_v10 = vpop.f32.mrb[80].mxu1 }
0x1cb9   :  { %v3771_v16 = vmul.f32 0.35355338, %v5466_v10  ;;  %v3755_v60 = vpop.f32.mrb[81].mxu1  ;;  %v4121_v10 = vpack.c.bf16 %v3388_v3, %v3388_v3 }
0x1cba   :  { %v3769_v25 = vmul.f32 0.35355338, %v3755_v60  ;;  %v5467_v31 = vpop.f32.mrb[82].mxu1 }
0x1cbb   :  { %v3776_v43 = vmul.f32 1.442695, %v3771_v16  ;;  %v3758_v15 = vpop.f32.mrb[83].mxu1 }
0x1cbc   :  { %v3772_v13 = vmul.f32 1.442695, %v3769_v25  ;;  %v3770_v7 = vmul.f32 0.35355338, %v3758_v15 }
0x1cbd   :  { %5923 = vpow2.f32 %v3776_v43 }
0x1cbe   :  { %v3774_v18 = vmul.f32 1.442695, %v3770_v7  ;;  %5925 = vpow2.f32 %v3772_v13 }
0x1cc0   :  { %5927 = vpow2.f32 %v3774_v18 }
0x1cc7   :  { %v5924_v44 = vpop.eup %5923 }
0x1cc8   :  { %v3784_v30 = vsel %vm440_vm9, %v5924_v44, 0.0  ;;  %v5926_v29 = vpop.eup %5925 }
0x1cc9   :  { %3785 = vadd.xlane.f32.xlu0 %v3784_v30  ;;  %v3778_v9 = vsel %vm433_vm10, %v5926_v29, 0.0 }
0x1cca   :  { %v5928_v2 = vpop.eup %5927 }
0x1ccb   :  { %v3781_v58 = vsel %vm433_vm10, %v5928_v2, 0.0 }
0x1ccc   :  { %3782 = vadd.xlane.f32.xlu1 %v3781_v58  ;;  %v7044_v58 = vld [vmem:[%s7249_s2 + $0x15] ss:$0 sm:$0xff] }
0x1ccd   :  { %3779 = vadd.xlane.f32.xlu0 %v3778_v9 }
0x1cdd   :  { %3861 = vrot.lane.b32.xlu1 %v6769_v24, %s6015_s20 }
0x1ce1   :  { %3857 = vrot.lane.b32.xlu1 %v6769_v24, %s6016_s21 }
0x1ce3   :  { %3795 = vrot.lane.b32.xlu0 %v6769_v24, %s6014_s19 }
0x1ce7   :  { %3863 = vrot.lane.b32.xlu0 %v6835_v55, %s6015_s20  ;;  %s6022_s20 = smov [#allocation2]  }
0x1ceb   :  { %3859 = vrot.lane.b32.xlu0 %v6835_v55, %s6016_s21  ;;  %s4717_s21 = sshll.u32 %s6022_s20, 4  ;;  %s4718_s21 = int_to_ptr.vmem [resolvable:$true] %s4717_s21 }
0x1cec   :  { %p5986_p1 = scmp.lt.s32.totalorder %s4718_s21, %s4718_s21 }
0x1d56   :  { %v3786_v0 = vpop.xlane.xlu0 %3785 }
0x1d57   :  { %5929 = vrcp.f32 %v3786_v0 }
0x1d59   :  { %v3783_v20 = vpop.xlane.xlu1 %3782 }
0x1d5a   :  { %5931 = vrcp.f32 %v3783_v20  ;;  %v3780_v11 = vpop.xlane.xlu0 %3779 }
0x1d5b   :  { %5933 = vrcp.f32 %v3780_v11 }
0x1d5d   :  { %v3862_v51 = vpop.permute.xlu1 %3861 }
0x1d5e   :  { %v3796_v47 = vpop.permute.xlu0 %3795  ;;  %v3872_v23 = vsel %vm363_vm5, %v3862_v51, 0 }
0x1d5f   :  { %5468 = vmatprep.subr.bf16.mxu0 %v3796_v47 }
0x1d60   :  { %5469 = vmatpush3.bf16.msra.mxu0 %v3796_v47 }
0x1d61   :  { %5470 = vmatprep.subr.bf16.mxu0 %v3807_v45  ;;  %v5930_v32 = vpop.eup %5929  ;;  %v3858_v17 = vpop.permute.xlu1 %3857 }
0x1d62   :  { %v3792_v46 = vmul.f32 %v5930_v32, %v5924_v44  ;;  %v3864_v6 = vpop.permute.xlu0 %3863 }
0x1d63   :  { %v3875_v54 = vsel %vm363_vm5, %v3864_v6, 0 }
0x1d64   :  { %v5932_v36 = vpop.eup %5931  ;;  %5471 = vmatpush3.bf16.msra.mxu0 %v3807_v45  ;;  %v3794_v14 = vpack.c.bf16 %v3792_v46, %v3792_v46 }
0x1d65   :  { %v5934_v48 = vpop.eup %5933  ;;  %5594 = vmatprep.subr.msk.bf16.mxu0 %vm363_vm5, %v3862_v51  ;;  %v3791_v12 = vmul.f32 %v5932_v36, %v5928_v2 }
0x1d66   :  { %v3790_v39 = vmul.f32 %v5934_v48, %v5926_v29  ;;  %v3860_v61 = vpop.permute.xlu0 %3859 }
0x1d68   :  { %v3793_v27 = vpack.c.bf16 %v3791_v12, %v3790_v39 }
0x1d6a   :  { %5472 = vmatprep.mubr.msk.bf16.mxu0 %vm433_vm10, %v3793_v27 }
0x1d6b   :  { %5473 = vmatmul.mubr.msk.bf16.vlgmr.msra.gmra.mrb[84].mxu0 %vm433_vm10, %v3794_v14 }
0x1d6c   :  { %5480 = vmatprep.mubr.msk.bf16.mxu0 %vm363_vm5, %v3858_v17 }
0x1d6d   :  { %5477 = vmatpush3.bf16.xpose.msra.mxu0 %v3872_v23 }
0x1d6e   :  { %5595 = vmatprep.subr.msk.bf16.mxu0 %vm363_vm5, %v3864_v6 }
0x1d75   :  { %5479 = vmatpush3.bf16.xpose.msra.mxu0 %v3875_v54 }
0x1d76   :  { %5500 = vmatprep.subr.bf16.mxu0 %v5695_v1 }
0x1d7c   :  { %5481 = vmatmul.mubr.msk.bf16.vlgmr.msra.gmra.mrb[88].mxu0 %vm363_vm5, %v3860_v61 }
0x1d7d   :  { %5501 = vmatpush3.bf16.msra.mxu0 %v5695_v1  ;;  %5504 = vmatprep.mubr.msk.bf16.mxu0 %vm208_vm1, %v4120_v40 }
0x1d7e   :  { %5502 = vmatprep.subr.bf16.mxu0 %v5696_v26 }
0x1d81   :  { %5503 = vmatpush3.bf16.msra.mxu0 %v5696_v26 }
0x1d82   :  { %5528 = vmatprep.subr.bf16.mxu0 %v5695_v1 }
0x1d84   :  { %5505 = vmatmul.mubr.msk.bf16.vlgmr.msra.gmra.mrb[92].mxu0 %vm208_vm1, %v4121_v10 }
0x1d85   :  { %5529 = vmatpush3.bf16.msra.mxu0 %v5695_v1 }
0x1d86   :  { %5530 = vmatprep.subr.bf16.mxu0 %v5696_v26 }
0x1d89   :  { %5531 = vmatpush3.bf16.msra.mxu0 %v5696_v26 }
0x1e3e   :  { %v7033_v63 = vpop.f32.mrb[84].mxu0 }
0x1e3f   :  { %v7035_v41 = vpop.f32.mrb[85].mxu0 }
0x1e40   :  { %v5475_v16 = vpop.f32.mrb[86].mxu0 }
0x1e41   :  { %v7037_v60 = vpop.f32.mrb[87].mxu0 }
0x1e42   :  { %v5664_v25 = vpack.i.bf16 %v7037_v60, %v7035_v41 }
0x1e4f   :  { %v5482_v31 = vpop.f32.mrb[88].mxu0 }
0x1e50   :  { %v3927_v43 = vmul.f32 0.35355338, %v5482_v31  ;;  %v3911_v15 = vpop.f32.mrb[89].mxu0 }
0x1e51   :  { %v3925_v13 = vmul.f32 0.35355338, %v3911_v15  ;;  %v5483_v7 = vpop.f32.mrb[90].mxu0 }
0x1e52   :  { %v3932_v18 = vmul.f32 1.442695, %v3927_v43  ;;  %v3914_v44 = vpop.f32.mrb[91].mxu0 }
0x1e53   :  { %v3928_v30 = vmul.f32 1.442695, %v3925_v13  ;;  %v3926_v29 = vmul.f32 0.35355338, %v3914_v44 }
0x1e54   :  { %5935 = vpow2.f32 %v3932_v18 }
0x1e55   :  { %5937 = vpow2.f32 %v3928_v30  ;;  %v3930_v2 = vmul.f32 1.442695, %v3926_v29 }
0x1e57   :  { %5939 = vpow2.f32 %v3930_v2  ;;  %v7046_v9 = vpop.f32.mrb[92].mxu0 }
0x1e58   :  { %v4178_v59 = vpop.f32.mrb[93].mxu0 }
0x1e59   :  { %v7049_v0 = vadd.f32 %v7044_v58, %v4178_v59  ;;  %v5507_v20 = vpop.f32.mrb[94].mxu0 }
0x1e5a   :  { %v4181_v11 = vpop.f32.mrb[95].mxu0 }
0x1e5b   :  { %v7052_v47 = vmul.f32 0.70710677, %v7049_v0  ;;  %v7055_v45 = vadd.f32 %v7044_v58, %v4181_v11 }
0x1e5d   :  { %v4198_v32 = vand.u32 2147483647, %v7052_v47  ;;  %v7059_v36 = vmul.f32 0.70710677, %v7055_v45  ;;  %v4193_v41 = vmul.f32 0.5, %v7055_v45 }
0x1e5e   :  { %v7061_v51 = vpop.eup %5935 }
0x1e5f   :  { %v7063_v48 = vpop.eup %5937  ;;  %v4201_v46 = vmul.f32 0.3275911, %v4198_v32  ;;  %v4199_v12 = vand.u32 2147483647, %v7059_v36  ;;  %v3940_v39 = vsel %vm440_vm9, %v7061_v51, 0.0  ;;  %v4240_v34 = vsub.f32 0.0, %v4198_v32 }
0x1e60   :  { %v3934_v27 = vsel %vm433_vm10, %v7063_v48, 0.0  ;;  %3941 = vadd.xlane.f32.xlu0 %v3940_v39  ;;  %vm4258_vm9 = vcmp.ge.f32.partialorder %v7052_v47, 0.0  ;;  %vm4259_vm14 = vcmp.ge.f32.partialorder %v7059_v36, 0.0 }
0x1e61   :  { %v7070_v14 = vpop.eup %5939  ;;  %v4204_v17 = vadd.f32 1.0, %v4201_v46  ;;  %v4202_v23 = vmul.f32 0.3275911, %v4199_v12  ;;  %3935 = vadd.xlane.f32.xlu1 %v3934_v27  ;;  %v4241_v54 = vsub.f32 0.0, %v4199_v12  ;;  %v4243_v56 = vmul.f32 %v4240_v34, %v4198_v32 }
0x1e62   :  { %v3937_v6 = vsel %vm433_vm10, %v7070_v14, 0.0 }
0x1e63   :  { %5941 = vrcp.f32 %v4204_v17  ;;  %v4205_v1 = vadd.f32 1.0, %v4202_v23  ;;  %v4244_v61 = vmul.f32 %v4241_v54, %v4199_v12  ;;  %v4246_v3 = vmul.f32 1.442695, %v4243_v56 }
0x1e64   :  { %3938 = vadd.xlane.f32.xlu0 %v3937_v6  ;;  %v4192_v23 = vmul.f32 0.5, %v7049_v0 }
0x1e65   :  { %5943 = vrcp.f32 %v4205_v1  ;;  %v4248_v15 = vmul.f32 1.442695, %v4244_v61 }
0x1e66   :  { %5945 = vpow2.f32 %v4246_v3 }
0x1e67   :  { %5947 = vpow2.f32 %v4248_v15 }
0x1e6d   :  { %v5942_v49 = vpop.eup %5941 }
0x1e6e   :  { %v4213_v19 = vmul.f32 1.0614054, %v5942_v49 }
0x1e6f   :  { %v5944_v26 = vpop.eup %5943 }
0x1e70   :  { %v4216_v40 = vadd.f32 -1.4531521, %v4213_v19  ;;  %v4214_v10 = vmul.f32 1.0614054, %v5944_v26  ;;  %v5946_v42 = vpop.eup %5945 }
0x1e72   :  { %v4219_v16 = vmul.f32 %v5942_v49, %v4216_v40  ;;  %3951 = vrot.lane.b32.xlu1 %v6769_v24, %s6017_s22  ;;  %v4217_v31 = vadd.f32 -1.4531521, %v4214_v10 }
0x1e74   :  { %v4222_v43 = vadd.f32 1.4214138, %v4219_v16  ;;  %v4220_v13 = vmul.f32 %v5944_v26, %v4217_v31 }
0x1e76   :  { %v4225_v7 = vmul.f32 %v5942_v49, %v4222_v43  ;;  %5660 = vrot.lane.b32.xlu1 %v5659_v5, %s6018_s23  ;;  %v4223_v18 = vadd.f32 1.4214138, %v4220_v13 }
0x1e78   :  { %v4228_v44 = vadd.f32 -0.28449672, %v4225_v7  ;;  %v4226_v30 = vmul.f32 %v5944_v26, %v4223_v18 }
0x1e7a   :  { %v4231_v29 = vmul.f32 %v5942_v49, %v4228_v44  ;;  %4020 = vrot.lane.b32.xlu1 %v6978_v57, %s6018_s23  ;;  %v4229_v24 = vadd.f32 -0.28449672, %v4226_v30  ;;  %3953 = vrot.lane.b32.xlu0 %v6835_v55, %s6017_s22  ;;  %v5948_v57 = vpop.eup %5947  ;;  %s5981_s22 = scalar_lea.vmem %s4718_s21, 32 }
0x1e7b   :  { %p5982_p0 = scmp.ne.s32.totalorder %s4718_s21, %s5981_s22  ;;  %p5987_p2 = scmp.lt.s32.totalorder %s5981_s22, %s5981_s22 }
0x1e7c   :  { %v4234_v2 = vadd.f32 0.2548296, %v4231_v29  ;;  %v4232_v59 = vmul.f32 %v5944_v26, %v4229_v24 }
0x1e7d   :  { %p5988_p3 = por %p5987_p2, %p5986_p1 }
0x1e7e   :  { %v4237_v20 = vmul.f32 %v5942_v49, %v4234_v2  ;;  %4032 = vrot.lane.b32.xlu1 %v7033_v63, %s6019_s24  ;;  %v4235_v4 = vadd.f32 0.2548296, %v4232_v59  ;;  %5665 = vrot.lane.b32.xlu0 %v5664_v25, %s6019_s24 }
0x1e7f   :  { %p5989_p4 = pnand %p5988_p3, %p5982_p0 }
0x1e80   :  { %v4252_v5 = vmul.f32 %v5946_v42, %v4237_v20  ;;  %v4238_v11 = vmul.f32 %v5944_v26, %v4235_v4 }
0x1e82   :  { %v4255_v32 = vsub.f32 1.0, %v4252_v5  ;;  %v4253_v46 = vmul.f32 %v5948_v57, %v4238_v11 }
0x1e84   :  { %v4261_v12 = vsub.f32 0.0, %v4255_v32  ;;  %v4256_v55 = vsub.f32 1.0, %v4253_v46 }
0x1e86   :  { %v4264_v39 = vsel %vm4258_vm9, %v4255_v32, %v4261_v12  ;;  %v4262_v27 = vsub.f32 0.0, %v4256_v55 }
0x1e87   :  { %v4267_v17 = vadd.f32 1.0, %v4264_v39 }
0x1e88   :  { %v4265_v63 = vsel %vm4259_vm14, %v4256_v55, %v4262_v27 }
0x1e89   :  { %v4268_v60 = vadd.f32 1.0, %v4265_v63  ;;  %v7094_v25 = vmul.f32 %v4267_v17, %v4192_v23 }
0x1e8b   :  { %v7096_v6 = vmul.f32 %v4268_v60, %v4193_v41 }
0x1e8d   :  { %v4273_v1 = vpack.c.bf16 %v7096_v6, %v7094_v25  ;;  %v5701_v25 = vld [vmem:[%s7248_s1 + $0xd8] sm:$0xff]  }
0x1eed   :  { %v3942_v47 = vpop.xlane.xlu0 %3941 }
0x1eee   :  { %v3936_v34 = vpop.xlane.xlu1 %3935  ;;  %5949 = vrcp.f32 %v3942_v47 }
0x1eef   :  { %5951 = vrcp.f32 %v3936_v34 }
0x1ef1   :  { %v3939_v54 = vpop.xlane.xlu0 %3938 }
0x1ef2   :  { %v3952_v49 = vpop.permute.xlu1 %3951  ;;  %5953 = vrcp.f32 %v3939_v54 }
0x1ef3   :  { %5484 = vmatprep.subr.bf16.mxu1 %v3952_v49 }
0x1ef4   :  { %5485 = vmatpush3.bf16.msra.mxu1 %v3952_v49 }
0x1ef5   :  { %v3954_v0 = vpop.permute.xlu0 %3953 }
0x1ef6   :  { %v3963_v45 = vand.u32 %v3954_v0, %v6141_v8  ;;  %v7113_v8 = vld [vmem:[%s7248_s1 + $0xb8] sm:$0xff]   ;;  %v5661_v30 = vpop.permute.xlu1 %5660 }
0x1ef7   :  { %5536 = vmatprep.subr.bf16.mxu0 %v7113_v8  ;;  %v5663_v5 = vunpack.i.h.bf16 %v5661_v30  ;;  %v5662_v11 = vunpack.i.l.bf16 %v5661_v30 }
0x1ef8   :  { %5486 = vmatprep.subr.bf16.mxu1 %v3963_v45  ;;  %v5950_v36 = vpop.eup %5949 }
0x1ef9   :  { %5487 = vmatpush3.bf16.msra.mxu1 %v3963_v45  ;;  %v5952_v56 = vpop.eup %5951  ;;  %v3948_v26 = vmul.f32 %v5950_v36, %v7061_v51  ;;  %v4050_v39 = vsel %vm363_vm5, %v6952_v50, %v5663_v5  ;;  %v4049_v63 = vsel %vm363_vm5, %v6950_v28, %v5662_v11  ;;  %v5698_v28 = vld [vmem:[%s7248_s1 + $0xc0] sm:$0xff]  }
0x1efa   :  { %5492 = vmatprep.subr.bf16.mxu1 %v6889_v35  ;;  %v3946_v40 = vmul.f32 %v5952_v56, %v7063_v48  ;;  %v4021_v24 = vpop.permute.xlu1 %4020  ;;  %v5699_v56 = vld [vmem:[%s7248_s1 + $0xc8] sm:$0xff]  }
0x1efb   :  { %v3950_v10 = vpack.c.bf16 %v3948_v26, %v3948_v26  ;;  %v4051_v27 = vsel %vm363_vm5, %v6948_v21, %v4021_v24 }
0x1efc   :  { %v5954_v19 = vpop.eup %5953 }
0x1efd   :  { %v3947_v61 = vmul.f32 %v5954_v19, %v7070_v14 }
0x1efe   :  { %v4033_v4 = vpop.permute.xlu1 %4032 }
0x1eff   :  { %v3949_v3 = vpack.c.bf16 %v3947_v61, %v3946_v40  ;;  %v4054_v23 = vsel %vm1024_vm12, %v4051_v27, %v4033_v4  ;;  %v5700_v40 = vld [vmem:[%s7248_s1 + $0xd0] sm:$0xff]  }
0x1f01   :  { %5488 = vmatprep.mubr.msk.bf16.mxu1 %vm433_vm10, %v3949_v3 }
0x1f02   :  { %5489 = vmatmul.mubr.msk.bf16.vlgmr.msra.gmra.mrb[84].mxu1 %vm433_vm10, %v3950_v10  ;;  %v5703_v10 = vld [vmem:[%s7248_s1 + $0xe8] sm:$0xff]  }
0x1f03   :  { %5493 = vmatpush3.bf16.msra.mxu1 %v6889_v35 }
0x1f04   :  { %5494 = vmatprep.subr.bf16.mxu1 %v6896_v62 }
0x1f07   :  { %5495 = vmatpush3.bf16.msra.mxu1 %v6896_v62  ;;  %v7121_v62 = vadd.f32 %v7046_v9, %v7044_v58  ;;  %v5666_v9 = vpop.permute.xlu0 %5665 }
0x1f08   :  { %5508 = vmatprep.subr.bf16.mxu1 %v7113_v8  ;;  %v5668_v32 = vunpack.i.h.bf16 %v5666_v9  ;;  %v5667_v46 = vunpack.i.l.bf16 %v5666_v9 }
0x1f09   :  { %v7124_v31 = vmul.f32 0.70710677, %v7121_v62 }
0x1f0a   :  { %v4053_v34 = vsel %vm1024_vm12, %v4050_v39, %v5668_v32  ;;  %v4052_v54 = vsel %vm1024_vm12, %v4049_v63, %v5667_v46 }
0x1f0b   :  { %v4200_v43 = vand.u32 2147483647, %v7124_v31  ;;  %vm4260_vm5 = vcmp.ge.f32.partialorder %v7124_v31, 0.0 }
0x1f0d   :  { %v4203_v15 = vmul.f32 0.3275911, %v4200_v43  ;;  %v4242_v59 = vsub.f32 0.0, %v4200_v43 }
0x1f0f   :  { %v4206_v13 = vadd.f32 1.0, %v4203_v15  ;;  %v4245_v42 = vmul.f32 %v4242_v59, %v4200_v43 }
0x1f11   :  { %5955 = vrcp.f32 %v4206_v13  ;;  %v4250_v12 = vmul.f32 1.442695, %v4245_v42 }
0x1f13   :  { %5957 = vpow2.f32 %v4250_v12 }
0x1f1b   :  { %v5956_v7 = vpop.eup %5955 }
0x1f1c   :  { %v4215_v18 = vmul.f32 1.0614054, %v5956_v7 }
0x1f1d   :  { %v5958_v26 = vpop.eup %5957 }
0x1f1e   :  { %v4218_v44 = vadd.f32 -1.4531521, %v4215_v18 }
0x1f20   :  { %v4221_v29 = vmul.f32 %v5956_v7, %v4218_v44 }
0x1f22   :  { %v4224_v2 = vadd.f32 1.4214138, %v4221_v29 }
0x1f24   :  { %v4227_v20 = vmul.f32 %v5956_v7, %v4224_v2 }
0x1f26   :  { %v4230_v57 = vadd.f32 -0.28449672, %v4227_v20 }
0x1f28   :  { %v4233_v47 = vmul.f32 %v5956_v7, %v4230_v57 }
0x1f2a   :  { %v4236_v36 = vadd.f32 0.2548296, %v4233_v47 }
0x1f2c   :  { %v4239_v19 = vmul.f32 %v5956_v7, %v4236_v36 }
0x1f2e   :  { %v4254_v61 = vmul.f32 %v5958_v26, %v4239_v19 }
0x1f30   :  { %v4257_v6 = vsub.f32 1.0, %v4254_v61 }
0x1f32   :  { %v4263_v3 = vsub.f32 0.0, %v4257_v6 }
0x1fd5   :  { %v5490_v51 = vpop.f32.mrb[84].mxu1 }
0x1fd6   :  { %4044 = vrot.lane.b32.xlu1 %v5490_v51, %s6020_s29  ;;  %v3999_v48 = vpop.f32.mrb[85].mxu1  ;;  %v4266_v51 = vsel %vm4260_vm5, %v4257_v6, %v4263_v3 }
0x1fd7   :  { %v5491_v14 = vpop.f32.mrb[86].mxu1 }
0x1fd8   :  { %v4002_v16 = vpop.f32.mrb[87].mxu1  ;;  %v5704_v14 = vld [vmem:[%s7248_s1 + $0xf0] sm:$0xff]  }
0x1fd9   :  { %v5669_v35 = vpack.i.bf16 %v4002_v16, %v3999_v48  ;;  %v4269_v48 = vadd.f32 1.0, %v4266_v51  ;;  %v4194_v16 = vmul.f32 0.5, %v7121_v62 }
0x1fdb   :  { %5670 = vrot.lane.b32.xlu0 %v5669_v35, %s6020_s29  ;;  %v4272_v35 = vmul.f32 %v4269_v48, %v4194_v16 }
0x1fdd   :  { %v4274_v31 = vpack.c.bf16 %v4272_v35, %v4272_v35 }
0x2048   :  { %v4045_v55 = vpop.permute.xlu1 %4044 }
0x2049   :  { %v4057_v49 = vsel %vm1028_vm13, %v4054_v23, %v4045_v55 }
0x204a   :  { %v4059_v45 = vpack.c.bf16 %v4057_v49, %v4057_v49 }
0x204d   :  { %v5671_v17 = vpop.permute.xlu0 %5670 }
0x204e   :  { %v5673_v41 = vunpack.i.h.bf16 %v5671_v17  ;;  %v5672_v60 = vunpack.i.l.bf16 %v5671_v17 }
0x2050   :  { %v4055_v50 = vsel %vm1028_vm13, %v4052_v54, %v5672_v60  ;;  %v4056_v21 = vsel %vm1028_vm13, %v4053_v34, %v5673_v41 }
0x2051   :  { %v4058_v0 = vpack.c.bf16 %v4056_v21, %v4055_v50 }
0x2053   :  { %5496 = vmatprep.mubr.msk.bf16.mxu1 %vm208_vm1, %v4058_v0 }
0x2054   :  { %5497 = vmatmul.mubr.msk.bf16.vlgmr.msra.gmra.mrb[88].mxu1 %vm208_vm1, %v4059_v45 }
0x2055   :  { %5509 = vmatpush3.bf16.msra.mxu1 %v7113_v8  ;;  %5524 = vmatprep.mubr.bf16.mxu1 %v4273_v1  ;;  %v5702_v1 = vld [vmem:[%s7248_s1 + $0xe0] sm:$0xff]  }
0x2056   :  { %5510 = vmatprep.subr.bf16.mxu1 %v5698_v28 }
0x2059   :  { %5511 = vmatpush3.bf16.msra.mxu1 %v5698_v28 }
0x205a   :  { %5512 = vmatprep.subr.bf16.mxu1 %v5699_v56 }
0x205d   :  { %5513 = vmatpush3.bf16.msra.mxu1 %v5699_v56 }
0x205e   :  { %5514 = vmatprep.subr.bf16.mxu1 %v5700_v40 }
0x2061   :  { %5515 = vmatpush3.bf16.msra.mxu1 %v5700_v40 }
0x2062   :  { %5516 = vmatprep.subr.bf16.mxu1 %v5701_v25 }
0x2065   :  { %5517 = vmatpush3.bf16.msra.mxu1 %v5701_v25 }
0x2066   :  { %5518 = vmatprep.subr.bf16.mxu1 %v5702_v1 }
0x2069   :  { %5519 = vmatpush3.bf16.msra.mxu1 %v5702_v1 }
0x206a   :  { %5520 = vmatprep.subr.bf16.mxu1 %v5703_v10 }
0x206d   :  { %5521 = vmatpush3.bf16.msra.mxu1 %v5703_v10 }
0x206e   :  { %5522 = vmatprep.subr.bf16.mxu1 %v5704_v14 }
0x2071   :  { %5523 = vmatpush3.bf16.msra.mxu1 %v5704_v14 }
0x2072   :  { %5556 = vmatprep.subr.bf16.mxu1 %v6005_v52 }
0x2074   :  { %5525 = vmatmul.mubr.bf16.vlgmr.msra.gmra.mrb[92].mxu1 %v4274_v31 }
0x2127   :  { %v5498_v43 = vpop.f32.mrb[88].mxu1 }
0x2128   :  { %v4116_v15 = vadd.f32 %v5498_v43, %v6730_v22  ;;  %v4100_v13 = vpop.f32.mrb[89].mxu1 }
0x2129   :  { %v4114_v7 = vadd.f32 %v4100_v13, %v6733_v53  ;;  %v5499_v18 = vpop.f32.mrb[90].mxu1 }
0x212a   :  { %v4103_v44 = vpop.f32.mrb[91].mxu1  ;;  %v4119_v62 = vadd.f32 %v7017_v37, %v4116_v15 }
0x212b   :  { %v4115_v30 = vadd.f32 %v4103_v44, %v6736_v33  ;;  %v7174_v29 = vadd.f32 %v7017_v37, %v4114_v7 }
0x212c   :  { %v4402_v59 = vpack.c.bf16 %v4119_v62, %v4119_v62 }
0x212d   :  { %v4118_v24 = vadd.f32 %v7017_v37, %v4115_v30 }
0x212f   :  { %v4401_v2 = vpack.c.bf16 %v4118_v24, %v7174_v29 }
0x2131   :  { %5532 = vmatprep.mubr.msk.bf16.mxu0 %vm208_vm1, %v4401_v2 }
0x2132   :  { %5533 = vmatmul.mubr.msk.bf16.vlgmr.msra.gmra.mrb[96].mxu0 %vm208_vm1, %v4402_v59 }
0x2133   :  { %5537 = vmatpush3.bf16.msra.mxu0 %v7113_v8 }
0x2134   :  { %5538 = vmatprep.subr.bf16.mxu0 %v5698_v28 }
0x2137   :  { %5539 = vmatpush3.bf16.msra.mxu0 %v5698_v28 }
0x2138   :  { %5540 = vmatprep.subr.bf16.mxu0 %v5699_v56 }
0x213b   :  { %5541 = vmatpush3.bf16.msra.mxu0 %v5699_v56 }
0x213c   :  { %5542 = vmatprep.subr.bf16.mxu0 %v5700_v40 }
0x213f   :  { %5543 = vmatpush3.bf16.msra.mxu0 %v5700_v40 }
0x2140   :  { %5544 = vmatprep.subr.bf16.mxu0 %v5701_v25 }
0x2143   :  { %5545 = vmatpush3.bf16.msra.mxu0 %v5701_v25 }
0x2144   :  { %5546 = vmatprep.subr.bf16.mxu0 %v5702_v1 }
0x2147   :  { %v5526_v22 = vpop.f32.mrb[92].mxu1  ;;  %5547 = vmatpush3.bf16.msra.mxu0 %v5702_v1 }
0x2148   :  { %v7181_v53 = vpop.f32.mrb[93].mxu1  ;;  %5548 = vmatprep.subr.bf16.mxu0 %v5703_v10 }
0x2149   :  { %v5527_v33 = vpop.f32.mrb[94].mxu1 }
0x214a   :  { %v4364_v37 = vpop.f32.mrb[95].mxu1 }
0x214b   :  { %5549 = vmatpush3.bf16.msra.mxu0 %v5703_v10 }
0x214c   :  { %5550 = vmatprep.subr.bf16.mxu0 %v5704_v14 }
0x214f   :  { %5551 = vmatpush3.bf16.msra.mxu0 %v5704_v14 }
0x2205   :  { %v5534_v8 = vpop.f32.mrb[96].mxu0 }
0x2206   :  { %v7184_v20 = vadd.f32 %v5534_v8, %v7044_v58  ;;  %v4443_v42 = vpop.f32.mrb[97].mxu0 }
0x2207   :  { %v7187_v9 = vadd.f32 %v7044_v58, %v4443_v42  ;;  %v5535_v4 = vpop.f32.mrb[98].mxu0 }
0x2208   :  { %v7190_v5 = vmul.f32 0.70710677, %v7184_v20  ;;  %v4446_v11 = vpop.f32.mrb[99].mxu0 }
0x2209   :  { %v7193_v57 = vmul.f32 0.70710677, %v7187_v9  ;;  %v7196_v32 = vadd.f32 %v7044_v58, %v4446_v11 }
0x220a   :  { %v4465_v46 = vand.u32 2147483647, %v7190_v5  ;;  %vm4525_vm10 = vcmp.ge.f32.partialorder %v7190_v5, 0.0 }
0x220b   :  { %v4463_v12 = vand.u32 2147483647, %v7193_v57  ;;  %v7201_v55 = vmul.f32 0.70710677, %v7196_v32  ;;  %vm4523_vm12 = vcmp.ge.f32.partialorder %v7193_v57, 0.0 }
0x220c   :  { %v4468_v39 = vmul.f32 0.3275911, %v4465_v46  ;;  %v4507_v58 = vsub.f32 0.0, %v4465_v46 }
0x220d   :  { %v4466_v27 = vmul.f32 0.3275911, %v4463_v12  ;;  %v4464_v17 = vand.u32 2147483647, %v7201_v55  ;;  %v4505_v47 = vsub.f32 0.0, %v4463_v12  ;;  %vm4524_vm13 = vcmp.ge.f32.partialorder %v7201_v55, 0.0 }
0x220e   :  { %v4471_v63 = vadd.f32 1.0, %v4468_v39  ;;  %v4510_v54 = vmul.f32 %v4507_v58, %v4465_v46 }
0x220f   :  { %v4469_v23 = vadd.f32 1.0, %v4466_v27  ;;  %v4467_v41 = vmul.f32 0.3275911, %v4464_v17  ;;  %v4506_v49 = vsub.f32 0.0, %v4464_v17  ;;  %v4508_v0 = vmul.f32 %v4505_v47, %v4463_v12 }
0x2210   :  { %5959 = vrcp.f32 %v4471_v63  ;;  %v4515_v56 = vmul.f32 1.442695, %v4510_v54  ;;  %v4459_v47 = vmul.f32 0.5, %v7184_v20  ;;  %v4457_v54 = vmul.f32 0.5, %v7187_v9 }
0x2211   :  { %5961 = vrcp.f32 %v4469_v23  ;;  %v4470_v60 = vadd.f32 1.0, %v4467_v41  ;;  %v4509_v26 = vmul.f32 %v4506_v49, %v4464_v17  ;;  %v4511_v61 = vmul.f32 1.442695, %v4508_v0 }
0x2212   :  { %v4458_v49 = vmul.f32 0.5, %v7196_v32 }
0x2213   :  { %5963 = vrcp.f32 %v4470_v60  ;;  %v4513_v51 = vmul.f32 1.442695, %v4509_v26 }
0x2214   :  { %5965 = vpow2.f32 %v4515_v56 }
0x2215   :  { %5967 = vpow2.f32 %v4511_v61 }
0x2216   :  { %5969 = vpow2.f32 %v4513_v51 }
0x221a   :  { %v5960_v34 = vpop.eup %5959 }
0x221b   :  { %v5962_v50 = vpop.eup %5961  ;;  %v4480_v21 = vmul.f32 1.0614054, %v5960_v34 }
0x221c   :  { %v4478_v45 = vmul.f32 1.0614054, %v5962_v50 }
0x221d   :  { %v4483_v28 = vadd.f32 -1.4531521, %v4480_v21  ;;  %v5964_v36 = vpop.eup %5963 }
0x221e   :  { %v4481_v19 = vadd.f32 -1.4531521, %v4478_v45  ;;  %v4479_v25 = vmul.f32 1.0614054, %v5964_v36  ;;  %v5966_v2 = vpop.eup %5965 }
0x221f   :  { %v4486_v40 = vmul.f32 %v5960_v34, %v4483_v28  ;;  %v5968_v22 = vpop.eup %5967  ;;  %v4858_v28 = vld [vmem:[%s7249_s2 + $0x16] ss:$0 sm:$0xff] }
0x2220   :  { %v4484_v6 = vmul.f32 %v5962_v50, %v4481_v19  ;;  %v4482_v3 = vadd.f32 -1.4531521, %v4479_v25  ;;  %v5970_v11 = vpop.eup %5969  ;;  %v4362_v55 = vadd.f32 %v4858_v28, %v7181_v53 }
0x2221   :  { %v4489_v1 = vadd.f32 1.4214138, %v4486_v40 }
0x2222   :  { %v4487_v10 = vadd.f32 1.4214138, %v4484_v6  ;;  %v4485_v14 = vmul.f32 %v5964_v36, %v4482_v3  ;;  %v4374_v20 = vmul.f32 0.70710677, %v4362_v55 }
0x2223   :  { %v4492_v48 = vmul.f32 %v5960_v34, %v4489_v1 }
0x2224   :  { %v4490_v16 = vmul.f32 %v5962_v50, %v4487_v10  ;;  %v4488_v31 = vadd.f32 1.4214138, %v4485_v14  ;;  %vm4395_vm15 = vcmp.ge.f32.partialorder %v4374_v20, 0.0 }
0x2225   :  { %v4495_v35 = vadd.f32 -0.28449672, %v4492_v48 }
0x2226   :  { %v4493_v43 = vadd.f32 -0.28449672, %v4490_v16  ;;  %v4491_v13 = vmul.f32 %v5964_v36, %v4488_v31 }
0x2227   :  { %v4498_v15 = vmul.f32 %v5960_v34, %v4495_v35 }
0x2228   :  { %v4496_v7 = vmul.f32 %v5962_v50, %v4493_v43  ;;  %v4494_v44 = vadd.f32 -0.28449672, %v4491_v13 }
0x2229   :  { %v4501_v18 = vadd.f32 0.2548296, %v4498_v15 }
0x222a   :  { %v4499_v30 = vadd.f32 0.2548296, %v4496_v7  ;;  %v4497_v24 = vmul.f32 %v5964_v36, %v4494_v44 }
0x222b   :  { %v4504_v62 = vmul.f32 %v5960_v34, %v4501_v18 }
0x222c   :  { %v4502_v59 = vmul.f32 %v5962_v50, %v4499_v30  ;;  %v4500_v37 = vadd.f32 0.2548296, %v4497_v24 }
0x222d   :  { %v4519_v33 = vmul.f32 %v5966_v2, %v4504_v62 }
0x222e   :  { %v4517_v8 = vmul.f32 %v5968_v22, %v4502_v59  ;;  %v4503_v4 = vmul.f32 %v5964_v36, %v4500_v37  ;;  %v4375_v36 = vand.u32 2147483647, %v4374_v20 }
0x222f   :  { %v4522_v42 = vsub.f32 1.0, %v4519_v33 }
0x2230   :  { %v4520_v46 = vsub.f32 1.0, %v4517_v8  ;;  %v4518_v39 = vmul.f32 %v5970_v11, %v4503_v4  ;;  %v4376_v56 = vmul.f32 0.3275911, %v4375_v36  ;;  %v4389_v14 = vsub.f32 0.0, %v4375_v36 }
0x2231   :  { %v4528_v12 = vsub.f32 0.0, %v4522_v42 }
0x2232   :  { %v4526_v27 = vsub.f32 0.0, %v4520_v46  ;;  %v4521_v63 = vsub.f32 1.0, %v4518_v39  ;;  %v4377_v9 = vadd.f32 1.0, %v4376_v56  ;;  %v4390_v31 = vmul.f32 %v4389_v14, %v4375_v36 }
0x2233   :  { %v4531_v17 = vsel %vm4525_vm10, %v4522_v42, %v4528_v12 }
0x2234   :  { %v4529_v23 = vsel %vm4523_vm12, %v4520_v46, %v4526_v27  ;;  %v4534_v41 = vadd.f32 1.0, %v4531_v17  ;;  %v4527_v60 = vsub.f32 0.0, %v4521_v63  ;;  %5971 = vrcp.f32 %v4377_v9 }
0x2235   :  { %v4532_v58 = vadd.f32 1.0, %v4529_v23  ;;  %v4391_v15 = vmul.f32 1.442695, %v4390_v31 }
0x2236   :  { %v4530_v34 = vsel %vm4524_vm13, %v4521_v63, %v4527_v60  ;;  %v4537_v5 = vmul.f32 %v4534_v41, %v4459_v47 }
0x2237   :  { %v4533_v50 = vadd.f32 1.0, %v4530_v34  ;;  %v4535_v21 = vmul.f32 %v4532_v58, %v4457_v54  ;;  %v4373_v34 = vmul.f32 0.5, %v4362_v55  ;;  %v5705_v55 = vld [vmem:[%s7248_s1 + $0xf8] sm:$0xff]  }
0x2238   :  { %v4539_v57 = vpack.c.bf16 %v4537_v5, %v4537_v5  ;;  %5557 = vmatpush3.bf16.msra.mxu1 %v5705_v55 }
0x2239   :  { %v4536_v0 = vmul.f32 %v4533_v50, %v4458_v49  ;;  %5558 = vmatprep.subr.bf16.mxu1 %v6005_v52 }
0x223b   :  { %v4538_v45 = vpack.c.bf16 %v4536_v0, %v4535_v21 }
0x223d   :  { %5552 = vmatprep.mubr.bf16.mxu0 %v4538_v45 }
0x223e   :  { %5553 = vmatmul.mubr.bf16.vlgmr.msra.gmra.mrb[100].mxu0 %v4539_v57  ;;  %v5972_v32 = vpop.eup %5971 }
0x223f   :  { %v4380_v19 = vmul.f32 1.0614054, %v5972_v32 }
0x2241   :  { %v4381_v26 = vadd.f32 -1.4531521, %v4380_v19 }
0x2243   :  { %v4382_v1 = vmul.f32 %v5972_v32, %v4381_v26 }
0x2245   :  { %v4383_v48 = vadd.f32 1.4214138, %v4382_v1 }
0x2247   :  { %v4384_v35 = vmul.f32 %v5972_v32, %v4383_v48 }
0x2249   :  { %v4385_v43 = vadd.f32 -0.28449672, %v4384_v35 }
0x224b   :  { %v4386_v7 = vmul.f32 %v5972_v32, %v4385_v43 }
0x224d   :  { %v4387_v30 = vadd.f32 0.2548296, %v4386_v7 }
0x224f   :  { %v4388_v59 = vmul.f32 %v5972_v32, %v4387_v30 }
0x2311   :  { %v5554_v40 = vpop.f32.mrb[100].mxu0 }
0x2312   :  { %v4574_v61 = vpop.f32.mrb[101].mxu0 }
0x2313   :  { %v4575_v25 = vadd.f32 %v4858_v28, %v4574_v61  ;;  %v5555_v6 = vpop.f32.mrb[102].mxu0  ;;  %v4869_v61 = vld [vmem:[%s7249_s2 + $0x17] ss:$0 sm:$0xff] }
0x2314   :  { %v4577_v3 = vpop.f32.mrb[103].mxu0  ;;  %v4870_v6 = vld [vmem:[%s7249_s2 + $0x18] ss:$0 sm:$0xff] }
0x2315   :  { %v4587_v10 = vmul.f32 0.70710677, %v4575_v25  ;;  %v4586_v54 = vmul.f32 0.5, %v4575_v25 }
0x2317   :  { %v4588_v51 = vand.u32 2147483647, %v4587_v10  ;;  %vm4608_vm0 = vcmp.ge.f32.partialorder %v4587_v10, 0.0 }
0x2319   :  { %v4589_v16 = vmul.f32 0.3275911, %v4588_v51  ;;  %v4602_v13 = vsub.f32 0.0, %v4588_v51 }
0x231b   :  { %v4590_v53 = vadd.f32 1.0, %v4589_v16  ;;  %v4603_v44 = vmul.f32 %v4602_v13, %v4588_v51 }
0x231d   :  { %5973 = vrcp.f32 %v4590_v53  ;;  %v4604_v2 = vmul.f32 1.442695, %v4603_v44 }
0x231e   :  { %5975 = vpow2.f32 %v4391_v15 }
0x231f   :  { %5977 = vpow2.f32 %v4604_v2 }
0x2327   :  { %v5974_v18 = vpop.eup %5973 }
0x2328   :  { %v4593_v62 = vmul.f32 1.0614054, %v5974_v18  ;;  %v5976_v37 = vpop.eup %5975 }
0x2329   :  { %v4393_v8 = vmul.f32 %v5976_v37, %v4388_v59  ;;  %v5978_v17 = vpop.eup %5977 }
0x232a   :  { %v4594_v24 = vadd.f32 -1.4531521, %v4593_v62 }
0x232b   :  { %v4394_v11 = vsub.f32 1.0, %v4393_v8 }
0x232c   :  { %v4595_v22 = vmul.f32 %v5974_v18, %v4594_v24 }
0x232d   :  { %v4396_v39 = vsub.f32 0.0, %v4394_v11 }
0x232e   :  { %v4596_v33 = vadd.f32 1.4214138, %v4595_v22 }
0x232f   :  { %v4397_v23 = vsel %vm4395_vm15, %v4394_v11, %v4396_v39 }
0x2330   :  { %v4597_v42 = vmul.f32 %v5974_v18, %v4596_v33  ;;  %v4398_v58 = vadd.f32 1.0, %v4397_v23 }
0x2332   :  { %v4598_v4 = vadd.f32 -0.28449672, %v4597_v42  ;;  %v4399_v50 = vmul.f32 %v4398_v58, %v4373_v34 }
0x2334   :  { %v4599_v46 = vmul.f32 %v5974_v18, %v4598_v4  ;;  %v4400_v0 = vadd.f32 %v4399_v50, %v7021_v38  ;;  %v5706_v38 = vld [vmem:[%s7248_s1 + $0x100] sm:$0xff]  }
0x2335   :  { %5559 = vmatpush3.bf16.msra.mxu1 %v5706_v38 }
0x2336   :  { %v4600_v12 = vadd.f32 0.2548296, %v4599_v46 }
0x2338   :  { %v4601_v27 = vmul.f32 %v5974_v18, %v4600_v12 }
0x233a   :  { %v4606_v63 = vmul.f32 %v5978_v17, %v4601_v27 }
0x233c   :  { %v4607_v41 = vsub.f32 1.0, %v4606_v63 }
0x233e   :  { %v4609_v60 = vsub.f32 0.0, %v4607_v41 }
0x2340   :  { %v4610_v47 = vsel %vm4608_vm0, %v4607_v41, %v4609_v60 }
0x2341   :  { %v4611_v49 = vadd.f32 1.0, %v4610_v47 }
0x2343   :  { %v4612_v5 = vmul.f32 %v4611_v49, %v4586_v54 }
0x2345   :  { %v4613_v21 = vadd.f32 %v4612_v5, %v7174_v29 }
0x2347   :  { %v4615_v45 = vrot.slane %v4613_v21, 7 }
0x2349   :  { %v4617_v57 = vsel %vm463_vm8, %v4400_v0, %v4615_v45  ;;  %vm6021_vm8 = vmmov 0  }
0x234a   :  { %v4619_v28 = vsel %vm4618_vm2, %v4617_v57, 0.0  ;;  %5560 = vmatprep.mubr.msk.bf16.mxu1 %vm6021_vm8, %v6005_v52  ;;  %v4871_v52 = vld [vmem:[%s7249_s2 + $0x19] ss:$0 sm:$0xff] }
0x234b   :  { %4620 = vadd.xlane.f32.xlu0 %v4619_v28 }
0x23d8   :  { %v4621_v20 = vpop.xlane.xlu0 %4620 }
0x23d9   :  { %v4623_v36 = vmul.f32 0.03125, %v4621_v20 }
0x23db   :  { %v4624_v56 = vsub.f32 %v4617_v57, %v4623_v36 }
0x23dd   :  { %v4625_v9 = vmul.f32 %v4624_v56, %v4624_v56 }
0x23df   :  { %v4626_v32 = vsel %vm4618_vm2, %v4625_v9, 0.0 }
0x23e0   :  { %4627 = vadd.xlane.f32.xlu1 %v4626_v32 }
0x246d   :  { %v4628_v29 = vpop.xlane.xlu1 %4627 }
0x246e   :  { %v4629_v19 = vmul.f32 0.03125, %v4628_v29 }
0x2470   :  { %v4630_v26 = vadd.f32 1e-05, %v4629_v19 }
0x2472   :  { %5979 = vrsqrt.f32 %v4630_v26 }
0x247c   :  { %v5980_v40 = vpop.eup %5979 }
0x247d   :  { %v4632_v25 = vmul.f32 %v5980_v40, %v4624_v56 }
0x247f   :  { %v4638_v1 = vmul.f32 %v4869_v61, %v4632_v25 }
0x2481   :  { %v4644_v3 = vadd.f32 %v4870_v6, %v4638_v1 }
0x2483   :  { %v4650_v10 = vpack.c.bf16 %v4644_v3, %v4644_v3 }
0x2485   :  { %5561 = vmatmul.mubr.msk.bf16.vlgmr.msra.gmra.mrb[96].mxu1 %vm208_vm1, %v4650_v10 }
0x2558   :  { %v4704_v51 = vpop.f32.mrb[96].mxu1 }
0x2559   :  { %v4705_v48 = vadd.f32 %v4871_v52, %v4704_v51  ;;  %v5562_v14 = vpop.f32.mrb[97].mxu1 }
0x255a   :  { %v4707_v16 = vpop.f32.mrb[98].mxu1 }
0x255b   :  { %4710 = vst [vmem:[#allocation2] sm:$0x3] %v4705_v48  ;;  %v5563_v53 = vpop.f32.mrb[99].mxu1 }
0x255c   :  { %5992 = shalt.err (!%p5989_p4)
}
0x255d   :  { %s5993_s2 = scalar_lea.hbm %s7250_s3, 32 }
0x255e   :  { %p5994_p5 = scmp.ne.s32.totalorder %s7250_s3, %s5993_s2  ;;  %p5997_p6 = scmp.lt.u32.totalorder %s5993_s2, %s7250_s3 }
0x2560   :  { %p5999_p7 = pnand %p5997_p6, %p5994_p5 }
0x2562   :  { %6002 = shalt.err (!%p5999_p7)
}
0x2563   :  { %4720 = dma.vmem_to_hbm [thread:$0]  %s4718_s21, 32, %s7250_s3, [#allocation3]  }
0x2564   :  { %6003 = dma.done.wait [#allocation3], 32  }
0x2565   :  { %6004 = vsyncadd [#allocation3], 4294967264 }
0x2566   :  { %4724 = vsyncpa [#allocation3], 1 }

</bundles_post_ra>
